<compile_context>
chip_gen: v7x
topology: tpu7x:2x2x1
jax: 0.10.0
libtpu: 0.0.40
codegen_flags: <defaults>
</compile_context>

<pallas_src>
import functools

import jax
import jax.numpy as jnp
from jax import lax
from jax.experimental import pallas as pl
from jax.experimental.pallas import tpu as pltpu

N_NODES = 64
N_EDGES = 256
IN_CHANNELS = 32
HIDDEN_CHANNELS = 32     # heads = 1
OUT_CHANNELS = 16
NEG_SLOPE = 0.2          # GATv2Conv default negative_slope


def _gatv2_gnn_kernel(ch, x_ref, ei_ref, w_ref, misc_ref, w2_ref, o_ref):
    f32 = jnp.float32
    n = o_ref.shape[0]
    c_pad = o_ref.shape[1]
    half = ch // 2
    two_n = 2 * n
    e_cnt = ei_ref.shape[1]

    x = x_ref[...]                                   # [N, C_in+1] (last column = 1)
    src = ei_ref[0:1, :]                             # [1, E] int32 (source j)
    dst = ei_ref[1:2, :]                             # [1, E] int32 (target i)

    # ---- densify the graph on the MXU (bf16 one-hots, exact f32 accumulation) ----
    node_ids = lax.broadcasted_iota(jnp.int32, (n, e_cnt), 0)
    not_self = (src != dst).astype(f32)                              # remove_self_loops
    onehot_dst = ((dst == node_ids).astype(f32) * not_self).astype(jnp.bfloat16)  # [N, E]
    onehot_src = (src == node_ids).astype(jnp.bfloat16)                           # [N, E]
    counts = lax.dot_general(onehot_dst, onehot_src, (((1,), (1,)), ((), ())),
                             preferred_element_type=f32)             # [N, N] mult of j->i
    row_i = lax.broadcasted_iota(jnp.int32, (n, n), 0)
    col_j = lax.broadcasted_iota(jnp.int32, (n, n), 1)
    mult = counts + (row_i == col_j).astype(f32)                     # add_self_loops

    # ---- GATv2 node projections; biases folded via the ones column of x ----
    w = w_ref[...]                                   # [2*Ch, C_in+1] = [[W_l|b_l],[W_r|b_r]]
    xr = lax.dot_general(x, w[ch:, :], (((1,), (1,)), ((), ())),
                         preferred_element_type=f32)                 # [N, Ch] (targets)
    xlT = lax.dot_general(w[:ch, :], x, (((1,), (1,)), ((), ())),
                          preferred_element_type=f32)                # [Ch, N] (sources)

    misc = misc_ref[...]                             # [half+3, W]
    attb_rows = misc[:half, :two_n]                  # [half, 2N] lane-packed b*att rows
    atta = misc[half:half + 1, :ch]                  # [1, Ch]    a*att
    b_conv = misc[half + 1:half + 2, :ch]            # [1, Ch]
    b2 = misc[half + 2:half + 3, :c_pad]             # [1, c_pad]

    # ---- attention logits: e[i,j] = sum_c att_c * leaky_relu(xr[i,c] + xl[j,c]) ----
    # leaky_relu(z) = a*z + b*|z|; the a*z part is rank-1 -> two tiny matvecs (MXU).
    s_r = lax.dot_general(xr, atta, (((1,), (1,)), ((), ())),
                          preferred_element_type=f32)                # [N, 1]
    s_l = lax.dot_general(atta, xlT, (((1,), (0,)), ((), ())),
                          preferred_element_type=f32)                # [1, N]

    # |z| part: two channels lane-packed per [N, 2N] tile, two independent accumulators.
    xlT_pack = jnp.concatenate([xlT[:half, :], xlT[half:, :]], axis=1)   # [half, 2N]
    acc0 = jnp.zeros((n, two_n), f32)
    acc1 = jnp.zeros((n, two_n), f32)
    for c in range(half):                            # small static unroll, pure 2D ops
        xr_pair = jnp.concatenate(
            [jnp.broadcast_to(xr[:, c:c + 1], (n, n)),
             jnp.broadcast_to(xr[:, c + half:c + half + 1], (n, n))], axis=1)
        term = attb_rows[c:c + 1, :] * jnp.abs(xr_pair + xlT_pack[c:c + 1, :])
        if c % 2 == 0:
            acc0 = acc0 + term
        else:
            acc1 = acc1 + term
    acc = acc0 + acc1
    e = (s_r + s_l) + (acc[:, :n] + acc[:, n:])      # [N, N]

    # ---- masked, multiplicity-weighted softmax (normalization deferred) ----
    e_m = jnp.where(mult > 0.0, e, -1e30)
    e_m = e_m - jnp.max(e_m, axis=1, keepdims=True)
    p = mult * jnp.exp(e_m)                          # [N, N] unnormalized
    denom = jnp.sum(p, axis=1, keepdims=True)        # [N, 1]

    # ---- aggregate + conv bias + ELU + final Linear (lane-padded, full-width store) ----
    h = lax.dot_general(p, xlT, (((1,), (1,)), ((), ())),
                        preferred_element_type=f32)                  # [N, Ch]
    h = h * pl.reciprocal(denom, approx=False) + b_conv
    h = jnp.where(h > 0.0, h, jnp.exp(jnp.minimum(h, 0.0)) - 1.0)    # ELU
    y = lax.dot_general(h, w2_ref[...], (((1,), (1,)), ((), ())),
                        preferred_element_type=f32) + b2             # [N, c_pad]
    o_ref[...] = y.astype(o_ref.dtype)


def gatv2_gnn_forward(x, edge_index, edge_weight, wl, bl, wr, br, att, b_conv,
                      w2, b2, negative_slope=NEG_SLOPE):
    """forward(x, edge_index, edge_weight) -> GATv2Conv -> ELU -> Linear."""
    del edge_weight  # TODO(synk): unused (GATv2Conv without edge_dim ignores edge features)
    f32 = jnp.float32
    n, c_in = x.shape
    ch = wl.shape[0]
    c_out = w2.shape[0]
    assert ch % 2 == 0, "lane packing assumes an even number of hidden channels"
    half = ch // 2

    # --- consolidated input slabs ---
    # x augmented with a ones column so projection biases live inside the weight slab.
    x_aug = jnp.concatenate([x.astype(f32), jnp.ones((n, 1), f32)], axis=1)   # [N, C_in+1]
    w_slab = jnp.concatenate(
        [jnp.concatenate([wl.astype(f32), bl.reshape(ch, 1).astype(f32)], axis=1),
         jnp.concatenate([wr.astype(f32), br.reshape(ch, 1).astype(f32)], axis=1)],
        axis=0)                                                               # [2Ch, C_in+1]

    a_coef = 0.5 * (1.0 + float(negative_slope))
    b_coef = 0.5 * (1.0 - float(negative_slope))
    c_pad = 128 * ((c_out + 127) // 128)
    width = max(2 * n, c_pad)

    attb = b_coef * att.astype(f32)                                           # [Ch]
    attb_pack = jnp.concatenate(
        [jnp.broadcast_to(attb[:half, None], (half, n)),
         jnp.broadcast_to(attb[half:, None], (half, n))], axis=1)             # [half, 2N]
    attb_pack = jnp.pad(attb_pack, ((0, 0), (0, width - 2 * n)))
    row_atta = jnp.pad((a_coef * att.astype(f32)).reshape(1, ch),
                       ((0, 0), (0, width - ch)))
    row_bconv = jnp.pad(b_conv.astype(f32).reshape(1, ch), ((0, 0), (0, width - ch)))
    row_b2 = jnp.pad(b2.astype(f32).reshape(1, c_out), ((0, 0), (0, width - c_out)))
    misc = jnp.concatenate([attb_pack, row_atta, row_bconv, row_b2], axis=0)  # [half+3, W]

    # Lane-dense output head: zero-pad the final Linear to 128 output lanes.
    w2p = jnp.pad(w2.astype(f32), ((0, c_pad - c_out), (0, 0)))               # [c_pad, Ch]

    kernel = functools.partial(_gatv2_gnn_kernel, ch)
    out = pl.pallas_call(
        kernel,
        out_shape=jax.ShapeDtypeStruct((n, c_pad), jnp.float32),
        in_specs=[pl.BlockSpec(memory_space=pltpu.MemorySpace.VMEM)] * 5,
        out_specs=pl.BlockSpec(memory_space=pltpu.MemorySpace.VMEM),
    )(x_aug, edge_index.astype(jnp.int32), w_slab, misc, w2p)
    return out[:, :c_out]


def _reference(x, edge_index, edge_weight, wl, bl, wr, br, att, b_conv, w2, b2,
               negative_slope=NEG_SLOPE):
    del edge_weight
    n = x.shape[0]
    src, dst = edge_index[0], edge_index[1]
    w_edges = jnp.where(src == dst, 0.0, 1.0).astype(jnp.float32)
    counts = jnp.zeros((n, n), jnp.float32).at[dst, src].add(w_edges)
    mult = counts + jnp.eye(n, dtype=jnp.float32)
    xl = x @ wl.T + bl[None, :]
    xr = x @ wr.T + br[None, :]
    z = xr[:, None, :] + xl[None, :, :]
    z = jnp.maximum(z, negative_slope * z)
    e = (z * att[None, None, :]).sum(-1)
    e = jnp.where(mult > 0, e, -1e30)
    e = e - e.max(axis=1, keepdims=True)
    p = mult * jnp.exp(e)
    alpha = p / p.sum(axis=1, keepdims=True)
    h = alpha @ xl + b_conv[None, :]
    h = jnp.where(h > 0.0, h, jnp.exp(jnp.minimum(h, 0.0)) - 1.0)
    return h @ w2.T + b2[None, :]


if __name__ == "__main__":
    key = jax.random.PRNGKey(0)
    ks = jax.random.split(key, 12)

    x = jax.random.normal(ks[0], (N_NODES, IN_CHANNELS), jnp.float32)
    src = jax.random.randint(ks[1], (N_EDGES,), 0, N_NODES)
    dst = jax.random.randint(ks[2], (N_EDGES,), 0, N_NODES)
    edge_index = jnp.stack([src, dst]).astype(jnp.int32)               # [2, E]
    edge_weight = jax.random.uniform(ks[3], (N_EDGES,), jnp.float32, 0.5, 1.5)

    b_in = 1.0 / (IN_CHANNELS ** 0.5)
    b_hid = 1.0 / (HIDDEN_CHANNELS ** 0.5)
    wl = jax.random.uniform(ks[4], (HIDDEN_CHANNELS, IN_CHANNELS), jnp.float32, -b_in, b_in)
    bl = jax.random.uniform(ks[5], (HIDDEN_CHANNELS,), jnp.float32, -b_in, b_in)
    wr = jax.random.uniform(ks[6], (HIDDEN_CHANNELS, IN_CHANNELS), jnp.float32, -b_in, b_in)
    br = jax.random.uniform(ks[7], (HIDDEN_CHANNELS,), jnp.float32, -b_in, b_in)
    att = jax.random.uniform(ks[8], (HIDDEN_CHANNELS,), jnp.float32, -b_hid, b_hid)
    b_conv = jax.random.uniform(ks[9], (HIDDEN_CHANNELS,), jnp.float32, -b_hid, b_hid)
    w2 = jax.random.uniform(ks[10], (OUT_CHANNELS, HIDDEN_CHANNELS), jnp.float32, -b_hid, b_hid)
    b2 = jax.random.uniform(ks[11], (OUT_CHANNELS,), jnp.float32, -b_hid, b_hid)

    out = gatv2_gnn_forward(x, edge_index, edge_weight, wl, bl, wr, br, att, b_conv, w2, b2)
    out = jax.block_until_ready(out)

    ref = _reference(x, edge_index, edge_weight, wl, bl, wr, br, att, b_conv, w2, b2)
    assert out.shape == (N_NODES, OUT_CHANNELS)
    err = float(jnp.max(jnp.abs(out - ref)))
    assert jnp.allclose(out, ref, atol=2e-4, rtol=2e-4), err
    print("KERNEL_OK")
</pallas_src>

<mosaic_0001>
module attributes {stable_mosaic.version = 11 : i64} {
  func.func @_gatv2_gnn_kernel(%arg0: memref<64x33xf32, #tpu.memory_space<vmem>>, %arg1: memref<2x256xi32, #tpu.memory_space<vmem>>, %arg2: memref<64x33xf32, #tpu.memory_space<vmem>>, %arg3: memref<19x128xf32, #tpu.memory_space<vmem>>, %arg4: memref<128x32xf32, #tpu.memory_space<vmem>>, %arg5: memref<64x128xf32, #tpu.memory_space<vmem>>) attributes {dimension_semantics = [], scalar_prefetch = 0 : i64, scratch_operands = 0 : i64, tpu.core_type = #tpu.core_type<tc>} {
    %c0 = arith.constant 0 : index
    %c0_0 = arith.constant 0 : index
    %0 = vector.load %arg0[%c0, %c0_0] : memref<64x33xf32, #tpu.memory_space<vmem>>, vector<64x33xf32>
    %c0_1 = arith.constant 0 : index
    %c0_2 = arith.constant 0 : index
    %1 = vector.load %arg1[%c0_1, %c0_2] : memref<2x256xi32, #tpu.memory_space<vmem>>, vector<1x256xi32>
    %c1 = arith.constant 1 : index
    %c0_3 = arith.constant 0 : index
    %2 = vector.load %arg1[%c1, %c0_3] : memref<2x256xi32, #tpu.memory_space<vmem>>, vector<1x256xi32>
    %3 = tpu.iota {dimensions = array<i32: 0>} : vector<64x256xi32>
    %4 = arith.cmpi ne, %1, %2 : vector<1x256xi32>
    %5 = arith.extui %4 : vector<1x256xi1> to vector<1x256xi32>
    %6 = arith.sitofp %5 : vector<1x256xi32> to vector<1x256xf32>
    %7 = vector.broadcast %2 : vector<1x256xi32> to vector<64x256xi32>
    %8 = arith.cmpi eq, %7, %3 : vector<64x256xi32>
    %9 = arith.extui %8 : vector<64x256xi1> to vector<64x256xi32>
    %10 = arith.sitofp %9 : vector<64x256xi32> to vector<64x256xf32>
    %11 = vector.broadcast %6 : vector<1x256xf32> to vector<64x256xf32>
    %12 = arith.mulf %10, %11 : vector<64x256xf32>
    %13 = arith.truncf %12 : vector<64x256xf32> to vector<64x256xbf16>
    %14 = vector.broadcast %1 : vector<1x256xi32> to vector<64x256xi32>
    %15 = arith.cmpi eq, %14, %3 : vector<64x256xi32>
    %16 = arith.extui %15 : vector<64x256xi1> to vector<64x256xi32>
    %17 = arith.sitofp %16 : vector<64x256xi32> to vector<64x256xf32>
    %18 = arith.truncf %17 : vector<64x256xf32> to vector<64x256xbf16>
    %cst = arith.constant dense<0.000000e+00> : vector<64x64xf32>
    %19 = tpu.matmul %13, %18, %cst {dimension_numbers = #tpu.dot_dimension_numbers<[1], [1], [0], [0], [0, 0, 1, 0], [], []>} : vector<64x256xbf16>, vector<64x256xbf16>, vector<64x64xf32> -> vector<64x64xf32>
    %20 = tpu.iota {dimensions = array<i32: 0>} : vector<64x64xi32>
    %21 = tpu.iota {dimensions = array<i32: 1>} : vector<64x64xi32>
    %22 = arith.cmpi eq, %20, %21 : vector<64x64xi32>
    %23 = arith.extui %22 : vector<64x64xi1> to vector<64x64xi32>
    %24 = arith.sitofp %23 : vector<64x64xi32> to vector<64x64xf32>
    %25 = arith.addf %19, %24 : vector<64x64xf32>
    %c0_4 = arith.constant 0 : index
    %c0_5 = arith.constant 0 : index
    %26 = vector.load %arg2[%c0_4, %c0_5] : memref<64x33xf32, #tpu.memory_space<vmem>>, vector<64x33xf32>
    %27 = vector.extract_strided_slice %26 {offsets = [32, 0], sizes = [32, 33], strides = [1, 1]} : vector<64x33xf32> to vector<32x33xf32>
    %cst_6 = arith.constant dense<0.000000e+00> : vector<64x32xf32>
    %28 = tpu.matmul %0, %27, %cst_6 {dimension_numbers = #tpu.dot_dimension_numbers<[1], [1], [0], [0], [0, 0, 1, 0], [], []>} : vector<64x33xf32>, vector<32x33xf32>, vector<64x32xf32> -> vector<64x32xf32>
    %29 = vector.extract_strided_slice %26 {offsets = [0, 0], sizes = [32, 33], strides = [1, 1]} : vector<64x33xf32> to vector<32x33xf32>
    %cst_7 = arith.constant dense<0.000000e+00> : vector<32x64xf32>
    %30 = tpu.matmul %29, %0, %cst_7 {dimension_numbers = #tpu.dot_dimension_numbers<[1], [1], [0], [0], [0, 0, 1, 0], [], []>} : vector<32x33xf32>, vector<64x33xf32>, vector<32x64xf32> -> vector<32x64xf32>
    %c0_8 = arith.constant 0 : index
    %c0_9 = arith.constant 0 : index
    %31 = vector.load %arg3[%c0_8, %c0_9] : memref<19x128xf32, #tpu.memory_space<vmem>>, vector<19x128xf32>
    %32 = vector.extract_strided_slice %31 {offsets = [0, 0], sizes = [16, 128], strides = [1, 1]} : vector<19x128xf32> to vector<16x128xf32>
    %33 = vector.extract_strided_slice %31 {offsets = [16, 0], sizes = [1, 32], strides = [1, 1]} : vector<19x128xf32> to vector<1x32xf32>
    %34 = vector.extract_strided_slice %31 {offsets = [17, 0], sizes = [1, 32], strides = [1, 1]} : vector<19x128xf32> to vector<1x32xf32>
    %35 = vector.extract_strided_slice %31 {offsets = [18, 0], sizes = [1, 128], strides = [1, 1]} : vector<19x128xf32> to vector<1x128xf32>
    %cst_10 = arith.constant dense<0.000000e+00> : vector<64x1xf32>
    %36 = tpu.matmul %28, %33, %cst_10 {dimension_numbers = #tpu.dot_dimension_numbers<[1], [1], [0], [0], [0, 0, 1, 0], [], []>} : vector<64x32xf32>, vector<1x32xf32>, vector<64x1xf32> -> vector<64x1xf32>
    %cst_11 = arith.constant dense<0.000000e+00> : vector<1x64xf32>
    %37 = tpu.matmul %33, %30, %cst_11 {dimension_numbers = #tpu.dot_dimension_numbers<[1], [0], [0], [1], [0, 0, 1, 1], [], []>} : vector<1x32xf32>, vector<32x64xf32>, vector<1x64xf32> -> vector<1x64xf32>
    %38 = vector.extract_strided_slice %30 {offsets = [0, 0], sizes = [16, 64], strides = [1, 1]} : vector<32x64xf32> to vector<16x64xf32>
    %39 = vector.extract_strided_slice %30 {offsets = [16, 0], sizes = [16, 64], strides = [1, 1]} : vector<32x64xf32> to vector<16x64xf32>
    %40 = tpu.concatenate %38, %39 in 1 : vector<16x64xf32>, vector<16x64xf32> -> vector<16x128xf32>
    %cst_12 = arith.constant 0.000000e+00 : f32
    %41 = vector.broadcast %cst_12 : f32 to vector<64x128xf32>
    %cst_13 = arith.constant 0.000000e+00 : f32
    %42 = vector.broadcast %cst_13 : f32 to vector<64x128xf32>
    %43 = vector.extract_strided_slice %28 {offsets = [0, 0], sizes = [64, 1], strides = [1, 1]} : vector<64x32xf32> to vector<64x1xf32>
    %44 = vector.shape_cast %43 : vector<64x1xf32> to vector<64x1xf32>
    %45 = vector.broadcast %44 : vector<64x1xf32> to vector<64x64xf32>
    %46 = vector.extract_strided_slice %28 {offsets = [0, 16], sizes = [64, 1], strides = [1, 1]} : vector<64x32xf32> to vector<64x1xf32>
    %47 = vector.shape_cast %46 : vector<64x1xf32> to vector<64x1xf32>
    %48 = vector.broadcast %47 : vector<64x1xf32> to vector<64x64xf32>
    %49 = tpu.concatenate %45, %48 in 1 : vector<64x64xf32>, vector<64x64xf32> -> vector<64x128xf32>
    %50 = vector.extract_strided_slice %32 {offsets = [0, 0], sizes = [1, 128], strides = [1, 1]} : vector<16x128xf32> to vector<1x128xf32>
    %51 = vector.extract_strided_slice %40 {offsets = [0, 0], sizes = [1, 128], strides = [1, 1]} : vector<16x128xf32> to vector<1x128xf32>
    %52 = vector.broadcast %51 : vector<1x128xf32> to vector<64x128xf32>
    %53 = arith.addf %49, %52 : vector<64x128xf32>
    %54 = math.absf %53 : vector<64x128xf32>
    %55 = vector.broadcast %50 : vector<1x128xf32> to vector<64x128xf32>
    %56 = arith.mulf %55, %54 : vector<64x128xf32>
    %57 = arith.addf %41, %56 : vector<64x128xf32>
    %58 = vector.extract_strided_slice %28 {offsets = [0, 1], sizes = [64, 1], strides = [1, 1]} : vector<64x32xf32> to vector<64x1xf32>
    %59 = vector.shape_cast %58 : vector<64x1xf32> to vector<64x1xf32>
    %60 = vector.broadcast %59 : vector<64x1xf32> to vector<64x64xf32>
    %61 = vector.extract_strided_slice %28 {offsets = [0, 17], sizes = [64, 1], strides = [1, 1]} : vector<64x32xf32> to vector<64x1xf32>
    %62 = vector.shape_cast %61 : vector<64x1xf32> to vector<64x1xf32>
    %63 = vector.broadcast %62 : vector<64x1xf32> to vector<64x64xf32>
    %64 = tpu.concatenate %60, %63 in 1 : vector<64x64xf32>, vector<64x64xf32> -> vector<64x128xf32>
    %65 = vector.extract_strided_slice %32 {offsets = [1, 0], sizes = [1, 128], strides = [1, 1]} : vector<16x128xf32> to vector<1x128xf32>
    %66 = vector.extract_strided_slice %40 {offsets = [1, 0], sizes = [1, 128], strides = [1, 1]} : vector<16x128xf32> to vector<1x128xf32>
    %67 = vector.broadcast %66 : vector<1x128xf32> to vector<64x128xf32>
    %68 = arith.addf %64, %67 : vector<64x128xf32>
    %69 = math.absf %68 : vector<64x128xf32>
    %70 = vector.broadcast %65 : vector<1x128xf32> to vector<64x128xf32>
    %71 = arith.mulf %70, %69 : vector<64x128xf32>
    %72 = arith.addf %42, %71 : vector<64x128xf32>
    %73 = vector.extract_strided_slice %28 {offsets = [0, 2], sizes = [64, 1], strides = [1, 1]} : vector<64x32xf32> to vector<64x1xf32>
    %74 = vector.shape_cast %73 : vector<64x1xf32> to vector<64x1xf32>
    %75 = vector.broadcast %74 : vector<64x1xf32> to vector<64x64xf32>
    %76 = vector.extract_strided_slice %28 {offsets = [0, 18], sizes = [64, 1], strides = [1, 1]} : vector<64x32xf32> to vector<64x1xf32>
    %77 = vector.shape_cast %76 : vector<64x1xf32> to vector<64x1xf32>
    %78 = vector.broadcast %77 : vector<64x1xf32> to vector<64x64xf32>
    %79 = tpu.concatenate %75, %78 in 1 : vector<64x64xf32>, vector<64x64xf32> -> vector<64x128xf32>
    %80 = vector.extract_strided_slice %32 {offsets = [2, 0], sizes = [1, 128], strides = [1, 1]} : vector<16x128xf32> to vector<1x128xf32>
    %81 = vector.extract_strided_slice %40 {offsets = [2, 0], sizes = [1, 128], strides = [1, 1]} : vector<16x128xf32> to vector<1x128xf32>
    %82 = vector.broadcast %81 : vector<1x128xf32> to vector<64x128xf32>
    %83 = arith.addf %79, %82 : vector<64x128xf32>
    %84 = math.absf %83 : vector<64x128xf32>
    %85 = vector.broadcast %80 : vector<1x128xf32> to vector<64x128xf32>
    %86 = arith.mulf %85, %84 : vector<64x128xf32>
    %87 = arith.addf %57, %86 : vector<64x128xf32>
    %88 = vector.extract_strided_slice %28 {offsets = [0, 3], sizes = [64, 1], strides = [1, 1]} : vector<64x32xf32> to vector<64x1xf32>
    %89 = vector.shape_cast %88 : vector<64x1xf32> to vector<64x1xf32>
    %90 = vector.broadcast %89 : vector<64x1xf32> to vector<64x64xf32>
    %91 = vector.extract_strided_slice %28 {offsets = [0, 19], sizes = [64, 1], strides = [1, 1]} : vector<64x32xf32> to vector<64x1xf32>
    %92 = vector.shape_cast %91 : vector<64x1xf32> to vector<64x1xf32>
    %93 = vector.broadcast %92 : vector<64x1xf32> to vector<64x64xf32>
    %94 = tpu.concatenate %90, %93 in 1 : vector<64x64xf32>, vector<64x64xf32> -> vector<64x128xf32>
    %95 = vector.extract_strided_slice %32 {offsets = [3, 0], sizes = [1, 128], strides = [1, 1]} : vector<16x128xf32> to vector<1x128xf32>
    %96 = vector.extract_strided_slice %40 {offsets = [3, 0], sizes = [1, 128], strides = [1, 1]} : vector<16x128xf32> to vector<1x128xf32>
    %97 = vector.broadcast %96 : vector<1x128xf32> to vector<64x128xf32>
    %98 = arith.addf %94, %97 : vector<64x128xf32>
    %99 = math.absf %98 : vector<64x128xf32>
    %100 = vector.broadcast %95 : vector<1x128xf32> to vector<64x128xf32>
    %101 = arith.mulf %100, %99 : vector<64x128xf32>
    %102 = arith.addf %72, %101 : vector<64x128xf32>
    %103 = vector.extract_strided_slice %28 {offsets = [0, 4], sizes = [64, 1], strides = [1, 1]} : vector<64x32xf32> to vector<64x1xf32>
    %104 = vector.shape_cast %103 : vector<64x1xf32> to vector<64x1xf32>
    %105 = vector.broadcast %104 : vector<64x1xf32> to vector<64x64xf32>
    %106 = vector.extract_strided_slice %28 {offsets = [0, 20], sizes = [64, 1], strides = [1, 1]} : vector<64x32xf32> to vector<64x1xf32>
    %107 = vector.shape_cast %106 : vector<64x1xf32> to vector<64x1xf32>
    %108 = vector.broadcast %107 : vector<64x1xf32> to vector<64x64xf32>
    %109 = tpu.concatenate %105, %108 in 1 : vector<64x64xf32>, vector<64x64xf32> -> vector<64x128xf32>
    %110 = vector.extract_strided_slice %32 {offsets = [4, 0], sizes = [1, 128], strides = [1, 1]} : vector<16x128xf32> to vector<1x128xf32>
    %111 = vector.extract_strided_slice %40 {offsets = [4, 0], sizes = [1, 128], strides = [1, 1]} : vector<16x128xf32> to vector<1x128xf32>
    %112 = vector.broadcast %111 : vector<1x128xf32> to vector<64x128xf32>
    %113 = arith.addf %109, %112 : vector<64x128xf32>
    %114 = math.absf %113 : vector<64x128xf32>
    %115 = vector.broadcast %110 : vector<1x128xf32> to vector<64x128xf32>
    %116 = arith.mulf %115, %114 : vector<64x128xf32>
    %117 = arith.addf %87, %116 : vector<64x128xf32>
    %118 = vector.extract_strided_slice %28 {offsets = [0, 5], sizes = [64, 1], strides = [1, 1]} : vector<64x32xf32> to vector<64x1xf32>
    %119 = vector.shape_cast %118 : vector<64x1xf32> to vector<64x1xf32>
    %120 = vector.broadcast %119 : vector<64x1xf32> to vector<64x64xf32>
    %121 = vector.extract_strided_slice %28 {offsets = [0, 21], sizes = [64, 1], strides = [1, 1]} : vector<64x32xf32> to vector<64x1xf32>
    %122 = vector.shape_cast %121 : vector<64x1xf32> to vector<64x1xf32>
    %123 = vector.broadcast %122 : vector<64x1xf32> to vector<64x64xf32>
    %124 = tpu.concatenate %120, %123 in 1 : vector<64x64xf32>, vector<64x64xf32> -> vector<64x128xf32>
    %125 = vector.extract_strided_slice %32 {offsets = [5, 0], sizes = [1, 128], strides = [1, 1]} : vector<16x128xf32> to vector<1x128xf32>
    %126 = vector.extract_strided_slice %40 {offsets = [5, 0], sizes = [1, 128], strides = [1, 1]} : vector<16x128xf32> to vector<1x128xf32>
    %127 = vector.broadcast %126 : vector<1x128xf32> to vector<64x128xf32>
    %128 = arith.addf %124, %127 : vector<64x128xf32>
    %129 = math.absf %128 : vector<64x128xf32>
    %130 = vector.broadcast %125 : vector<1x128xf32> to vector<64x128xf32>
    %131 = arith.mulf %130, %129 : vector<64x128xf32>
    %132 = arith.addf %102, %131 : vector<64x128xf32>
    %133 = vector.extract_strided_slice %28 {offsets = [0, 6], sizes = [64, 1], strides = [1, 1]} : vector<64x32xf32> to vector<64x1xf32>
    %134 = vector.shape_cast %133 : vector<64x1xf32> to vector<64x1xf32>
    %135 = vector.broadcast %134 : vector<64x1xf32> to vector<64x64xf32>
    %136 = vector.extract_strided_slice %28 {offsets = [0, 22], sizes = [64, 1], strides = [1, 1]} : vector<64x32xf32> to vector<64x1xf32>
    %137 = vector.shape_cast %136 : vector<64x1xf32> to vector<64x1xf32>
    %138 = vector.broadcast %137 : vector<64x1xf32> to vector<64x64xf32>
    %139 = tpu.concatenate %135, %138 in 1 : vector<64x64xf32>, vector<64x64xf32> -> vector<64x128xf32>
    %140 = vector.extract_strided_slice %32 {offsets = [6, 0], sizes = [1, 128], strides = [1, 1]} : vector<16x128xf32> to vector<1x128xf32>
    %141 = vector.extract_strided_slice %40 {offsets = [6, 0], sizes = [1, 128], strides = [1, 1]} : vector<16x128xf32> to vector<1x128xf32>
    %142 = vector.broadcast %141 : vector<1x128xf32> to vector<64x128xf32>
    %143 = arith.addf %139, %142 : vector<64x128xf32>
    %144 = math.absf %143 : vector<64x128xf32>
    %145 = vector.broadcast %140 : vector<1x128xf32> to vector<64x128xf32>
    %146 = arith.mulf %145, %144 : vector<64x128xf32>
    %147 = arith.addf %117, %146 : vector<64x128xf32>
    %148 = vector.extract_strided_slice %28 {offsets = [0, 7], sizes = [64, 1], strides = [1, 1]} : vector<64x32xf32> to vector<64x1xf32>
    %149 = vector.shape_cast %148 : vector<64x1xf32> to vector<64x1xf32>
    %150 = vector.broadcast %149 : vector<64x1xf32> to vector<64x64xf32>
    %151 = vector.extract_strided_slice %28 {offsets = [0, 23], sizes = [64, 1], strides = [1, 1]} : vector<64x32xf32> to vector<64x1xf32>
    %152 = vector.shape_cast %151 : vector<64x1xf32> to vector<64x1xf32>
    %153 = vector.broadcast %152 : vector<64x1xf32> to vector<64x64xf32>
    %154 = tpu.concatenate %150, %153 in 1 : vector<64x64xf32>, vector<64x64xf32> -> vector<64x128xf32>
    %155 = vector.extract_strided_slice %32 {offsets = [7, 0], sizes = [1, 128], strides = [1, 1]} : vector<16x128xf32> to vector<1x128xf32>
    %156 = vector.extract_strided_slice %40 {offsets = [7, 0], sizes = [1, 128], strides = [1, 1]} : vector<16x128xf32> to vector<1x128xf32>
    %157 = vector.broadcast %156 : vector<1x128xf32> to vector<64x128xf32>
    %158 = arith.addf %154, %157 : vector<64x128xf32>
    %159 = math.absf %158 : vector<64x128xf32>
    %160 = vector.broadcast %155 : vector<1x128xf32> to vector<64x128xf32>
    %161 = arith.mulf %160, %159 : vector<64x128xf32>
    %162 = arith.addf %132, %161 : vector<64x128xf32>
    %163 = vector.extract_strided_slice %28 {offsets = [0, 8], sizes = [64, 1], strides = [1, 1]} : vector<64x32xf32> to vector<64x1xf32>
    %164 = vector.shape_cast %163 : vector<64x1xf32> to vector<64x1xf32>
    %165 = vector.broadcast %164 : vector<64x1xf32> to vector<64x64xf32>
    %166 = vector.extract_strided_slice %28 {offsets = [0, 24], sizes = [64, 1], strides = [1, 1]} : vector<64x32xf32> to vector<64x1xf32>
    %167 = vector.shape_cast %166 : vector<64x1xf32> to vector<64x1xf32>
    %168 = vector.broadcast %167 : vector<64x1xf32> to vector<64x64xf32>
    %169 = tpu.concatenate %165, %168 in 1 : vector<64x64xf32>, vector<64x64xf32> -> vector<64x128xf32>
    %170 = vector.extract_strided_slice %32 {offsets = [8, 0], sizes = [1, 128], strides = [1, 1]} : vector<16x128xf32> to vector<1x128xf32>
    %171 = vector.extract_strided_slice %40 {offsets = [8, 0], sizes = [1, 128], strides = [1, 1]} : vector<16x128xf32> to vector<1x128xf32>
    %172 = vector.broadcast %171 : vector<1x128xf32> to vector<64x128xf32>
    %173 = arith.addf %169, %172 : vector<64x128xf32>
    %174 = math.absf %173 : vector<64x128xf32>
    %175 = vector.broadcast %170 : vector<1x128xf32> to vector<64x128xf32>
    %176 = arith.mulf %175, %174 : vector<64x128xf32>
    %177 = arith.addf %147, %176 : vector<64x128xf32>
    %178 = vector.extract_strided_slice %28 {offsets = [0, 9], sizes = [64, 1], strides = [1, 1]} : vector<64x32xf32> to vector<64x1xf32>
    %179 = vector.shape_cast %178 : vector<64x1xf32> to vector<64x1xf32>
    %180 = vector.broadcast %179 : vector<64x1xf32> to vector<64x64xf32>
    %181 = vector.extract_strided_slice %28 {offsets = [0, 25], sizes = [64, 1], strides = [1, 1]} : vector<64x32xf32> to vector<64x1xf32>
    %182 = vector.shape_cast %181 : vector<64x1xf32> to vector<64x1xf32>
    %183 = vector.broadcast %182 : vector<64x1xf32> to vector<64x64xf32>
    %184 = tpu.concatenate %180, %183 in 1 : vector<64x64xf32>, vector<64x64xf32> -> vector<64x128xf32>
    %185 = vector.extract_strided_slice %32 {offsets = [9, 0], sizes = [1, 128], strides = [1, 1]} : vector<16x128xf32> to vector<1x128xf32>
    %186 = vector.extract_strided_slice %40 {offsets = [9, 0], sizes = [1, 128], strides = [1, 1]} : vector<16x128xf32> to vector<1x128xf32>
    %187 = vector.broadcast %186 : vector<1x128xf32> to vector<64x128xf32>
    %188 = arith.addf %184, %187 : vector<64x128xf32>
    %189 = math.absf %188 : vector<64x128xf32>
    %190 = vector.broadcast %185 : vector<1x128xf32> to vector<64x128xf32>
    %191 = arith.mulf %190, %189 : vector<64x128xf32>
    %192 = arith.addf %162, %191 : vector<64x128xf32>
    %193 = vector.extract_strided_slice %28 {offsets = [0, 10], sizes = [64, 1], strides = [1, 1]} : vector<64x32xf32> to vector<64x1xf32>
    %194 = vector.shape_cast %193 : vector<64x1xf32> to vector<64x1xf32>
    %195 = vector.broadcast %194 : vector<64x1xf32> to vector<64x64xf32>
    %196 = vector.extract_strided_slice %28 {offsets = [0, 26], sizes = [64, 1], strides = [1, 1]} : vector<64x32xf32> to vector<64x1xf32>
    %197 = vector.shape_cast %196 : vector<64x1xf32> to vector<64x1xf32>
    %198 = vector.broadcast %197 : vector<64x1xf32> to vector<64x64xf32>
    %199 = tpu.concatenate %195, %198 in 1 : vector<64x64xf32>, vector<64x64xf32> -> vector<64x128xf32>
    %200 = vector.extract_strided_slice %32 {offsets = [10, 0], sizes = [1, 128], strides = [1, 1]} : vector<16x128xf32> to vector<1x128xf32>
    %201 = vector.extract_strided_slice %40 {offsets = [10, 0], sizes = [1, 128], strides = [1, 1]} : vector<16x128xf32> to vector<1x128xf32>
    %202 = vector.broadcast %201 : vector<1x128xf32> to vector<64x128xf32>
    %203 = arith.addf %199, %202 : vector<64x128xf32>
    %204 = math.absf %203 : vector<64x128xf32>
    %205 = vector.broadcast %200 : vector<1x128xf32> to vector<64x128xf32>
    %206 = arith.mulf %205, %204 : vector<64x128xf32>
    %207 = arith.addf %177, %206 : vector<64x128xf32>
    %208 = vector.extract_strided_slice %28 {offsets = [0, 11], sizes = [64, 1], strides = [1, 1]} : vector<64x32xf32> to vector<64x1xf32>
    %209 = vector.shape_cast %208 : vector<64x1xf32> to vector<64x1xf32>
    %210 = vector.broadcast %209 : vector<64x1xf32> to vector<64x64xf32>
    %211 = vector.extract_strided_slice %28 {offsets = [0, 27], sizes = [64, 1], strides = [1, 1]} : vector<64x32xf32> to vector<64x1xf32>
    %212 = vector.shape_cast %211 : vector<64x1xf32> to vector<64x1xf32>
    %213 = vector.broadcast %212 : vector<64x1xf32> to vector<64x64xf32>
    %214 = tpu.concatenate %210, %213 in 1 : vector<64x64xf32>, vector<64x64xf32> -> vector<64x128xf32>
    %215 = vector.extract_strided_slice %32 {offsets = [11, 0], sizes = [1, 128], strides = [1, 1]} : vector<16x128xf32> to vector<1x128xf32>
    %216 = vector.extract_strided_slice %40 {offsets = [11, 0], sizes = [1, 128], strides = [1, 1]} : vector<16x128xf32> to vector<1x128xf32>
    %217 = vector.broadcast %216 : vector<1x128xf32> to vector<64x128xf32>
    %218 = arith.addf %214, %217 : vector<64x128xf32>
    %219 = math.absf %218 : vector<64x128xf32>
    %220 = vector.broadcast %215 : vector<1x128xf32> to vector<64x128xf32>
    %221 = arith.mulf %220, %219 : vector<64x128xf32>
    %222 = arith.addf %192, %221 : vector<64x128xf32>
    %223 = vector.extract_strided_slice %28 {offsets = [0, 12], sizes = [64, 1], strides = [1, 1]} : vector<64x32xf32> to vector<64x1xf32>
    %224 = vector.shape_cast %223 : vector<64x1xf32> to vector<64x1xf32>
    %225 = vector.broadcast %224 : vector<64x1xf32> to vector<64x64xf32>
    %226 = vector.extract_strided_slice %28 {offsets = [0, 28], sizes = [64, 1], strides = [1, 1]} : vector<64x32xf32> to vector<64x1xf32>
    %227 = vector.shape_cast %226 : vector<64x1xf32> to vector<64x1xf32>
    %228 = vector.broadcast %227 : vector<64x1xf32> to vector<64x64xf32>
    %229 = tpu.concatenate %225, %228 in 1 : vector<64x64xf32>, vector<64x64xf32> -> vector<64x128xf32>
    %230 = vector.extract_strided_slice %32 {offsets = [12, 0], sizes = [1, 128], strides = [1, 1]} : vector<16x128xf32> to vector<1x128xf32>
    %231 = vector.extract_strided_slice %40 {offsets = [12, 0], sizes = [1, 128], strides = [1, 1]} : vector<16x128xf32> to vector<1x128xf32>
    %232 = vector.broadcast %231 : vector<1x128xf32> to vector<64x128xf32>
    %233 = arith.addf %229, %232 : vector<64x128xf32>
    %234 = math.absf %233 : vector<64x128xf32>
    %235 = vector.broadcast %230 : vector<1x128xf32> to vector<64x128xf32>
    %236 = arith.mulf %235, %234 : vector<64x128xf32>
    %237 = arith.addf %207, %236 : vector<64x128xf32>
    %238 = vector.extract_strided_slice %28 {offsets = [0, 13], sizes = [64, 1], strides = [1, 1]} : vector<64x32xf32> to vector<64x1xf32>
    %239 = vector.shape_cast %238 : vector<64x1xf32> to vector<64x1xf32>
    %240 = vector.broadcast %239 : vector<64x1xf32> to vector<64x64xf32>
    %241 = vector.extract_strided_slice %28 {offsets = [0, 29], sizes = [64, 1], strides = [1, 1]} : vector<64x32xf32> to vector<64x1xf32>
    %242 = vector.shape_cast %241 : vector<64x1xf32> to vector<64x1xf32>
    %243 = vector.broadcast %242 : vector<64x1xf32> to vector<64x64xf32>
    %244 = tpu.concatenate %240, %243 in 1 : vector<64x64xf32>, vector<64x64xf32> -> vector<64x128xf32>
    %245 = vector.extract_strided_slice %32 {offsets = [13, 0], sizes = [1, 128], strides = [1, 1]} : vector<16x128xf32> to vector<1x128xf32>
    %246 = vector.extract_strided_slice %40 {offsets = [13, 0], sizes = [1, 128], strides = [1, 1]} : vector<16x128xf32> to vector<1x128xf32>
    %247 = vector.broadcast %246 : vector<1x128xf32> to vector<64x128xf32>
    %248 = arith.addf %244, %247 : vector<64x128xf32>
    %249 = math.absf %248 : vector<64x128xf32>
    %250 = vector.broadcast %245 : vector<1x128xf32> to vector<64x128xf32>
    %251 = arith.mulf %250, %249 : vector<64x128xf32>
    %252 = arith.addf %222, %251 : vector<64x128xf32>
    %253 = vector.extract_strided_slice %28 {offsets = [0, 14], sizes = [64, 1], strides = [1, 1]} : vector<64x32xf32> to vector<64x1xf32>
    %254 = vector.shape_cast %253 : vector<64x1xf32> to vector<64x1xf32>
    %255 = vector.broadcast %254 : vector<64x1xf32> to vector<64x64xf32>
    %256 = vector.extract_strided_slice %28 {offsets = [0, 30], sizes = [64, 1], strides = [1, 1]} : vector<64x32xf32> to vector<64x1xf32>
    %257 = vector.shape_cast %256 : vector<64x1xf32> to vector<64x1xf32>
    %258 = vector.broadcast %257 : vector<64x1xf32> to vector<64x64xf32>
    %259 = tpu.concatenate %255, %258 in 1 : vector<64x64xf32>, vector<64x64xf32> -> vector<64x128xf32>
    %260 = vector.extract_strided_slice %32 {offsets = [14, 0], sizes = [1, 128], strides = [1, 1]} : vector<16x128xf32> to vector<1x128xf32>
    %261 = vector.extract_strided_slice %40 {offsets = [14, 0], sizes = [1, 128], strides = [1, 1]} : vector<16x128xf32> to vector<1x128xf32>
    %262 = vector.broadcast %261 : vector<1x128xf32> to vector<64x128xf32>
    %263 = arith.addf %259, %262 : vector<64x128xf32>
    %264 = math.absf %263 : vector<64x128xf32>
    %265 = vector.broadcast %260 : vector<1x128xf32> to vector<64x128xf32>
    %266 = arith.mulf %265, %264 : vector<64x128xf32>
    %267 = arith.addf %237, %266 : vector<64x128xf32>
    %268 = vector.extract_strided_slice %28 {offsets = [0, 15], sizes = [64, 1], strides = [1, 1]} : vector<64x32xf32> to vector<64x1xf32>
    %269 = vector.shape_cast %268 : vector<64x1xf32> to vector<64x1xf32>
    %270 = vector.broadcast %269 : vector<64x1xf32> to vector<64x64xf32>
    %271 = vector.extract_strided_slice %28 {offsets = [0, 31], sizes = [64, 1], strides = [1, 1]} : vector<64x32xf32> to vector<64x1xf32>
    %272 = vector.shape_cast %271 : vector<64x1xf32> to vector<64x1xf32>
    %273 = vector.broadcast %272 : vector<64x1xf32> to vector<64x64xf32>
    %274 = tpu.concatenate %270, %273 in 1 : vector<64x64xf32>, vector<64x64xf32> -> vector<64x128xf32>
    %275 = vector.extract_strided_slice %32 {offsets = [15, 0], sizes = [1, 128], strides = [1, 1]} : vector<16x128xf32> to vector<1x128xf32>
    %276 = vector.extract_strided_slice %40 {offsets = [15, 0], sizes = [1, 128], strides = [1, 1]} : vector<16x128xf32> to vector<1x128xf32>
    %277 = vector.broadcast %276 : vector<1x128xf32> to vector<64x128xf32>
    %278 = arith.addf %274, %277 : vector<64x128xf32>
    %279 = math.absf %278 : vector<64x128xf32>
    %280 = vector.broadcast %275 : vector<1x128xf32> to vector<64x128xf32>
    %281 = arith.mulf %280, %279 : vector<64x128xf32>
    %282 = arith.addf %252, %281 : vector<64x128xf32>
    %283 = arith.addf %267, %282 : vector<64x128xf32>
    %284 = vector.broadcast %36 : vector<64x1xf32> to vector<64x64xf32>
    %285 = vector.broadcast %37 : vector<1x64xf32> to vector<64x64xf32>
    %286 = arith.addf %284, %285 : vector<64x64xf32>
    %287 = vector.extract_strided_slice %283 {offsets = [0, 0], sizes = [64, 64], strides = [1, 1]} : vector<64x128xf32> to vector<64x64xf32>
    %288 = vector.extract_strided_slice %283 {offsets = [0, 64], sizes = [64, 64], strides = [1, 1]} : vector<64x128xf32> to vector<64x64xf32>
    %289 = arith.addf %287, %288 : vector<64x64xf32>
    %290 = arith.addf %286, %289 : vector<64x64xf32>
    %cst_14 = arith.constant 0.000000e+00 : f32
    %291 = vector.broadcast %cst_14 : f32 to vector<64x64xf32>
    %292 = arith.cmpf ogt, %25, %291 : vector<64x64xf32>
    %cst_15 = arith.constant -1.000000e+30 : f32
    %293 = vector.broadcast %cst_15 : f32 to vector<64x64xf32>
    %294 = arith.select %292, %290, %293 : vector<64x64xi1>, vector<64x64xf32>
    %cst_16 = arith.constant dense<0xFF800000> : vector<64xf32>
    %295 = vector.multi_reduction <maximumf>, %294, %cst_16 [1] : vector<64x64xf32> to vector<64xf32>
    %296 = vector.shape_cast %295 : vector<64xf32> to vector<64x1xf32>
    %297 = vector.broadcast %296 : vector<64x1xf32> to vector<64x64xf32>
    %298 = arith.subf %294, %297 : vector<64x64xf32>
    %299 = math.exp %298 : vector<64x64xf32>
    %300 = arith.mulf %25, %299 : vector<64x64xf32>
    %cst_17 = arith.constant dense<0.000000e+00> : vector<64xf32>
    %301 = vector.multi_reduction <add>, %300, %cst_17 [1] : vector<64x64xf32> to vector<64xf32>
    %302 = vector.shape_cast %301 : vector<64xf32> to vector<64x1xf32>
    %cst_18 = arith.constant dense<0.000000e+00> : vector<64x32xf32>
    %303 = tpu.matmul %300, %30, %cst_18 {dimension_numbers = #tpu.dot_dimension_numbers<[1], [1], [0], [0], [0, 0, 1, 0], [], []>} : vector<64x64xf32>, vector<32x64xf32>, vector<64x32xf32> -> vector<64x32xf32>
    %304 = tpu.reciprocal %302 : vector<64x1xf32> -> vector<64x1xf32>
    %305 = vector.broadcast %304 : vector<64x1xf32> to vector<64x32xf32>
    %306 = arith.mulf %303, %305 : vector<64x32xf32>
    %307 = vector.broadcast %34 : vector<1x32xf32> to vector<64x32xf32>
    %308 = arith.addf %306, %307 : vector<64x32xf32>
    %cst_19 = arith.constant 0.000000e+00 : f32
    %309 = vector.broadcast %cst_19 : f32 to vector<64x32xf32>
    %310 = arith.cmpf ogt, %308, %309 : vector<64x32xf32>
    %cst_20 = arith.constant 0.000000e+00 : f32
    %311 = vector.broadcast %cst_20 : f32 to vector<64x32xf32>
    %312 = arith.minimumf %308, %311 : vector<64x32xf32>
    %313 = math.exp %312 : vector<64x32xf32>
    %cst_21 = arith.constant 1.000000e+00 : f32
    %314 = vector.broadcast %cst_21 : f32 to vector<64x32xf32>
    %315 = arith.subf %313, %314 : vector<64x32xf32>
    %316 = arith.select %310, %308, %315 : vector<64x32xi1>, vector<64x32xf32>
    %c0_22 = arith.constant 0 : index
    %c0_23 = arith.constant 0 : index
    %317 = vector.load %arg4[%c0_22, %c0_23] : memref<128x32xf32, #tpu.memory_space<vmem>>, vector<128x32xf32>
    %cst_24 = arith.constant dense<0.000000e+00> : vector<64x128xf32>
    %318 = tpu.matmul %316, %317, %cst_24 {dimension_numbers = #tpu.dot_dimension_numbers<[1], [1], [0], [0], [0, 0, 1, 0], [], []>} : vector<64x32xf32>, vector<128x32xf32>, vector<64x128xf32> -> vector<64x128xf32>
    %319 = vector.broadcast %35 : vector<1x128xf32> to vector<64x128xf32>
    %320 = arith.addf %318, %319 : vector<64x128xf32>
    %c0_25 = arith.constant 0 : index
    %c0_26 = arith.constant 0 : index
    %321 = vector.load %arg5[%c0_25, %c0_26] : memref<64x128xf32, #tpu.memory_space<vmem>>, vector<64x128xf32>
    tpu.vector_store %arg5[%c0_25, %c0_26], %320 {strides = array<i32>} : memref<64x128xf32, #tpu.memory_space<vmem>>, vector<64x128xf32>,
    return
  }
}

</mosaic_0001>

<bundles_post_ra>
// kernel: tpu_custom_call.1
= control target key start
LH: loop header
LB: loop body
LE: loop exit
PB: predicated region body
PF: predicated region fallthrough
CT: control target
= control target key end

     0   :  { %vm299_vm0 = vcmask 269312   ;;  %v33_v2 = vlaneseq  ;;  %v6260_v11 = vmov 16   ;;  %v6250_v16 = vmov 0   ;;  %s6232_s0 = inlined_call_operand.vmem [shape: f32[64,33], index: 0, kind: input, shape index: {}]   ;;  %s6233_s1 = inlined_call_operand.vmem [shape: s32[2,256], index: 1, kind: input, shape index: {}]   ;;  %s6234_s2 = inlined_call_operand.vmem [shape: f32[64,33], index: 2, kind: input, shape index: {}]   ;;  %s6235_s3 = inlined_call_operand.vmem [shape: f32[19,128], index: 3, kind: input, shape index: {}]   ;;  %s6236_s4 = inlined_call_operand.vmem [shape: f32[128,32], index: 4, kind: input, shape index: {}]   ;;  %s6237_s5 = inlined_call_operand.hbm [shape: f32[64,128], index: 5, kind: output, shape index: {}]  }
   0x1   :  { %v295_v0 = vld [vmem:[%s6234_s2 + $0x20] sm:$0xff]  ;;  %v296_v1 = vld [vmem:[%s6234_s2 + $0x28] sm:$0xff]  ;;  %vm3883_vm1 = vmpackc.low %vm299_vm0, %vm299_vm0  ;;  %3514 = vset.pattern.permute.xlu0 %v6260_v11  ;;  %3513 = vset.pattern.permute.xlu1 %v6250_v16  ;;  %v6238_v21 = vmov 0.0  }
   0x2   :  { %v3371_v3 = vpack.c.bf16 %v296_v1, %v295_v0  ;;  %v297_v5 = vld [vmem:[%s6234_s2 + $0x30] sm:$0xff]  ;;  %v298_v6 = vld [vmem:[%s6234_s2 + $0x38] sm:$0xff]  ;;  %v3894_v7 = vshrl.u32 %v33_v2, 7  ;;  %v3899_v9 = vld [vmem:[%s6232_s0] sm:$0xff] }
   0x3   :  { %v3377_v8 = vpack.c.bf16 %v298_v6, %v297_v5  ;;  %v3904_v10 = vld [vmem:[%s6233_s1 + $0x1] ss:$2 sm:$0x3]  ;;  %v30_v12 = vld [vmem:[%s6233_s1] ss:$2 sm:$0x3]  ;;  %3262 = vmatprep.mubr.msk.f32.mxu1 %vm299_vm0, %v3899_v9 }
   0x4   :  { %6376 = vst [vmem:[#allocation5_spill] sm:$0xff] %v3894_v7  ;;  %3373 = vmatprep.subr.msk.bf16.mxu1 %vm3883_vm1, %v3371_v3  ;;  %v3917_v13 = vadd.s32 8, %v3894_v7  ;;  %v3920_v14 = vsub.s32 1, %v3894_v7  ;;  %v3923_v15 = vsub.s32 0, %v3894_v7  ;;  %vm42_vm2 = vcmp.ne.s32.totalorder %v30_v12, %v3904_v10 }
   0x5   :  { %3376 = vmatpush3.bf16.xpose.msk.msra.mxu1 %vm3883_vm1, %v3371_v3  ;;  %v3930_v17 = vadd.s32 16, %v3894_v7  ;;  %v3933_v18 = vadd.s32 24, %v3894_v7  ;;  %v3940_v22 = vsel %vm42_vm2, 1.0, %v6238_v21 }
   0x6   :  { %6377 = vst [vmem:[#allocation6_spill] sm:$0xff] %v3917_v13  ;;  %6378 = vst [vmem:[#allocation7_spill] sm:$0xff] %v3920_v14  ;;  %3379 = vmatprep.subr.msk.bf16.mxu1 %vm3883_vm1, %v3377_v8  ;;  %v143_v19 = vrot.slane %v30_v12, %v3920_v14  ;;  %v3937_v20 = vrot.slane %v30_v12, %v3923_v15  ;;  %v3944_v23 = vrot.slane %v3904_v10, %v3920_v14 }
   0x7   :  { %6379 = vst [vmem:[#allocation8_spill] sm:$0xff] %v3923_v15  ;;  %6380 = vst [vmem:[#allocation9_spill] sm:$0xff] %v3930_v17 }
   0x8   :  { %6381 = vst [vmem:[#allocation10_spill] sm:$0xff] %v3933_v18 }
   0x9   :  { %10 = vsyncpa [#allocation3], 0  ;;  %vm145_vm3 = vcmp.eq.s32.totalorder %v143_v19, %v3894_v7  ;;  %vm147_vm4 = vcmp.eq.s32.totalorder %v143_v19, %v3917_v13  ;;  %vm144_vm5 = vcmp.eq.s32.totalorder %v3937_v20, %v3894_v7  ;;  %vm146_vm6 = vcmp.eq.s32.totalorder %v3937_v20, %v3917_v13  ;;  %v23_v32 = vld [vmem:[%s6232_s0 + $0x8] sm:$0xff]  ;;  %v24_v36 = vld [vmem:[%s6232_s0 + $0x10] sm:$0xff]  ;;  %s3825_s28 = smov 64  }
   0xa   :  { %vm3104_vm7 = vmpackc.low %vm147_vm4, %vm145_vm3  ;;  %vm149_vm8 = vcmp.eq.s32.totalorder %v143_v19, %v3930_v17  ;;  %vm151_vm9 = vcmp.eq.s32.totalorder %v143_v19, %v3933_v18  ;;  %v3808_v24 = vmov 1.0|1.0   ;;  %v3956_v25 = vadd.s32 32, %v3894_v7  ;;  %v25_v37 = vld [vmem:[%s6232_s0 + $0x18] sm:$0xff]  ;;  %v26_v38 = vld [vmem:[%s6232_s0 + $0x20] sm:$0xff] }
   0xb   :  { %3105 = vmatprep.subr.msk.bf16.mxu0 %vm3104_vm7, %v3808_v24  ;;  %vm3106_vm10 = vmpackc.low %vm146_vm6, %vm144_vm5  ;;  %v3959_v26 = vadd.s32 40, %v3894_v7  ;;  %v3963_v27 = vrot.slane %v3940_v22, %v3920_v14  ;;  %vm54_vm12 = vcmp.eq.s32.totalorder %v3944_v23, %v3894_v7  ;;  %vm56_vm13 = vcmp.eq.s32.totalorder %v3944_v23, %v3917_v13  ;;  %v27_v40 = vld [vmem:[%s6232_s0 + $0x28] sm:$0xff]  ;;  %v4024_v41 = vld [vmem:[%s6232_s0 + $0x30] sm:$0xff] }
   0xc   :  { %6382 = vst [vmem:[#allocation11_spill] sm:$0xff] %v3956_v25  ;;  %3107 = vmatpush1.bf16.xpose.msk.msra.mxu0 %vm3106_vm10, %v3808_v24  ;;  %vm3108_vm11 = vmpackc.low %vm151_vm9, %vm149_vm8  ;;  %vm148_vm14 = vcmp.eq.s32.totalorder %v3937_v20, %v3930_v17  ;;  %vm150_vm15 = vcmp.eq.s32.totalorder %v3937_v20, %v3933_v18  ;;  %v3065_v28 = vsel %vm54_vm12, 1.0, %v6238_v21  ;;  %v3067_v29 = vsel %vm56_vm13, 1.0, %v6238_v21  ;;  %v29_v43 = vld [vmem:[%s6232_s0 + $0x38] sm:$0xff] }
   0xd   :  { %6383 = vst [vmem:[#allocation12_spill] sm:$0xff] %v3959_v26  ;;  %3382 = vmatpush3.bf16.xpose.msk.msra.mxu1 %vm3883_vm1, %v3377_v8  ;;  %3109 = vmatprep.subr.msk.bf16.mxu0 %vm3108_vm11, %v3808_v24  ;;  %vm153_vm2 = vcmp.eq.s32.totalorder %v143_v19, %v3956_v25  ;;  %vm155_vm3 = vcmp.eq.s32.totalorder %v143_v19, %v3959_v26  ;;  %vm3110_vm4 = vmpackc.low %vm150_vm15, %vm148_vm14  ;;  %v3987_v34 = vadd.s32 48, %v3894_v7  ;;  %v3990_v35 = vadd.s32 56, %v3894_v7 }
   0xe   :  { %v113_v30 = vmul.f32 %v3065_v28, %v3963_v27  ;;  %v115_v31 = vmul.f32 %v3067_v29, %v3963_v27  ;;  %vm3112_vm5 = vmpackc.low %vm155_vm3, %vm153_vm2  ;;  %vm152_vm6 = vcmp.eq.s32.totalorder %v3937_v20, %v3956_v25  ;;  %vm154_vm7 = vcmp.eq.s32.totalorder %v3937_v20, %v3959_v26 }
   0xf   :  { %vm157_vm8 = vcmp.eq.s32.totalorder %v143_v19, %v3987_v34  ;;  %vm159_vm9 = vcmp.eq.s32.totalorder %v143_v19, %v3990_v35  ;;  %vm3114_vm10 = vmpackc.low %vm154_vm7, %vm152_vm6  ;;  %v4014_v39 = vrot.slane %v3904_v10, %v3923_v15  ;;  %vm156_vm14 = vcmp.eq.s32.totalorder %v3937_v20, %v3987_v34 }
  0x10   :  { %v129_v33 = vpack.c.bf16 %v115_v31, %v113_v30  ;;  %vm3116_vm11 = vmpackc.low %vm159_vm9, %vm157_vm8  ;;  %vm158_vm15 = vcmp.eq.s32.totalorder %v3937_v20, %v3990_v35  ;;  %vm58_vm2 = vcmp.eq.s32.totalorder %v3944_v23, %v3930_v17  ;;  %vm60_vm3 = vcmp.eq.s32.totalorder %v3944_v23, %v3933_v18 }
  0x11   :  { %vm53_vm12 = vcmp.eq.s32.totalorder %v4014_v39, %v3894_v7  ;;  %vm55_vm13 = vcmp.eq.s32.totalorder %v4014_v39, %v3917_v13  ;;  %v105_v42 = vrot.slane %v3940_v22, %v3923_v15  ;;  %v3383_v46 = vpack.c.bf16 %v23_v32, %v3899_v9 }
  0x12   :  { %258 = vmatprep.mubr.bf16.mxu0 %v129_v33  ;;  %v3064_v44 = vsel %vm53_vm12, 1.0, %v6238_v21  ;;  %v3066_v45 = vsel %vm55_vm13, 1.0, %v6238_v21  ;;  %v3069_v47 = vsel %vm58_vm2, 1.0, %v6238_v21  ;;  %v3071_v48 = vsel %vm60_vm3, 1.0, %v6238_v21  ;;  %v292_v33 = vld [vmem:[%s6234_s2 + $0x8] sm:$0xff] }
  0x13   :  { %v112_v49 = vmul.f32 %v3064_v44, %v105_v42  ;;  %v114_v50 = vmul.f32 %v3066_v45, %v105_v42  ;;  %v117_v51 = vmul.f32 %v3069_v47, %v3963_v27  ;;  %v119_v52 = vmul.f32 %v3071_v48, %v3963_v27 }
  0x14   :  { %3111 = vmatpush1.bf16.xpose.msk.msra.mxu0 %vm3110_vm4, %v3808_v24  ;;  %3263 = vmatmul.mubr.msk.f32.vlgmr.msra.gmra.mrb[0].mxu1 %vm299_vm0, %v23_v32  ;;  %vm3118_vm4 = vmpackc.low %vm158_vm15, %vm156_vm14  ;;  %vm59_vm6 = vcmp.eq.s32.totalorder %v4014_v39, %v3933_v18  ;;  %vm62_vm7 = vcmp.eq.s32.totalorder %v3944_v23, %v3956_v25  ;;  %vm64_vm8 = vcmp.eq.s32.totalorder %v3944_v23, %v3959_v26  ;;  %v291_v32 = vld [vmem:[%s6234_s2] sm:$0xff]  ;;  %v3809_v4 = vmov 0.0|0.0  }
  0x15   :  { %3113 = vmatprep.subr.msk.bf16.mxu0 %vm3112_vm5, %v3808_v24  ;;  %3265 = vmatprep.mubr.msk.f32.mxu1 %vm299_vm0, %v24_v36  ;;  %vm57_vm5 = vcmp.eq.s32.totalorder %v4014_v39, %v3930_v17  ;;  %v128_v53 = vpack.c.bf16 %v114_v50, %v112_v49  ;;  %v131_v54 = vpack.c.bf16 %v119_v52, %v117_v51  ;;  %v3070_v56 = vsel %vm59_vm6, 1.0, %v6238_v21 }
  0x16   :  { %v3068_v55 = vsel %vm57_vm5, 1.0, %v6238_v21  ;;  %v3389_v57 = vpack.c.bf16 %v25_v37, %v24_v36  ;;  %v3073_v58 = vsel %vm62_vm7, 1.0, %v6238_v21  ;;  %v3075_v59 = vsel %vm64_vm8, 1.0, %v6238_v21  ;;  %v293_v36 = vld [vmem:[%s6234_s2 + $0x10] sm:$0xff] }
  0x17   :  { %v116_v60 = vmul.f32 %v3068_v55, %v105_v42  ;;  %v118_v61 = vmul.f32 %v3070_v56, %v105_v42  ;;  %v121_v62 = vmul.f32 %v3073_v58, %v3963_v27  ;;  %v123_v63 = vmul.f32 %v3075_v59, %v3963_v27 }
  0x18   :  { %3266 = vmatmul.mubr.msk.f32.gmra.mrb[2].mxu1 %vm299_vm0, %v25_v37  ;;  %vm61_vm9 = vcmp.eq.s32.totalorder %v4014_v39, %v3956_v25  ;;  %vm68_vm12 = vcmp.eq.s32.totalorder %v3944_v23, %v3990_v35  ;;  %v3395_v6 = vpack.c.bf16 %v27_v40, %v26_v38  ;;  %vm65_vm13 = vcmp.eq.s32.totalorder %v4014_v39, %v3987_v34  ;;  %v294_v37 = vld [vmem:[%s6234_s2 + $0x18] sm:$0xff] }
  0x19   :  { %3268 = vmatprep.mubr.msk.f32.mxu1 %vm299_vm0, %v26_v38  ;;  %v130_v0 = vpack.c.bf16 %v118_v61, %v116_v60  ;;  %v133_v1 = vpack.c.bf16 %v123_v63, %v121_v62  ;;  %v3072_v3 = vsel %vm61_vm9, 1.0, %v6238_v21  ;;  %v3079_v9 = vsel %vm68_vm12, 1.0, %v6238_v21 }
  0x1a   :  { %v120_v10 = vmul.f32 %v3072_v3, %v105_v42  ;;  %v127_v20 = vmul.f32 %v3079_v9, %v3963_v27  ;;  %vm67_vm14 = vcmp.eq.s32.totalorder %v4014_v39, %v3990_v35  ;;  %v3401_v29 = vpack.c.bf16 %v29_v43, %v4024_v41 }
  0x1b   :  { %v3078_v28 = vsel %vm67_vm14, 1.0, %v6238_v21  ;;  %v6254_v44 = vmov 18   ;;  %v6256_v45 = vmov 2   ;;  %v6251_v47 = vmov 19  }
  0x1c   :  { %3115 = vmatpush1.bf16.xpose.msk.msra.mxu0 %vm3114_vm10, %v3808_v24  ;;  %3269 = vmatmul.mubr.msk.f32.gmra.mrb[4].mxu1 %vm299_vm0, %v27_v40  ;;  %vm63_vm10 = vcmp.eq.s32.totalorder %v4014_v39, %v3959_v26  ;;  %v6259_v48 = vmov 3   ;;  %v6246_v49 = vmov 20   ;;  %v6263_v50 = vmov 4  }
  0x1d   :  { %3117 = vmatprep.subr.msk.bf16.mxu0 %vm3116_vm11, %v3808_v24  ;;  %3271 = vmatprep.mubr.msk.f32.mxu1 %vm299_vm0, %v4024_v41  ;;  %vm66_vm11 = vcmp.eq.s32.totalorder %v3944_v23, %v3987_v34  ;;  %v3074_v5 = vsel %vm63_vm10, 1.0, %v6238_v21  ;;  %v6257_v41 = vmov 17   ;;  %v4176_v63 = vand.u32 127, %v33_v2 }
  0x1e   :  { %v3077_v8 = vsel %vm66_vm11, 1.0, %v6238_v21  ;;  %v122_v12 = vmul.f32 %v3074_v5, %v105_v42  ;;  %vm553_vm2 = vcmask 261120   ;;  %vm659_vm3 = vcmask 523264  }
  0x1f   :  { %v125_v19 = vmul.f32 %v3077_v8, %v3963_v27  ;;  %v126_v27 = vmul.f32 %v3078_v28, %v105_v42  ;;  %6391 = vst [vmem:[#allocation20_spill] sm:$0xff] %v4176_v63  ;;  %vm209_vm15 = vcmp.eq.s32.totalorder %v3990_v35, %v4176_v63 }
  0x20   :  { %3272 = vmatmul.mubr.msk.f32.gmra.mrb[6].mxu1 %vm299_vm0, %v29_v43  ;;  %v132_v22 = vpack.c.bf16 %v122_v12, %v120_v10  ;;  %v3103_v8 = vsel %vm209_vm15, 1.0, %v6238_v21 }
  0x21   :  { %v135_v23 = vpack.c.bf16 %v127_v20, %v125_v19 }
  0x24   :  { %3119 = vmatpush1.bf16.xpose.msk.msra.mxu0 %vm3118_vm4, %v3808_v24  ;;  %v3076_v24 = vsel %vm65_vm13, 1.0, %v6238_v21  ;;  %vm3414_vm4 = vmpackc.low %vm659_vm3, %vm659_vm3 }
  0x25   :  { %3385 = vmatprep.subr.msk.bf16.mxu0 %vm3883_vm1, %v3383_v46  ;;  %v124_v30 = vmul.f32 %v3076_v24, %v105_v42  ;;  %v6253_v42 = vmov 1  }
  0x27   :  { %v134_v31 = vpack.c.bf16 %v126_v27, %v124_v30  ;;  %v6242_v30 = vmov 22   ;;  %v6240_v27 = vmov 7  }
  0x2b   :  { %259 = vmatmul.mubr.bf16.vlgmr.msra.gmra.mrb[0].mxu0 %v128_v53  ;;  %v6248_v53 = vmov 21  }
  0x2c   :  { %3388 = vmatpush3.bf16.xpose.msk.msra.mxu0 %vm3883_vm1, %v3383_v46  ;;  %266 = vmatprep.mubr.bf16.mxu0 %v131_v54  ;;  %v6266_v54 = vmov 5  }
  0x2d   :  { %3391 = vmatprep.subr.msk.bf16.mxu0 %vm3883_vm1, %v3389_v57 }
  0x33   :  { %267 = vmatmul.mubr.bf16.gmra.mrb[4].mxu0 %v130_v0 }
  0x34   :  { %3394 = vmatpush3.bf16.xpose.msk.msra.mxu0 %vm3883_vm1, %v3389_v57  ;;  %274 = vmatprep.mubr.bf16.mxu0 %v133_v1  ;;  %v6244_v57 = vmov 6  }
  0x35   :  { %3397 = vmatprep.subr.msk.bf16.mxu0 %vm3883_vm1, %v3395_v6 }
  0x3b   :  { %275 = vmatmul.mubr.bf16.gmra.mrb[8].mxu0 %v132_v22 }
  0x3c   :  { %3400 = vmatpush3.bf16.xpose.msk.msra.mxu0 %vm3883_vm1, %v3395_v6  ;;  %282 = vmatprep.mubr.bf16.mxu0 %v135_v23 }
  0x3d   :  { %3403 = vmatprep.subr.msk.bf16.mxu0 %vm3883_vm1, %v3401_v29 }
  0x43   :  { %283 = vmatmul.mubr.bf16.gmra.mrb[12].mxu0 %v134_v31 }
  0x44   :  { %3406 = vmatpush3.bf16.xpose.msk.msra.mxu0 %vm3883_vm1, %v3401_v29  ;;  %3290 = vmatprep.mubr.msk.f32.mxu0 %vm299_vm0, %v291_v32  ;;  %vm3810_vm1 = vmmov 0   ;;  %v540_v29 = vld [vmem:[%s6235_s3 + $0x10] sm:$0x7] }
  0x45   :  { %3407 = vmatprep.subr.bf16.mxu0 %v3809_v4  ;;  %v4241_v31 = vrot.slane %v540_v29, %v3923_v15 }
  0x4b   :  { %3291 = vmatmul.mubr.msk.f32.vlgmr.msra.gmra.mrb[16].mxu0 %vm299_vm0, %v292_v33 }
  0x4c   :  { %3293 = vmatprep.mubr.msk.f32.mxu0 %vm299_vm0, %v293_v36 }
  0x4f   :  { %3294 = vmatmul.mubr.msk.f32.gmra.mrb[18].mxu0 %vm299_vm0, %v294_v37  ;;  %vm208_vm0 = vcmp.eq.s32.totalorder %v3987_v34, %v4176_v63 }
  0x50   :  { %3304 = vmatprep.mubr.msk.f32.mxu0 %vm3810_vm1, %v6238_v21  ;;  %v3102_v2 = vsel %vm208_vm0, 1.0, %v6238_v21 }
  0xe7   :  { %v4125_v38 = vpop.f32.mrb[0].mxu1 }
  0xe8   :  { %707 = vperm.xlu0 %3514, %v4125_v38   ;;  %669 = vperm.xlu1 %3513, %v4125_v38   ;;  %v4129_v39 = vpop.f32.mrb[1].mxu1  ;;  %v546_v32 = vmul.f32 %v4125_v38, %v4241_v31 }
  0xe9   :  { %v545_v36 = vmul.f32 %v4241_v31, %v4129_v39 }
  0xea   :  { %v557_v33 = vsel %vm553_vm2, %v546_v32, 0.0 }
  0xeb   :  { %v4131_v40 = vpop.f32.mrb[2].mxu1  ;;  %v554_v37 = vsel %vm553_vm2, %v545_v36, 0.0 }
  0xec   :  { %3516 = vset.pattern.permute.xlu0 %v6257_v41  ;;  %3515 = vset.pattern.permute.xlu1 %v6253_v42  ;;  %v4135_v43 = vpop.f32.mrb[3].mxu1 }
  0xed   :  { %6384 = vst [vmem:[#allocation13_spill] sm:$0xff] %v4135_v43  ;;  %819 = vperm.xlu0 %3516, %v4125_v38   ;;  %787 = vperm.xlu1 %3515, %v4125_v38  }
  0xef   :  { %v4143_v46 = vpop.f32.mrb[4].mxu1 }
  0xf0   :  { %6385 = vst [vmem:[#allocation14_spill] sm:$0xff] %v4143_v46  ;;  %v4186_v5 = vpop.f32.mrb[5].mxu1 }
  0xf1   :  { %3518 = vset.pattern.permute.xlu0 %v6254_v44  ;;  %3517 = vset.pattern.permute.xlu1 %v6256_v45  ;;  %6393 = vst [vmem:[#allocation22_spill] sm:$0xff] %v4186_v5  ;;  %v549_v36 = vmul.f32 %v4241_v31, %v4186_v5 }
  0xf2   :  { %931 = vperm.xlu0 %3518, %v4125_v38   ;;  %899 = vperm.xlu1 %3517, %v4125_v38  }
  0xf6   :  { %3520 = vset.pattern.permute.xlu0 %v6251_v47  ;;  %3519 = vset.pattern.permute.xlu1 %v6259_v48 }
  0xf7   :  { %1043 = vperm.xlu0 %3520, %v4125_v38   ;;  %1011 = vperm.xlu1 %3519, %v4125_v38  }
  0xfb   :  { %3522 = vset.pattern.permute.xlu0 %v6246_v49  ;;  %3521 = vset.pattern.permute.xlu1 %v6263_v50 }
  0xfc   :  { %1155 = vperm.xlu0 %3522, %v4125_v38   ;;  %1123 = vperm.xlu1 %3521, %v4125_v38  }
  0xfe   :  { %v4153_v51 = vpop.f32.mrb[0].mxu0 }
  0xff   :  { %6386 = vst [vmem:[#allocation15_spill] sm:$0xff] %v4153_v51  ;;  %v262_v52 = vpop.f32.mrb[1].mxu0  ;;  %v6412_v51 = vmov 21  }
 0x100   :  { %3524 = vset.pattern.permute.xlu0 %v6248_v53  ;;  %3523 = vset.pattern.permute.xlu1 %v6266_v54  ;;  %v4157_v55 = vpop.f32.mrb[2].mxu0 }
 0x101   :  { %6387 = vst [vmem:[#allocation16_spill] sm:$0xff] %v4157_v55  ;;  %1267 = vperm.xlu0 %3524, %v4125_v38   ;;  %1235 = vperm.xlu1 %3523, %v4125_v38   ;;  %v265_v56 = vpop.f32.mrb[3].mxu0  ;;  %v6407_v55 = vmov 19  }
 0x105   :  { %3528 = vset.pattern.permute.xlu0 %v6253_v42  ;;  %3525 = vset.pattern.permute.xlu1 %v6244_v57 }
 0x106   :  { %1347 = vperm.xlu1 %3525, %v4125_v38   ;;  %783 = vperm.xlu0 %3528, %v4129_v39   ;;  %v4165_v58 = vpop.f32.mrb[4].mxu0 }
 0x107   :  { %6388 = vst [vmem:[#allocation17_spill] sm:$0xff] %v4165_v58  ;;  %v270_v59 = vpop.f32.mrb[5].mxu0 }
 0x108   :  { %v4167_v60 = vpop.f32.mrb[6].mxu0 }
 0x109   :  { %6389 = vst [vmem:[#allocation18_spill] sm:$0xff] %v4167_v60  ;;  %v273_v61 = vpop.f32.mrb[7].mxu0  ;;  %v6410_v60 = vmov 20  }
 0x10a   :  { %3526 = vset.pattern.permute.xlu1 %v6250_v16  ;;  %3530 = vset.pattern.permute.xlu0 %v6256_v45 }
 0x10b   :  { %895 = vperm.xlu0 %3530, %v4129_v39   ;;  %664 = vperm.xlu1 %3526, %v4129_v39  }
 0x10e   :  { %v4173_v62 = vpop.f32.mrb[8].mxu0 }
 0x10f   :  { %6390 = vst [vmem:[#allocation19_spill] sm:$0xff] %v4173_v62  ;;  %3532 = vset.pattern.permute.xlu0 %v6259_v48  ;;  %3527 = vset.pattern.permute.xlu1 %v6260_v11  ;;  %v278_v0 = vpop.f32.mrb[9].mxu0  ;;  %v6405_v62 = vmov 18  }
 0x110   :  { %1007 = vperm.xlu0 %3532, %v4129_v39   ;;  %703 = vperm.xlu1 %3527, %v4129_v39   ;;  %v4182_v1 = vpop.f32.mrb[10].mxu0 }
 0x111   :  { %6392 = vst [vmem:[#allocation21_spill] sm:$0xff] %v4182_v1  ;;  %v281_v3 = vpop.f32.mrb[11].mxu0  ;;  %v6403_v1 = vmov 17  }
 0x114   :  { %3534 = vset.pattern.permute.xlu0 %v6263_v50  ;;  %3529 = vset.pattern.permute.xlu1 %v6257_v41 }
 0x115   :  { %1119 = vperm.xlu0 %3534, %v4129_v39   ;;  %815 = vperm.xlu1 %3529, %v4129_v39  }
 0x116   :  { %v284_v6 = vpop.f32.mrb[12].mxu0 }
 0x117   :  { %v4196_v9 = vadd.f32 %v3102_v2, %v284_v6  ;;  %v286_v34 = vpop.f32.mrb[13].mxu0  ;;  %v548_v2 = vmul.f32 %v4131_v40, %v4241_v31 }
 0x118   :  { %v287_v10 = vpop.f32.mrb[14].mxu0  ;;  %v547_v34 = vmul.f32 %v4241_v31, %v4135_v43 }
 0x119   :  { %6394 = vst [vmem:[#allocation23_spill] sm:$0xff] %v4196_v9  ;;  %3536 = vset.pattern.permute.xlu0 %v6266_v54  ;;  %3531 = vset.pattern.permute.xlu1 %v6254_v44  ;;  %v4200_v35 = vadd.f32 %v3103_v8, %v287_v10  ;;  %v289_v12 = vpop.f32.mrb[15].mxu0  ;;  %v563_v8 = vsel %vm553_vm2, %v548_v2, 0.0  ;;  %v566_v2 = vsel %vm553_vm2, %v549_v36, 0.0 }
 0x11a   :  { %1231 = vperm.xlu0 %3536, %v4129_v39   ;;  %927 = vperm.xlu1 %3531, %v4129_v39   ;;  %v560_v10 = vsel %vm553_vm2, %v547_v34, 0.0 }
 0x11b   :  { %6395 = vst [vmem:[#allocation24_spill] sm:$0xff] %v4200_v35 }
 0x11e   :  { %v4204_v19 = vpop.f32.mrb[16].mxu0  ;;  %3538 = vset.pattern.permute.xlu0 %v6244_v57  ;;  %3533 = vset.pattern.permute.xlu1 %v6251_v47 }
 0x11f   :  { %6396 = vst [vmem:[#allocation25_spill] sm:$0xff] %v4204_v19  ;;  %v4208_v20 = vpop.f32.mrb[17].mxu0  ;;  %1343 = vperm.xlu0 %3538, %v4129_v39   ;;  %1039 = vperm.xlu1 %3533, %v4129_v39  }
 0x120   :  { %v4214_v22 = vpack.c.bf16 %v4204_v19, %v4208_v20 }
 0x122   :  { %v4216_v23 = vpop.f32.mrb[18].mxu0  ;;  %3409 = vmatpush3.bf16.msra.mxu0 %v4214_v22 }
 0x123   :  { %v4219_v24 = vpop.f32.mrb[19].mxu0  ;;  %3535 = vset.pattern.permute.xlu1 %v6246_v49  ;;  %3410 = vmatprep.subr.bf16.mxu0 %v3809_v4  ;;  %v4269_v4 = vpop.f32.mrb[6].mxu1 }
 0x124   :  { %v4225_v28 = vpack.c.bf16 %v4216_v23, %v4219_v24  ;;  %1151 = vperm.xlu1 %3535, %v4129_v39   ;;  %3543 = vset.pattern.permute.xlu0 %v6253_v42  ;;  %v4296_v52 = vpop.f32.mrb[7].mxu1 }
 0x125   :  { %6397 = vst [vmem:[#allocation26_spill] sm:$0xff] %v4296_v52 }
 0x126   :  { %3412 = vmatpush3.bf16.msra.mxu0 %v4225_v28 }
 0x127   :  { %3415 = vmatprep.subr.msk.bf16.mxu0 %vm3414_vm4, %v4214_v22 }
 0x128   :  { %3537 = vset.pattern.permute.xlu1 %v6248_v53 }
 0x129   :  { %3305 = vmatmul.mubr.msk.f32.vlgmr.msra.gmra.mrb[20].mxu0 %vm553_vm2, %v540_v29  ;;  %1263 = vperm.xlu1 %3537, %v4129_v39  }
 0x12d   :  { %3539 = vset.pattern.permute.xlu1 %v6242_v30 }
 0x12e   :  { %1375 = vperm.xlu1 %3539, %v4129_v39  }
 0x12f   :  { %3418 = vmatpush3.bf16.xpose.msk.msra.mxu0 %vm3414_vm4, %v4214_v22 }
 0x130   :  { %3421 = vmatprep.subr.msk.bf16.mxu0 %vm3414_vm4, %v4225_v28 }
 0x132   :  { %3540 = vset.pattern.permute.xlu1 %v6240_v27 }
 0x133   :  { %1455 = vperm.xlu1 %3540, %v4129_v39  }
 0x137   :  { %3541 = vset.pattern.permute.xlu1 %v6250_v16  ;;  %3424 = vmatpush3.bf16.xpose.msk.msra.mxu0 %vm3414_vm4, %v4225_v28 }
 0x138   :  { %679 = vperm.xlu1 %3541, %v4131_v40  }
 0x13c   :  { %3542 = vset.pattern.permute.xlu1 %v6260_v11 }
 0x13d   :  { %715 = vperm.xlu1 %3542, %v4131_v40  }
 0x13e   :  { %558 = vadd.xlane.f32.xlu0 %v557_v33 }
 0x141   :  { %3544 = vset.pattern.permute.xlu1 %v6257_v41 }
 0x142   :  { %555 = vadd.xlane.f32.xlu0 %v554_v37  ;;  %827 = vperm.xlu1 %3544, %v4131_v40  }
 0x146   :  { %3546 = vset.pattern.permute.xlu1 %v6254_v44 }
 0x147   :  { %939 = vperm.xlu1 %3546, %v4131_v40  }
 0x14b   :  { %3548 = vset.pattern.permute.xlu1 %v6251_v47 }
 0x14c   :  { %1051 = vperm.xlu1 %3548, %v4131_v40  }
 0x150   :  { %3550 = vset.pattern.permute.xlu1 %v6246_v49 }
 0x151   :  { %1163 = vperm.xlu1 %3550, %v4131_v40  }
 0x155   :  { %3552 = vset.pattern.permute.xlu1 %v6248_v53 }
 0x156   :  { %1275 = vperm.xlu1 %3552, %v4131_v40  }
 0x158   :  { %795 = vperm.xlu0 %3543, %v4131_v40  }
 0x15a   :  { %3554 = vset.pattern.permute.xlu1 %v6260_v11 }
 0x15b   :  { %711 = vperm.xlu1 %3554, %v4135_v43  }
 0x15c   :  { %3545 = vset.pattern.permute.xlu0 %v6256_v45 }
 0x15d   :  { %907 = vperm.xlu0 %3545, %v4131_v40  }
 0x15f   :  { %3555 = vset.pattern.permute.xlu1 %v6253_v42 }
 0x160   :  { %791 = vperm.xlu1 %3555, %v4135_v43  }
 0x161   :  { %3547 = vset.pattern.permute.xlu0 %v6259_v48 }
 0x162   :  { %1019 = vperm.xlu0 %3547, %v4131_v40  }
 0x164   :  { %3556 = vset.pattern.permute.xlu1 %v6257_v41 }
 0x165   :  { %823 = vperm.xlu1 %3556, %v4135_v43  }
 0x166   :  { %3549 = vset.pattern.permute.xlu0 %v6263_v50 }
 0x167   :  { %1131 = vperm.xlu0 %3549, %v4131_v40   ;;  %v4312_v56 = vpop.permute.xlu1 %669  ;;  %v4349_v33 = vpop.permute.xlu0 %707 }
 0x169   :  { %3557 = vset.pattern.permute.xlu1 %v6256_v45 }
 0x16a   :  { %903 = vperm.xlu1 %3557, %v4135_v43  }
 0x16b   :  { %3551 = vset.pattern.permute.xlu0 %v6266_v54 }
 0x16c   :  { %1243 = vperm.xlu0 %3551, %v4131_v40   ;;  %v4317_v59 = vpop.permute.xlu1 %787 }
 0x16e   :  { %3558 = vset.pattern.permute.xlu1 %v6254_v44 }
 0x16f   :  { %935 = vperm.xlu1 %3558, %v4135_v43  }
 0x170   :  { %3553 = vset.pattern.permute.xlu0 %v6250_v16 }
 0x171   :  { %674 = vperm.xlu0 %3553, %v4135_v43   ;;  %v4322_v61 = vpop.permute.xlu1 %899 }
 0x173   :  { %3559 = vset.pattern.permute.xlu1 %v6259_v48 }
 0x174   :  { %1015 = vperm.xlu1 %3559, %v4135_v43  }
 0x175   :  { %689 = vperm.xlu0 %3553, %v4143_v46  }
 0x176   :  { %v4326_v0 = vpop.permute.xlu1 %1011 }
 0x178   :  { %3560 = vset.pattern.permute.xlu1 %v6251_v47 }
 0x179   :  { %1047 = vperm.xlu1 %3560, %v4135_v43   ;;  %3566 = vset.pattern.permute.xlu0 %v6253_v42 }
 0x17a   :  { %803 = vperm.xlu0 %3566, %v4143_v46  }
 0x17b   :  { %v4330_v3 = vpop.permute.xlu1 %1123 }
 0x17d   :  { %3561 = vset.pattern.permute.xlu1 %v6263_v50 }
 0x17e   :  { %1127 = vperm.xlu1 %3561, %v4135_v43   ;;  %3568 = vset.pattern.permute.xlu0 %v6256_v45 }
 0x17f   :  { %915 = vperm.xlu0 %3568, %v4143_v46  }
 0x180   :  { %v4336_v6 = vpop.permute.xlu1 %1235 }
 0x182   :  { %3562 = vset.pattern.permute.xlu1 %v6246_v49 }
 0x183   :  { %1159 = vperm.xlu1 %3562, %v4135_v43   ;;  %3570 = vset.pattern.permute.xlu0 %v6259_v48 }
 0x184   :  { %1027 = vperm.xlu0 %3570, %v4143_v46  }
 0x185   :  { %v4343_v12 = vpop.permute.xlu1 %1347 }
 0x186   :  { %6398 = vst [vmem:[#allocation27_spill] sm:$0xff] %v4343_v12 }
 0x187   :  { %3563 = vset.pattern.permute.xlu1 %v6266_v54 }
 0x188   :  { %1239 = vperm.xlu1 %3563, %v4135_v43   ;;  %3572 = vset.pattern.permute.xlu0 %v6263_v50 }
 0x189   :  { %1139 = vperm.xlu0 %3572, %v4143_v46  }
 0x18a   :  { %v4345_v29 = vpop.permute.xlu1 %664 }
 0x18c   :  { %3564 = vset.pattern.permute.xlu1 %v6248_v53 }
 0x18d   :  { %1271 = vperm.xlu1 %3564, %v4135_v43   ;;  %3574 = vset.pattern.permute.xlu0 %v6266_v54 }
 0x18e   :  { %1251 = vperm.xlu0 %3574, %v4143_v46  }
 0x18f   :  { %v4347_v32 = vpop.permute.xlu1 %703 }
 0x191   :  { %3565 = vset.pattern.permute.xlu1 %v6260_v11 }
 0x192   :  { %3577 = vset.pattern.permute.xlu0 %v6260_v11 }
 0x193   :  { %719 = vperm.xlu0 %3577, %v4186_v5  }
 0x194   :  { %v4354_v37 = vpop.permute.xlu1 %815 }
 0x197   :  { %3579 = vset.pattern.permute.xlu0 %v6257_v41 }
 0x198   :  { %831 = vperm.xlu0 %3579, %v4186_v5  }
 0x199   :  { %v4361_v34 = vpop.permute.xlu1 %927 }
 0x19c   :  { %3581 = vset.pattern.permute.xlu0 %v6254_v44 }
 0x19d   :  { %943 = vperm.xlu0 %3581, %v4186_v5  }
 0x19e   :  { %v4367_v21 = vpop.permute.xlu1 %1039 }
 0x1a1   :  { %3583 = vset.pattern.permute.xlu0 %v6251_v47 }
 0x1a2   :  { %1055 = vperm.xlu0 %3583, %v4186_v5  }
 0x1a6   :  { %3585 = vset.pattern.permute.xlu0 %v6246_v49 }
 0x1a7   :  { %1167 = vperm.xlu0 %3585, %v4186_v5  }
 0x1ab   :  { %3587 = vset.pattern.permute.xlu0 %v6248_v53 }
 0x1ac   :  { %1279 = vperm.xlu0 %3587, %v4186_v5  }
 0x1b0   :  { %3588 = vset.pattern.permute.xlu0 %v6250_v16 }
 0x1b1   :  { %564 = vadd.xlane.f32.xlu1 %v563_v8  ;;  %v4359_v8 = vpop.permute.xlu0 %819 }
 0x1b5   :  { %561 = vadd.xlane.f32.xlu1 %v560_v10  ;;  %v4365_v10 = vpop.permute.xlu0 %931 }
 0x1b9   :  { %v4371_v36 = vpop.permute.xlu0 %1043 }
 0x1bd   :  { %v4377_v27 = vpop.permute.xlu0 %1155 }
 0x1c1   :  { %v4385_v57 = vpop.permute.xlu0 %1267 }
 0x1c6   :  { %723 = vperm.xlu1 %3565, %v4143_v46  }
 0x1ca   :  { %3567 = vset.pattern.permute.xlu1 %v6257_v41 }
 0x1cb   :  { %835 = vperm.xlu1 %3567, %v4143_v46   ;;  %567 = vadd.xlane.f32.xlu0 %v566_v2  ;;  %v4374_v2 = vpop.permute.xlu1 %1151 }
 0x1cf   :  { %3569 = vset.pattern.permute.xlu1 %v6254_v44  ;;  %v4381_v30 = vpop.permute.xlu1 %1263 }
 0x1d0   :  { %947 = vperm.xlu1 %3569, %v4143_v46  }
 0x1d4   :  { %3571 = vset.pattern.permute.xlu1 %v6251_v47 }
 0x1d5   :  { %1059 = vperm.xlu1 %3571, %v4143_v46  }
 0x1d9   :  { %3573 = vset.pattern.permute.xlu1 %v6246_v49  ;;  %v4389_v49 = vpop.permute.xlu1 %1375 }
 0x1da   :  { %1171 = vperm.xlu1 %3573, %v4143_v46   ;;  %6399 = vst [vmem:[#allocation28_spill] sm:$0xff] %v4389_v49 }
 0x1de   :  { %3575 = vset.pattern.permute.xlu1 %v6248_v53  ;;  %v4394_v53 = vpop.permute.xlu0 %783 }
 0x1df   :  { %1283 = vperm.xlu1 %3575, %v4143_v46  }
 0x1e1   :  { %699 = vperm.xlu0 %3588, %v4269_v4  }
 0x1e2   :  { %v4403_v47 = vpop.permute.xlu0 %895 }
 0x1e3   :  { %3576 = vset.pattern.permute.xlu1 %v6250_v16  ;;  %v4398_v16 = vpop.permute.xlu1 %1455 }
 0x1e4   :  { %684 = vperm.xlu1 %3576, %v4186_v5   ;;  %6400 = vst [vmem:[#allocation29_spill] sm:$0xff] %v4398_v16 }
 0x1e5   :  { %3590 = vset.pattern.permute.xlu0 %v6253_v42 }
 0x1e6   :  { %811 = vperm.xlu0 %3590, %v4269_v4   ;;  %v4412_v44 = vpop.permute.xlu0 %1007 }
 0x1e8   :  { %3578 = vset.pattern.permute.xlu1 %v6253_v42  ;;  %v4406_v42 = vpop.permute.xlu1 %679 }
 0x1e9   :  { %799 = vperm.xlu1 %3578, %v4186_v5  }
 0x1ea   :  { %3592 = vset.pattern.permute.xlu0 %v6256_v45  ;;  %v4420_v41 = vpop.permute.xlu0 %1119 }
 0x1eb   :  { %923 = vperm.xlu0 %3592, %v4269_v4  }
 0x1ed   :  { %3580 = vset.pattern.permute.xlu1 %v6256_v45  ;;  %v4415_v45 = vpop.permute.xlu1 %715 }
 0x1ee   :  { %911 = vperm.xlu1 %3580, %v4186_v5   ;;  %v4431_v9 = vpop.permute.xlu0 %1231 }
 0x1ef   :  { %3594 = vset.pattern.permute.xlu0 %v6259_v48 }
 0x1f0   :  { %1035 = vperm.xlu0 %3594, %v4269_v4  }
 0x1f1   :  { %v4426_v35 = vpop.permute.xlu1 %827 }
 0x1f2   :  { %3582 = vset.pattern.permute.xlu1 %v6259_v48 }
 0x1f3   :  { %1023 = vperm.xlu1 %3582, %v4186_v5  }
 0x1f4   :  { %3596 = vset.pattern.permute.xlu0 %v6263_v50 }
 0x1f5   :  { %1147 = vperm.xlu0 %3596, %v4269_v4   ;;  %v4434_v26 = vpop.permute.xlu1 %939 }
 0x1f7   :  { %3584 = vset.pattern.permute.xlu1 %v6263_v50  ;;  %v6402_v50 = vmov 16  }
 0x1f8   :  { %1135 = vperm.xlu1 %3584, %v4186_v5  }
 0x1f9   :  { %3598 = vset.pattern.permute.xlu0 %v6266_v54 }
 0x1fa   :  { %1259 = vperm.xlu0 %3598, %v4269_v4  }
 0x1fc   :  { %v4422_v48 = vpop.f32.mrb[20].mxu0  ;;  %3586 = vset.pattern.permute.xlu1 %v6266_v54  ;;  %v4437_v54 = vpop.permute.xlu0 %1343 }
 0x1fd   :  { %6401 = vst [vmem:[#allocation30_spill] sm:$0xff] %v4422_v48  ;;  %1247 = vperm.xlu1 %3586, %v4186_v5   ;;  %v3306_v11 = vpop.f32.mrb[21].mxu0  ;;  %6404 = vst [vmem:[#allocation31_spill] sm:$0xff] %v4437_v54  ;;  %v550_v48 = vmul.f32 %v4143_v46, %v4241_v31 }
 0x1fe   :  { %3601 = vset.pattern.permute.xlu0 %v6402_v50  ;;  %v4441_v11 = vpop.permute.xlu1 %1051 }
 0x1ff   :  { %727 = vperm.xlu0 %3601, %v4296_v52   ;;  %v569_v63 = vsel %vm553_vm2, %v550_v48, 0.0 }
 0x200   :  { %v4443_v25 = vpop.xlane.xlu0 %558 }
 0x201   :  { %3589 = vset.pattern.permute.xlu1 %v6402_v50  ;;  %6406 = vst [vmem:[#allocation32_spill] sm:$0xff] %v4443_v25 }
 0x202   :  { %v4447_v50 = vpop.permute.xlu1 %1163 }
 0x203   :  { %3603 = vset.pattern.permute.xlu0 %v6403_v1  ;;  %6408 = vst [vmem:[#allocation33_spill] sm:$0xff] %v4447_v50 }
 0x204   :  { %839 = vperm.xlu0 %3603, %v4296_v52   ;;  %v4449_v13 = vpop.xlane.xlu0 %555 }
 0x205   :  { %6409 = vst [vmem:[#allocation34_spill] sm:$0xff] %v4449_v13  ;;  %v6414_v13 = vmov 6  }
 0x206   :  { %v4453_v58 = vpop.permute.xlu1 %1275 }
 0x207   :  { %6411 = vst [vmem:[#allocation35_spill] sm:$0xff] %v4453_v58  ;;  %v551_v58 = vmul.f32 %v4241_v31, %v4296_v52 }
 0x208   :  { %3605 = vset.pattern.permute.xlu0 %v6405_v62  ;;  %v4455_v18 = vpop.permute.xlu0 %795 }
 0x209   :  { %951 = vperm.xlu0 %3605, %v4296_v52  }
 0x20a   :  { %v4459_v25 = vpop.permute.xlu1 %711 }
 0x20b   :  { %6413 = vst [vmem:[#allocation36_spill] sm:$0xff] %v4459_v25 }
 0x20c   :  { %v4461_v17 = vpop.permute.xlu0 %907 }
 0x20d   :  { %3607 = vset.pattern.permute.xlu0 %v6407_v55 }
 0x20e   :  { %1063 = vperm.xlu0 %3607, %v4296_v52   ;;  %v4467_v16 = vpop.permute.xlu1 %791 }
 0x20f   :  { %6415 = vst [vmem:[#allocation37_spill] sm:$0xff] %v4467_v16 }
 0x210   :  { %v4469_v54 = vpop.permute.xlu0 %1019 }
 0x212   :  { %3609 = vset.pattern.permute.xlu0 %v6410_v60  ;;  %v4471_v49 = vpop.permute.xlu1 %823 }
 0x213   :  { %1175 = vperm.xlu0 %3609, %v4296_v52   ;;  %6416 = vst [vmem:[#allocation38_spill] sm:$0xff] %v4471_v49 }
 0x214   :  { %v4473_v19 = vpop.permute.xlu0 %1131 }
 0x216   :  { %v4475_v12 = vpop.permute.xlu1 %903 }
 0x217   :  { %3611 = vset.pattern.permute.xlu0 %v6412_v51  ;;  %6417 = vst [vmem:[#allocation39_spill] sm:$0xff] %v4475_v12  ;;  %v6436_v12 = vmov 3  }
 0x218   :  { %1287 = vperm.xlu0 %3611, %v4296_v52   ;;  %v4477_v25 = vpop.permute.xlu0 %1243 }
 0x21a   :  { %v4482_v50 = vpop.permute.xlu1 %935 }
 0x21b   :  { %6418 = vst [vmem:[#allocation40_spill] sm:$0xff] %v4482_v50  ;;  %v6441_v50 = vmov 5  }
 0x21c   :  { %3625 = vset.pattern.permute.xlu0 %v6414_v13  ;;  %v4484_v48 = vpop.permute.xlu0 %674 }
 0x21d   :  { %6419 = vst [vmem:[#allocation41_spill] sm:$0xff] %v4484_v48 }
 0x21e   :  { %v4494_v49 = vpop.permute.xlu1 %1015 }
 0x21f   :  { %6420 = vst [vmem:[#allocation42_spill] sm:$0xff] %v4494_v49 }
 0x220   :  { %v4489_v16 = vpop.permute.xlu0 %689 }
 0x221   :  { %570 = vadd.xlane.f32.xlu1 %v569_v63  ;;  %v572_v63 = vsel %vm553_vm2, %v551_v58, 0.0 }
 0x224   :  { %v4500_v58 = vpop.permute.xlu0 %803 }
 0x225   :  { %6421 = vst [vmem:[#allocation43_spill] sm:$0xff] %v4500_v58 }
 0x232   :  { %731 = vperm.xlu1 %3589, %v4269_v4  }
 0x236   :  { %3591 = vset.pattern.permute.xlu1 %v6403_v1  ;;  %v4502_v1 = vpop.permute.xlu1 %1047 }
 0x237   :  { %843 = vperm.xlu1 %3591, %v4269_v4   ;;  %573 = vadd.xlane.f32.xlu0 %v572_v63  ;;  %6422 = vst [vmem:[#allocation44_spill] sm:$0xff] %v4502_v1  ;;  %v4507_v63 = vpop.permute.xlu0 %915  ;;  %v6433_v1 = vmov 2  }
 0x238   :  { %6423 = vst [vmem:[#allocation45_spill] sm:$0xff] %v4507_v63  ;;  %v6280_v63 = vmov 28  }
 0x23a   :  { %v4510_v22 = vpop.permute.xlu1 %1127 }
 0x23b   :  { %3593 = vset.pattern.permute.xlu1 %v6405_v62  ;;  %6424 = vst [vmem:[#allocation46_spill] sm:$0xff] %v4510_v22  ;;  %v4513_v62 = vpop.permute.xlu0 %1027  ;;  %v6430_v22 = vmov 1  }
 0x23c   :  { %955 = vperm.xlu1 %3593, %v4269_v4   ;;  %6425 = vst [vmem:[#allocation47_spill] sm:$0xff] %v4513_v62  ;;  %v552_v62 = vmul.f32 %v4269_v4, %v4241_v31 }
 0x23e   :  { %v4517_v49 = vpop.permute.xlu1 %1159 }
 0x23f   :  { %6426 = vst [vmem:[#allocation48_spill] sm:$0xff] %v4517_v49  ;;  %v4521_v28 = vpop.permute.xlu0 %1139 }
 0x240   :  { %3595 = vset.pattern.permute.xlu1 %v6407_v55  ;;  %v6427_v55 = vmov 0   ;;  %6428 = vst [vmem:[#allocation49_spill] sm:$0xff] %v4521_v28 }
 0x241   :  { %1067 = vperm.xlu1 %3595, %v4269_v4  }
 0x245   :  { %3597 = vset.pattern.permute.xlu1 %v6410_v60  ;;  %v4525_v60 = vpop.permute.xlu1 %1239 }
 0x246   :  { %1179 = vperm.xlu1 %3597, %v4269_v4   ;;  %6429 = vst [vmem:[#allocation50_spill] sm:$0xff] %v4525_v60 }
 0x249   :  { %v4532_v49 = vpop.permute.xlu1 %1271 }
 0x24a   :  { %3599 = vset.pattern.permute.xlu1 %v6412_v51  ;;  %v4530_v51 = vpop.permute.xlu0 %1251  ;;  %6432 = vst [vmem:[#allocation52_spill] sm:$0xff] %v4532_v49 }
 0x24b   :  { %1291 = vperm.xlu1 %3599, %v4269_v4   ;;  %6431 = vst [vmem:[#allocation51_spill] sm:$0xff] %v4530_v51 }
 0x24d   :  { %1355 = vperm.xlu0 %3625, %v4131_v40  }
 0x24e   :  { %v4538_v60 = vpop.permute.xlu0 %719 }
 0x24f   :  { %3600 = vset.pattern.permute.xlu1 %v6427_v55  ;;  %v6274_v55 = vmov 23   ;;  %6434 = vst [vmem:[#allocation53_spill] sm:$0xff] %v4538_v60 }
 0x250   :  { %694 = vperm.xlu1 %3600, %v4296_v52  }
 0x251   :  { %1359 = vperm.xlu0 %3625, %v4186_v5  }
 0x254   :  { %3602 = vset.pattern.permute.xlu1 %v6430_v22  ;;  %v4540_v22 = vpop.xlane.xlu1 %564 }
 0x255   :  { %807 = vperm.xlu1 %3602, %v4296_v52   ;;  %1363 = vperm.xlu0 %3625, %v4143_v46   ;;  %6435 = vst [vmem:[#allocation54_spill] sm:$0xff] %v4540_v22 }
 0x258   :  { %v4548_v49 = vpop.xlane.xlu1 %561 }
 0x259   :  { %3604 = vset.pattern.permute.xlu1 %v6433_v1  ;;  %3650 = vset.pattern.permute.xlu0 %v6274_v55  ;;  %v4546_v1 = vpop.permute.xlu0 %831  ;;  %6438 = vst [vmem:[#allocation56_spill] sm:$0xff] %v4548_v49  ;;  %v6439_v55 = vmov 4  }
 0x25a   :  { %919 = vperm.xlu1 %3604, %v4296_v52   ;;  %1487 = vperm.xlu0 %3650, %v4129_v39   ;;  %6437 = vst [vmem:[#allocation55_spill] sm:$0xff] %v4546_v1 }
 0x25d   :  { %v4554_v22 = vpop.permute.xlu0 %943 }
 0x25e   :  { %3606 = vset.pattern.permute.xlu1 %v6436_v12  ;;  %653 = vrot.lane.b32.xlu0 %v4219_v24, %s3825_s28  ;;  %6440 = vst [vmem:[#allocation57_spill] sm:$0xff] %v4554_v22  ;;  %v4556_v12 = vpop.permute.xlu1 %723  ;;  %v6442_v24 = vmov 22  }
 0x25f   :  { %1031 = vperm.xlu1 %3606, %v4296_v52  }
 0x261   :  { %v4562_v49 = vpop.permute.xlu0 %1055 }
 0x262   :  { %1499 = vperm.xlu0 %3650, %v4131_v40   ;;  %6443 = vst [vmem:[#allocation58_spill] sm:$0xff] %v4562_v49  ;;  %v4564_v48 = vpop.permute.xlu1 %835  ;;  %v6448_v49 = vmov 7  }
 0x263   :  { %3608 = vset.pattern.permute.xlu1 %v6439_v55  ;;  %v6276_v55 = vmov 24  }
 0x264   :  { %1143 = vperm.xlu1 %3608, %v4296_v52  }
 0x265   :  { %v4569_v22 = vpop.permute.xlu0 %1167 }
 0x266   :  { %1503 = vperm.xlu0 %3650, %v4186_v5   ;;  %6444 = vst [vmem:[#allocation59_spill] sm:$0xff] %v4569_v22 }
 0x268   :  { %3610 = vset.pattern.permute.xlu1 %v6441_v50  ;;  %v4571_v50 = vpop.permute.xlu1 %947 }
 0x269   :  { %1255 = vperm.xlu1 %3610, %v4296_v52   ;;  %6445 = vst [vmem:[#allocation60_spill] sm:$0xff] %v4571_v50  ;;  %v4574_v1 = vpop.permute.xlu0 %1279  ;;  %v6469_v50 = vmov 24  }
 0x26a   :  { %1507 = vperm.xlu0 %3650, %v4143_v46   ;;  %6446 = vst [vmem:[#allocation61_spill] sm:$0xff] %v4574_v1 }
 0x26c   :  { %v4576_v60 = vpop.permute.xlu1 %1059 }
 0x26d   :  { %3612 = vset.pattern.permute.xlu1 %v6442_v24  ;;  %6447 = vst [vmem:[#allocation62_spill] sm:$0xff] %v4576_v60  ;;  %v4580_v51 = vpop.xlane.xlu0 %567 }
 0x26e   :  { %3653 = vset.pattern.permute.xlu0 %v6276_v55  ;;  %6449 = vst [vmem:[#allocation63_spill] sm:$0xff] %v4580_v51  ;;  %v6278_v51 = vmov 9  }
 0x26f   :  { %1599 = vperm.xlu0 %3653, %v4129_v39  }
 0x270   :  { %v4582_v55 = vpop.permute.xlu1 %1171 }
 0x271   :  { %6450 = vst [vmem:[#allocation64_spill] sm:$0xff] %v4582_v55  ;;  %v4585_v28 = vpop.permute.xlu0 %699  ;;  %v575_v55 = vsel %vm553_vm2, %v552_v62, 0.0 }
 0x272   :  { %6451 = vst [vmem:[#allocation65_spill] sm:$0xff] %v4585_v28 }
 0x273   :  { %1607 = vperm.xlu0 %3653, %v4135_v43  }
 0x274   :  { %v4588_v22 = vpop.permute.xlu1 %1283 }
 0x275   :  { %6452 = vst [vmem:[#allocation66_spill] sm:$0xff] %v4588_v22  ;;  %v4591_v1 = vpop.permute.xlu0 %811 }
 0x276   :  { %6453 = vst [vmem:[#allocation67_spill] sm:$0xff] %v4591_v1 }
 0x277   :  { %1619 = vperm.xlu0 %3653, %v4143_v46  }
 0x278   :  { %v4595_v60 = vpop.permute.xlu1 %684 }
 0x279   :  { %6454 = vst [vmem:[#allocation68_spill] sm:$0xff] %v4595_v60  ;;  %v4600_v28 = vpop.permute.xlu0 %923 }
 0x27a   :  { %6455 = vst [vmem:[#allocation69_spill] sm:$0xff] %v4600_v28 }
 0x27b   :  { %3666 = vset.pattern.permute.xlu0 %v6448_v49 }
 0x27c   :  { %1459 = vperm.xlu0 %3666, %v4125_v38   ;;  %v4603_v22 = vpop.permute.xlu1 %799 }
 0x27d   :  { %6456 = vst [vmem:[#allocation70_spill] sm:$0xff] %v4603_v22  ;;  %v4605_v1 = vpop.permute.xlu0 %1035  ;;  %v6465_v22 = vmov 9  }
 0x27e   :  { %6457 = vst [vmem:[#allocation71_spill] sm:$0xff] %v4605_v1 }
 0x280   :  { %1463 = vperm.xlu0 %3666, %v4135_v43   ;;  %v4609_v31 = vpop.permute.xlu1 %911 }
 0x281   :  { %6458 = vst [vmem:[#allocation72_spill] sm:$0xff] %v4609_v31  ;;  %v6284_v31 = vmov 25  }
 0x284   :  { %1479 = vperm.xlu0 %3666, %v4296_v52   ;;  %v4614_v62 = vpop.permute.xlu1 %1023 }
 0x285   :  { %6460 = vst [vmem:[#allocation74_spill] sm:$0xff] %v4614_v62 }
 0x288   :  { %1483 = vperm.xlu0 %3666, %v4269_v4  }
 0x28c   :  { %3681 = vset.pattern.permute.xlu0 %v6278_v51  ;;  %v4611_v51 = vpop.permute.xlu0 %1147 }
 0x28d   :  { %576 = vadd.xlane.f32.xlu1 %v575_v55  ;;  %1691 = vperm.xlu0 %3681, %v4131_v40   ;;  %6459 = vst [vmem:[#allocation73_spill] sm:$0xff] %v4611_v51  ;;  %v6282_v55 = vmov 8   ;;  %v4624_v51 = vpop.permute.xlu1 %1135 }
 0x28e   :  { %6463 = vst [vmem:[#allocation76_spill] sm:$0xff] %v4624_v51 }
 0x290   :  { %v4619_v1 = vpop.permute.xlu0 %1259 }
 0x291   :  { %1703 = vperm.xlu0 %3681, %v4296_v52   ;;  %6461 = vst [vmem:[#allocation75_spill] sm:$0xff] %v4619_v1  ;;  %v4631_v62 = vpop.permute.xlu1 %1247 }
 0x292   :  { %6464 = vst [vmem:[#allocation77_spill] sm:$0xff] %v4631_v62 }
 0x294   :  { %v4626_v28 = vpop.permute.xlu0 %727 }
 0x295   :  { %3690 = vset.pattern.permute.xlu0 %v6280_v63  ;;  %v6462_v63 = vmov 23  }
 0x296   :  { %2051 = vperm.xlu0 %3690, %v4125_v38  }
 0x298   :  { %v4634_v1 = vpop.permute.xlu0 %839 }
 0x29a   :  { %2063 = vperm.xlu0 %3690, %v4186_v5  }
 0x29e   :  { %1379 = vperm.xlu1 %3612, %v4125_v38   ;;  %3693 = vset.pattern.permute.xlu0 %v6282_v55 }
 0x29f   :  { %1571 = vperm.xlu0 %3693, %v4125_v38  }
 0x2a2   :  { %3613 = vset.pattern.permute.xlu1 %v6462_v63 }
 0x2a3   :  { %1491 = vperm.xlu1 %3613, %v4125_v38   ;;  %1583 = vperm.xlu0 %3693, %v4186_v5  }
 0x2a7   :  { %3614 = vset.pattern.permute.xlu1 %v6282_v55  ;;  %1595 = vperm.xlu0 %3693, %v4269_v4   ;;  %v4643_v55 = vpop.permute.xlu0 %951 }
 0x2a8   :  { %1567 = vperm.xlu1 %3614, %v4129_v39  }
 0x2ab   :  { %3696 = vset.pattern.permute.xlu0 %v6284_v31  ;;  %v4653_v58 = vpop.permute.xlu0 %1063 }
 0x2ac   :  { %3615 = vset.pattern.permute.xlu1 %v6465_v22  ;;  %1715 = vperm.xlu0 %3696, %v4125_v38  }
 0x2ad   :  { %1679 = vperm.xlu1 %3615, %v4129_v39  }
 0x2ae   :  { %v4639_v51 = vpop.xlane.xlu1 %570 }
 0x2af   :  { %6466 = vst [vmem:[#allocation78_spill] sm:$0xff] %v4639_v51  ;;  %v6286_v51 = vmov 26  }
 0x2b0   :  { %1727 = vperm.xlu0 %3696, %v4186_v5  }
 0x2b1   :  { %3616 = vset.pattern.permute.xlu1 %v6284_v31 }
 0x2b2   :  { %v4645_v62 = vpop.permute.xlu1 %731  ;;  %1711 = vperm.xlu1 %3616, %v4129_v39  }
 0x2b3   :  { %6467 = vst [vmem:[#allocation79_spill] sm:$0xff] %v4645_v62  ;;  %v959_v62 = vsel %vm659_vm3, %v4322_v61, %v4365_v10  ;;  %v4737_v61 = vsub.s32 4, %v3894_v7 }
 0x2b4   :  { %1739 = vperm.xlu0 %3696, %v4269_v4  }
 0x2b5   :  { %6482 = vst [vmem:[#allocation93_spill] sm:$0xff] %v4737_v61 }
 0x2b6   :  { %v4649_v60 = vpop.permute.xlu1 %843  ;;  %3617 = vset.pattern.permute.xlu1 %v6469_v50 }
 0x2b7   :  { %6468 = vst [vmem:[#allocation80_spill] sm:$0xff] %v4649_v60  ;;  %1603 = vperm.xlu1 %3617, %v4125_v38   ;;  %v4662_v60 = vpop.permute.xlu0 %1175 }
 0x2b8   :  { %3699 = vset.pattern.permute.xlu0 %v6286_v51 }
 0x2b9   :  { %1823 = vperm.xlu0 %3699, %v4129_v39  }
 0x2bb   :  { %v4657_v31 = vpop.permute.xlu1 %955  ;;  %3618 = vset.pattern.permute.xlu1 %v6465_v22  ;;  %v4670_v51 = vpop.permute.xlu0 %1287 }
 0x2bc   :  { %6470 = vst [vmem:[#allocation81_spill] sm:$0xff] %v4657_v31  ;;  %1683 = vperm.xlu1 %3618, %v4125_v38  }
 0x2bd   :  { %1839 = vperm.xlu0 %3699, %v4186_v5  }
 0x2c0   :  { %v4664_v50 = vpop.permute.xlu1 %1067  ;;  %655 = vrot.lane.b32.xlu1 %v4216_v23, %s3825_s28 }
 0x2c1   :  { %6471 = vst [vmem:[#allocation82_spill] sm:$0xff] %v4664_v50  ;;  %1843 = vperm.xlu0 %3699, %v4143_v46   ;;  %3619 = vset.pattern.permute.xlu1 %v6414_v13  ;;  %v6292_v50 = vmov 31  }
 0x2c4   :  { %1351 = vperm.xlu1 %3619, %v4135_v43   ;;  %v4676_v31 = vpop.xlane.xlu0 %573 }
 0x2c5   :  { %v4673_v22 = vpop.permute.xlu1 %1179  ;;  %1847 = vperm.xlu0 %3699, %v4296_v52   ;;  %6473 = vst [vmem:[#allocation84_spill] sm:$0xff] %v4676_v31  ;;  %v1183_v52 = vsel %vm659_vm3, %v4330_v3, %v4377_v27  ;;  %v4747_v27 = vsel %vm659_vm3, %v4394_v53, %v4354_v37  ;;  %v4751_v3 = vsub.s32 5, %v3894_v7 }
 0x2c6   :  { %6472 = vst [vmem:[#allocation83_spill] sm:$0xff] %v4673_v22  ;;  %v6294_v22 = vmov 10  }
 0x2c7   :  { %6483 = vst [vmem:[#allocation94_spill] sm:$0xff] %v4751_v3 }
 0x2c8   :  { %3620 = vset.pattern.permute.xlu1 %v6442_v24 }
 0x2c9   :  { %1383 = vperm.xlu1 %3620, %v4135_v43   ;;  %3704 = vset.pattern.permute.xlu0 %v6292_v50 }
 0x2ca   :  { %v4681_v23 = vpop.permute.xlu1 %1291  ;;  %2391 = vperm.xlu0 %3704, %v4135_v43  }
 0x2cb   :  { %6474 = vst [vmem:[#allocation85_spill] sm:$0xff] %v4681_v23 }
 0x2cc   :  { %v4684_v13 = vpop.permute.xlu0 %1355 }
 0x2cd   :  { %6475 = vst [vmem:[#allocation86_spill] sm:$0xff] %v4684_v13  ;;  %3621 = vset.pattern.permute.xlu1 %v6462_v63  ;;  %v6299_v13 = vmov 11  }
 0x2ce   :  { %1495 = vperm.xlu1 %3621, %v4135_v43   ;;  %2395 = vperm.xlu0 %3704, %v4131_v40  }
 0x2cf   :  { %v695_v31 = vpop.permute.xlu1 %694 }
 0x2d0   :  { %v4689_v46 = vpop.permute.xlu0 %1359 }
 0x2d1   :  { %6476 = vst [vmem:[#allocation87_spill] sm:$0xff] %v4689_v46  ;;  %v4701_v46 = vsub.s32 2, %v3894_v7 }
 0x2d2   :  { %3622 = vset.pattern.permute.xlu1 %v6294_v22  ;;  %2399 = vperm.xlu0 %3704, %v4186_v5   ;;  %v4708_v5 = vld [vmem:[%s6235_s3] sm:$0xff] }
 0x2d3   :  { %1791 = vperm.xlu1 %3622, %v4129_v39   ;;  %6478 = vst [vmem:[#allocation89_spill] sm:$0xff] %v4701_v46  ;;  %6480 = vst [vmem:[#allocation91_spill] sm:$0xff] %v4708_v5  ;;  %v4764_v53 = vrot.slane %v4708_v5, %v3923_v15  ;;  %v4772_v37 = vrot.slane %v4708_v5, %v4737_v61 }
 0x2d4   :  { %v808_v50 = vpop.permute.xlu1 %807  ;;  %v4694_v23 = vpop.permute.xlu0 %1363 }
 0x2d5   :  { %6477 = vst [vmem:[#allocation88_spill] sm:$0xff] %v4694_v23  ;;  %v735_v23 = vsel %vm659_vm3, %v4312_v56, %v4349_v33  ;;  %v4730_v56 = vsel %vm659_vm3, %v4336_v6, %v4385_v57  ;;  %v6303_v57 = vmov 27   ;;  %v4755_v6 = vrot.slane %v4708_v5, %v3920_v14  ;;  %6486 = vst [vmem:[#allocation97_spill] sm:$0xff] %v4764_v53 }
 0x2d6   :  { %3709 = vset.pattern.permute.xlu0 %v6299_v13  ;;  %6488 = vst [vmem:[#allocation99_spill] sm:$0xff] %v4772_v37 }
 0x2d7   :  { %3623 = vset.pattern.permute.xlu1 %v6299_v13  ;;  %1907 = vperm.xlu0 %3709, %v4125_v38   ;;  %v847_v13 = vsel %vm659_vm3, %v4317_v59, %v4359_v8  ;;  %v4734_v59 = vsub.s32 3, %v3894_v7  ;;  %6484 = vst [vmem:[#allocation95_spill] sm:$0xff] %v4755_v6  ;;  %v740_v8 = vsel %vm659_vm3, %v695_v31, %v4626_v28 }
 0x2d8   :  { %1903 = vperm.xlu1 %3623, %v4129_v39   ;;  %v852_v31 = vsel %vm659_vm3, %v808_v50, %v4634_v1 }
 0x2d9   :  { %v920_v22 = vpop.permute.xlu1 %919  ;;  %v4703_v63 = vpop.permute.xlu0 %1487  ;;  %6481 = vst [vmem:[#allocation92_spill] sm:$0xff] %v4734_v59 }
 0x2da   :  { %6479 = vst [vmem:[#allocation90_spill] sm:$0xff] %v4703_v63  ;;  %v4722_v63 = vsel %vm659_vm3, %v4326_v0, %v4371_v36  ;;  %v4742_v0 = vsel %vm659_vm3, %v4345_v29, %v4347_v32  ;;  %v4760_v29 = vrot.slane %v4708_v5, %v4734_v59  ;;  %v4768_v32 = vrot.slane %v4708_v5, %v4701_v46 }
 0x2db   :  { %1911 = vperm.xlu0 %3709, %v4135_v43  }
 0x2dc   :  { %3624 = vset.pattern.permute.xlu1 %v6303_v57  ;;  %6485 = vst [vmem:[#allocation96_spill] sm:$0xff] %v4760_v29  ;;  %6487 = vst [vmem:[#allocation98_spill] sm:$0xff] %v4768_v32  ;;  %v4782_v57 = vrot.slane %v4708_v5, %v4751_v3 }
 0x2dd   :  { %1935 = vperm.xlu1 %3624, %v4129_v39   ;;  %v654_v33 = vpop.permute.xlu0 %653 }
 0x2de   :  { %v4778_v10 = vsel %vm659_vm3, %v4208_v20, %v654_v33  ;;  %v1032_v36 = vpop.permute.xlu1 %1031  ;;  %6490 = vst [vmem:[#allocation101_spill] sm:$0xff] %v4782_v57  ;;  %v964_v33 = vsel %vm659_vm3, %v920_v22, %v4643_v55 }
 0x2df   :  { %6489 = vst [vmem:[#allocation100_spill] sm:$0xff] %v4778_v10  ;;  %v4786_v7 = vrot.slane %v4778_v10, %v3923_v15  ;;  %v4790_v43 = vrot.slane %v4778_v10, %v3920_v14  ;;  %v4794_v28 = vrot.slane %v4778_v10, %v4701_v46  ;;  %v4798_v20 = vrot.slane %v4778_v10, %v4734_v59 }
 0x2e0   :  { %1915 = vperm.xlu0 %3709, %v4131_v40   ;;  %v4807_v14 = vrot.slane %v4778_v10, %v4737_v61  ;;  %v4811_v46 = vrot.slane %v4778_v10, %v4751_v3  ;;  %v1076_v59 = vsel %vm659_vm3, %v1032_v36, %v4653_v58 }
 0x2e1   :  { %v864_v15 = vadd.f32 %v4790_v43, %v852_v31  ;;  %3626 = vset.pattern.permute.xlu1 %v6442_v24  ;;  %v4817_v5 = vpop.permute.xlu0 %1499  ;;  %v752_v1 = vadd.f32 %v4786_v7, %v740_v8  ;;  %v976_v22 = vadd.f32 %v4794_v28, %v964_v33  ;;  %v1088_v50 = vadd.f32 %v4798_v20, %v1076_v59 }
 0x2e2   :  { %6491 = vst [vmem:[#allocation102_spill] sm:$0xff] %v4807_v14  ;;  %6492 = vst [vmem:[#allocation103_spill] sm:$0xff] %v4811_v46  ;;  %1387 = vperm.xlu1 %3626, %v4131_v40   ;;  %v747_v55 = vadd.f32 %v4786_v7, %v735_v23  ;;  %v971_v3 = vadd.f32 %v4794_v28, %v959_v62  ;;  %v1195_v31 = vadd.f32 %v4807_v14, %v1183_v52 }
 0x2e3   :  { %6493 = vst [vmem:[#allocation104_spill] sm:$0xff] %v4817_v5  ;;  %v872_v61 = vand.u32 2147483647, %v864_v15  ;;  %v1144_v58 = vpop.permute.xlu1 %1143  ;;  %v760_v36 = vand.u32 2147483647, %v752_v1  ;;  %v859_v8 = vadd.f32 %v4790_v43, %v847_v13 }
 0x2e4   :  { %v984_v10 = vand.u32 2147483647, %v976_v22  ;;  %1931 = vperm.xlu0 %3709, %v4269_v4   ;;  %v1096_v5 = vand.u32 2147483647, %v1088_v50  ;;  %v1188_v59 = vsel %vm659_vm3, %v1144_v58, %v4662_v60  ;;  %v755_v33 = vand.u32 2147483647, %v747_v55 }
 0x2e5   :  { %v979_v24 = vand.u32 2147483647, %v971_v3  ;;  %v884_v23 = vmul.f32 %v4755_v6, %v872_v61  ;;  %v772_v62 = vmul.f32 %v4764_v53, %v760_v36  ;;  %v1200_v15 = vadd.f32 %v4807_v14, %v1188_v59  ;;  %v4834_v1 = vpop.permute.xlu0 %1503 }
 0x2e6   :  { %v996_v52 = vmul.f32 %v4768_v32, %v984_v10  ;;  %6494 = vst [vmem:[#allocation105_spill] sm:$0xff] %v4834_v1  ;;  %v1108_v22 = vmul.f32 %v4760_v29, %v1096_v5  ;;  %3627 = vset.pattern.permute.xlu1 %v6448_v49  ;;  %v767_v13 = vmul.f32 %v4764_v53, %v755_v33  ;;  %v1203_v50 = vand.u32 2147483647, %v1195_v31 }
 0x2e7   :  { %v991_v60 = vmul.f32 %v4768_v32, %v979_v24  ;;  %v1208_v55 = vand.u32 2147483647, %v1200_v15  ;;  %1467 = vperm.xlu1 %3627, %v4131_v40   ;;  %v6326_v61 = vmov 12   ;;  %v867_v10 = vand.u32 2147483647, %v859_v8 }
 0x2e8   :  { %v1004_v3 = vadd.f32 %v996_v52, %v772_v62  ;;  %3712 = vset.pattern.permute.xlu0 %v6326_v61  ;;  %v1083_v58 = vadd.f32 %v4798_v20, %v4722_v63  ;;  %v1116_v36 = vadd.f32 %v1108_v22, %v884_v23  ;;  %v1256_v5 = vpop.permute.xlu1 %1255  ;;  %v1215_v33 = vmul.f32 %v4772_v37, %v1203_v50 }
 0x2e9   :  { %2015 = vperm.xlu0 %3712, %v4129_v39   ;;  %v999_v59 = vadd.f32 %v991_v60, %v767_v13  ;;  %v1307_v24 = vadd.f32 %v4811_v46, %v4730_v56  ;;  %v1220_v31 = vmul.f32 %v4772_v37, %v1208_v55  ;;  %v1300_v62 = vsel %vm659_vm3, %v1256_v5, %v4670_v51  ;;  %v4851_v52 = vpop.permute.xlu0 %1507  ;;  %v6504_v5 = vld [vmem:[#allocation47_spill] sm:$0xff] }
 0x2ea   :  { %6495 = vst [vmem:[#allocation106_spill] sm:$0xff] %v4851_v52  ;;  %v879_v8 = vmul.f32 %v4755_v6, %v867_v10  ;;  %v1091_v63 = vand.u32 2147483647, %v1083_v58  ;;  %v958_v23 = vsel %vm659_vm3, %v4403_v47, %v4361_v34  ;;  %v1312_v15 = vadd.f32 %v4811_v46, %v1300_v62  ;;  %v6509_v62 = vld [vmem:[#allocation26_spill] sm:$0xff] }
 0x2eb   :  { %v4858_v22 = vadd.f32 %v1215_v33, %v999_v59  ;;  %v1315_v13 = vand.u32 2147483647, %v1307_v24  ;;  %v1070_v56 = vsel %vm659_vm3, %v4412_v44, %v4367_v21  ;;  %v1182_v51 = vsel %vm659_vm3, %v4420_v41, %v4374_v2  ;;  %v6499_v2 = vld [vmem:[#allocation35_spill] sm:$0xff]  ;;  %v6506_v33 = vld [vmem:[#allocation49_spill] sm:$0xff] }
 0x2ec   :  { %v4866_v60 = vadd.f32 %v1220_v31, %v1004_v3  ;;  %v6497_v50 = vmov 10   ;;  %v1103_v55 = vmul.f32 %v4760_v29, %v1091_v63  ;;  %v1294_v47 = vsel %vm659_vm3, %v4431_v9, %v4381_v30  ;;  %v6510_v63 = vld [vmem:[#allocation66_spill] sm:$0xff] }
 0x2ed   :  { %3628 = vset.pattern.permute.xlu1 %v6497_v50  ;;  %v737_v34 = vsel %vm659_vm3, %v4406_v42, %v4415_v45  ;;  %v1320_v10 = vand.u32 2147483647, %v1312_v15  ;;  %2027 = vperm.xlu0 %3712, %v4131_v40   ;;  %v1327_v21 = vmul.f32 %v4782_v57, %v1315_v13  ;;  %v849_v41 = vsel %vm659_vm3, %v4455_v18, %v4426_v35  ;;  %v6498_v45 = vld [vmem:[#allocation33_spill] sm:$0xff]  ;;  %v6511_v15 = vld [vmem:[#allocation51_spill] sm:$0xff] }
 0x2ee   :  { %6496 = vst [vmem:[#allocation107_spill] sm:$0xff] %v4866_v60  ;;  %1795 = vperm.xlu1 %3628, %v4125_v38   ;;  %v961_v44 = vsel %vm659_vm3, %v4461_v17, %v4434_v26  ;;  %v4888_v9 = vsel %vm659_vm3, %v4469_v54, %v4441_v11  ;;  %v1111_v42 = vadd.f32 %v1103_v55, %v879_v8  ;;  %v4904_v26 = vpop.permute.xlu0 %1599  ;;  %v6500_v54 = vld [vmem:[#allocation43_spill] sm:$0xff]  ;;  %v6502_v11 = vld [vmem:[#allocation45_spill] sm:$0xff] }
 0x2ef   :  { %v1185_v30 = vsel %vm659_vm3, %v4473_v19, %v6498_v45  ;;  %v4896_v3 = vsel %vm659_vm3, %v4477_v25, %v6499_v2  ;;  %v4901_v18 = vsel %vm659_vm3, %v4489_v16, %v4556_v12  ;;  %v1332_v17 = vmul.f32 %v4782_v57, %v1320_v10  ;;  %v6501_v19 = vld [vmem:[#allocation60_spill] sm:$0xff]  ;;  %v6503_v25 = vld [vmem:[#allocation62_spill] sm:$0xff]  ;;  %v6514_v45 = vld [vmem:[#allocation55_spill] sm:$0xff] }
 0x2f0   :  { %v4909_v35 = vsel %vm659_vm3, %v6500_v54, %v4564_v48  ;;  %v4914_v58 = vsel %vm659_vm3, %v6502_v11, %v6501_v19  ;;  %v4919_v59 = vsel %vm659_vm3, %v6504_v5, %v6503_v25  ;;  %v4921_v16 = vadd.f32 %v1327_v21, %v1111_v42  ;;  %v6505_v12 = vld [vmem:[#allocation64_spill] sm:$0xff]  ;;  %v6515_v2 = vld [vmem:[#allocation70_spill] sm:$0xff]  ;;  %v6517_v11 = vld [vmem:[#allocation57_spill] sm:$0xff] }
 0x2f1   :  { %v4926_v24 = vsel %vm659_vm3, %v6506_v33, %v6505_v12  ;;  %v4928_v31 = vadd.f32 %v1332_v17, %v1116_v36  ;;  %v6508_v48 = vmov 26   ;;  %2039 = vperm.xlu0 %3712, %v6509_v62   ;;  %v746_v8 = vadd.f32 %v4786_v7, %v4742_v0  ;;  %v6512_v36 = vld [vmem:[#allocation53_spill] sm:$0xff]  ;;  %v6513_v21 = vld [vmem:[#allocation68_spill] sm:$0xff]  ;;  %v6519_v5 = vld [vmem:[#allocation58_spill] sm:$0xff] }
 0x2f2   :  { %3629 = vset.pattern.permute.xlu1 %v6508_v48  ;;  %v4937_v13 = vsel %vm659_vm3, %v6511_v15, %v6510_v63  ;;  %v970_v55 = vadd.f32 %v4794_v28, %v958_v23  ;;  %v1194_v10 = vadd.f32 %v4807_v14, %v1182_v51  ;;  %v738_v42 = vsel %vm659_vm3, %v6513_v21, %v6512_v36  ;;  %v4948_v0 = vpop.permute.xlu0 %1607  ;;  %v6518_v25 = vld [vmem:[#allocation72_spill] sm:$0xff]  ;;  %v6520_v51 = vld [vmem:[#allocation74_spill] sm:$0xff]  ;;  %v6521_v15 = vld [vmem:[#allocation59_spill] sm:$0xff] }
 0x2f3   :  { %6507 = vst [vmem:[#allocation33_spill] sm:$0xff] %v4928_v31  ;;  %1827 = vperm.xlu1 %3629, %v4125_v38   ;;  %v850_v17 = vsel %vm659_vm3, %v6515_v2, %v6514_v45  ;;  %6516 = vst [vmem:[#allocation35_spill] sm:$0xff] %v4948_v0  ;;  %v754_v54 = vand.u32 2147483647, %v746_v8  ;;  %v858_v19 = vadd.f32 %v4790_v43, %v4747_v27  ;;  %v6522_v36 = vld [vmem:[#allocation76_spill] sm:$0xff]  ;;  %v6328_v45 = vmov 29  }
 0x2f4   :  { %v962_v23 = vsel %vm659_vm3, %v6518_v25, %v6517_v11  ;;  %v4958_v12 = vsel %vm659_vm3, %v6520_v51, %v6519_v5  ;;  %v978_v33 = vand.u32 2147483647, %v970_v55  ;;  %v1202_v63 = vand.u32 2147483647, %v1194_v10  ;;  %v6523_v11 = vld [vmem:[#allocation61_spill] sm:$0xff]  ;;  %v6530_v60 = vld [vmem:[#allocation67_spill] sm:$0xff] }
 0x2f5   :  { %v1186_v21 = vsel %vm659_vm3, %v6522_v36, %v6521_v15  ;;  %3717 = vset.pattern.permute.xlu0 %v6328_v45  ;;  %v766_v27 = vmul.f32 %v4764_v53, %v754_v54  ;;  %v866_v8 = vand.u32 2147483647, %v858_v19  ;;  %v1082_v2 = vadd.f32 %v4798_v20, %v1070_v56  ;;  %v6524_v25 = vld [vmem:[#allocation77_spill] sm:$0xff]  ;;  %v6527_v15 = vld [vmem:[#allocation79_spill] sm:$0xff] }
 0x2f6   :  { %v4969_v61 = vsel %vm659_vm3, %v6524_v25, %v6523_v11  ;;  %v6525_v5 = vmov 27   ;;  %2159 = vperm.xlu0 %3717, %v4129_v39   ;;  %v990_v55 = vmul.f32 %v4768_v32, %v978_v33  ;;  %v1214_v10 = vmul.f32 %v4772_v37, %v1202_v63  ;;  %v4976_v51 = vpop.permute.xlu0 %1619  ;;  %v6528_v36 = vld [vmem:[#allocation65_spill] sm:$0xff] }
 0x2f7   :  { %3630 = vset.pattern.permute.xlu1 %v6525_v5  ;;  %6526 = vst [vmem:[#allocation43_spill] sm:$0xff] %v4976_v51  ;;  %v878_v54 = vmul.f32 %v4755_v6, %v866_v8  ;;  %v1090_v56 = vand.u32 2147483647, %v1082_v2  ;;  %v1306_v19 = vadd.f32 %v4811_v46, %v1294_v47  ;;  %v4983_v11 = vsel %vm659_vm3, %v6528_v36, %v6527_v15  ;;  %v6529_v2 = vld [vmem:[#allocation80_spill] sm:$0xff]  ;;  %v6532_v36 = vld [vmem:[#allocation81_spill] sm:$0xff] }
 0x2f8   :  { %1939 = vperm.xlu1 %3630, %v4125_v38   ;;  %v998_v25 = vadd.f32 %v990_v55, %v766_v27  ;;  %v749_v45 = vadd.f32 %v4786_v7, %v737_v34  ;;  %v973_v33 = vadd.f32 %v4794_v28, %v961_v44  ;;  %v1197_v31 = vadd.f32 %v4807_v14, %v1185_v30 }
 0x2f9   :  { %v1102_v63 = vmul.f32 %v4760_v29, %v1090_v56  ;;  %v1314_v1 = vand.u32 2147483647, %v1306_v19  ;;  %v861_v8 = vadd.f32 %v4790_v43, %v849_v41  ;;  %v4993_v47 = vsel %vm659_vm3, %v6530_v60, %v6529_v2  ;;  %v6533_v41 = vld [vmem:[#allocation69_spill] sm:$0xff]  ;;  %v6534_v60 = vld [vmem:[#allocation82_spill] sm:$0xff]  ;;  %v6535_v2 = vld [vmem:[#allocation71_spill] sm:$0xff] }
 0x2fa   :  { %2171 = vperm.xlu0 %3717, %v4131_v40   ;;  %v4996_v15 = vadd.f32 %v1214_v10, %v998_v25  ;;  %v757_v27 = vand.u32 2147483647, %v749_v45  ;;  %v981_v34 = vand.u32 2147483647, %v973_v33  ;;  %v6531_v55 = vmov 8   ;;  %v6536_v10 = vld [vmem:[#allocation13_spill] sm:$0xff] }
 0x2fb   :  { %v1110_v44 = vadd.f32 %v1102_v63, %v878_v54  ;;  %v1326_v56 = vmul.f32 %v4782_v57, %v1314_v1  ;;  %v1205_v19 = vand.u32 2147483647, %v1197_v31  ;;  %v869_v30 = vand.u32 2147483647, %v861_v8  ;;  %v5011_v45 = vpop.permute.xlu0 %1459 }
 0x2fc   :  { %3631 = vset.pattern.permute.xlu1 %v6531_v55  ;;  %v5003_v52 = vsel %vm659_vm3, %v6533_v41, %v6532_v36  ;;  %v5008_v51 = vsel %vm659_vm3, %v6535_v2, %v6534_v60  ;;  %v769_v54 = vmul.f32 %v4764_v53, %v757_v27  ;;  %v993_v1 = vmul.f32 %v4768_v32, %v981_v34  ;;  %v6537_v34 = vld [vmem:[#allocation83_spill] sm:$0xff] }
 0x2fd   :  { %1575 = vperm.xlu1 %3631, %v6536_v10   ;;  %v5015_v31 = vadd.f32 %v1326_v56, %v1110_v44  ;;  %v1217_v25 = vmul.f32 %v4772_v37, %v1205_v19  ;;  %v881_v33 = vmul.f32 %v4755_v6, %v869_v30  ;;  %v1085_v63 = vadd.f32 %v4798_v20, %v4888_v9  ;;  %v6538_v44 = vld [vmem:[#allocation73_spill] sm:$0xff] }
 0x2fe   :  { %2183 = vperm.xlu0 %3717, %v6509_v62   ;;  %v1001_v8 = vadd.f32 %v993_v1, %v769_v54  ;;  %v1309_v36 = vadd.f32 %v4811_v46, %v4896_v3  ;;  %v750_v41 = vadd.f32 %v4786_v7, %v738_v42  ;;  %v974_v27 = vadd.f32 %v4794_v28, %v962_v23 }
 0x2ff   :  { %v5029_v56 = vsel %vm659_vm3, %v6538_v44, %v6537_v34  ;;  %v1093_v19 = vand.u32 2147483647, %v1085_v63  ;;  %v1198_v30 = vadd.f32 %v4807_v14, %v1186_v21  ;;  %v862_v9 = vadd.f32 %v4790_v43, %v850_v17  ;;  %v5034_v2 = vpop.permute.xlu0 %1463 }
 0x300   :  { %v6539_v60 = vmov 9   ;;  %6540 = vst [vmem:[#allocation60_spill] sm:$0xff] %v5034_v2  ;;  %v5036_v54 = vadd.f32 %v1217_v25, %v1001_v8  ;;  %v1317_v3 = vand.u32 2147483647, %v1309_v36  ;;  %v758_v42 = vand.u32 2147483647, %v750_v41 }
 0x301   :  { %3632 = vset.pattern.permute.xlu1 %v6539_v60  ;;  %v982_v1 = vand.u32 2147483647, %v974_v27  ;;  %v1105_v23 = vmul.f32 %v4760_v29, %v1093_v19  ;;  %v1206_v34 = vand.u32 2147483647, %v1198_v30  ;;  %v870_v44 = vand.u32 2147483647, %v862_v9 }
 0x302   :  { %6541 = vst [vmem:[#allocation45_spill] sm:$0xff] %v5036_v54  ;;  %1687 = vperm.xlu1 %3632, %v6536_v10   ;;  %v1086_v21 = vadd.f32 %v4798_v20, %v4958_v12  ;;  %v6330_v63 = vmov 13   ;;  %v1329_v17 = vmul.f32 %v4782_v57, %v1317_v3  ;;  %v770_v25 = vmul.f32 %v4764_v53, %v758_v42  ;;  %v6588_v2 = vld [vmem:[#allocation31_spill] sm:$0xff] }
 0x303   :  { %3720 = vset.pattern.permute.xlu0 %v6330_v63  ;;  %v994_v8 = vmul.f32 %v4768_v32, %v982_v1  ;;  %v1310_v36 = vadd.f32 %v4811_v46, %v4969_v61  ;;  %v1113_v41 = vadd.f32 %v1105_v23, %v881_v33  ;;  %v1218_v27 = vmul.f32 %v4772_v37, %v1206_v34  ;;  %v5051_v30 = vpop.permute.xlu0 %1479 }
 0x304   :  { %2135 = vperm.xlu0 %3720, %v6536_v10   ;;  %v882_v19 = vmul.f32 %v4755_v6, %v870_v44  ;;  %v1094_v12 = vand.u32 2147483647, %v1086_v21  ;;  %6542 = vst [vmem:[#allocation62_spill] sm:$0xff] %v5051_v30  ;;  %v751_v3 = vadd.f32 %v4786_v7, %v4901_v18  ;;  %v975_v42 = vadd.f32 %v4794_v28, %v4914_v58 }
 0x305   :  { %v1002_v9 = vadd.f32 %v994_v8, %v770_v25  ;;  %v1318_v63 = vand.u32 2147483647, %v1310_v36  ;;  %v6543_v1 = vmov 25   ;;  %v5058_v61 = vadd.f32 %v1329_v17, %v1113_v41  ;;  %v6546_v25 = vld [vmem:[#allocation14_spill] sm:$0xff] }
 0x306   :  { %3633 = vset.pattern.permute.xlu1 %v6543_v1  ;;  %v1106_v33 = vmul.f32 %v4760_v29, %v1094_v12  ;;  %v1199_v23 = vadd.f32 %v4807_v14, %v4926_v24  ;;  %v863_v34 = vadd.f32 %v4790_v43, %v4909_v35  ;;  %v759_v21 = vand.u32 2147483647, %v751_v3 }
 0x307   :  { %6544 = vst [vmem:[#allocation47_spill] sm:$0xff] %v5058_v61  ;;  %1719 = vperm.xlu1 %3633, %v6536_v10   ;;  %v5066_v44 = vadd.f32 %v1218_v27, %v1002_v9  ;;  %v1330_v18 = vmul.f32 %v4782_v57, %v1318_v63  ;;  %v983_v58 = vand.u32 2147483647, %v975_v42  ;;  %v1087_v41 = vadd.f32 %v4798_v20, %v4919_v59  ;;  %v5072_v24 = vpop.permute.xlu0 %1483 }
 0x308   :  { %2147 = vperm.xlu0 %3720, %v6546_v25   ;;  %v1114_v17 = vadd.f32 %v1106_v33, %v882_v19  ;;  %v1207_v8 = vand.u32 2147483647, %v1199_v23  ;;  %v871_v36 = vand.u32 2147483647, %v863_v34  ;;  %6547 = vst [vmem:[#allocation49_spill] sm:$0xff] %v5072_v24  ;;  %v771_v35 = vmul.f32 %v4764_v53, %v759_v21 }
 0x309   :  { %6545 = vst [vmem:[#allocation64_spill] sm:$0xff] %v5066_v44  ;;  %v995_v12 = vmul.f32 %v4768_v32, %v983_v58  ;;  %v1311_v27 = vadd.f32 %v4811_v46, %v4937_v13  ;;  %v753_v63 = vadd.f32 %v4786_v7, %v4983_v11  ;;  %v1095_v42 = vand.u32 2147483647, %v1087_v41  ;;  %v6552_v41 = vld [vmem:[#allocation75_spill] sm:$0xff] }
 0x30a   :  { %v5080_v9 = vadd.f32 %v1330_v18, %v1114_v17  ;;  %v1219_v19 = vmul.f32 %v4772_v37, %v1207_v8  ;;  %v883_v3 = vmul.f32 %v4755_v6, %v871_v36  ;;  %v6549_v59 = vmov 28  }
 0x30b   :  { %3634 = vset.pattern.permute.xlu1 %v6549_v59  ;;  %v1003_v33 = vadd.f32 %v995_v12, %v771_v35  ;;  %v1319_v23 = vand.u32 2147483647, %v1311_v27  ;;  %v761_v34 = vand.u32 2147483647, %v753_v63  ;;  %v977_v21 = vadd.f32 %v4794_v28, %v5003_v52  ;;  %v6551_v52 = vld [vmem:[#allocation85_spill] sm:$0xff] }
 0x30c   :  { %6548 = vst [vmem:[#allocation26_spill] sm:$0xff] %v5080_v9  ;;  %2047 = vperm.xlu1 %3634, %v4129_v39   ;;  %2155 = vperm.xlu0 %3720, %v4269_v4   ;;  %v1107_v13 = vmul.f32 %v4760_v29, %v1095_v42  ;;  %v1201_v11 = vadd.f32 %v4807_v14, %v5029_v56  ;;  %v5101_v12 = vpop.permute.xlu0 %1691  ;;  %v6569_v9 = vmov 22  }
 0x30d   :  { %v865_v18 = vadd.f32 %v4790_v43, %v4993_v47  ;;  %v5094_v58 = vadd.f32 %v1219_v19, %v1003_v33  ;;  %v1331_v17 = vmul.f32 %v4782_v57, %v1319_v23  ;;  %v773_v8 = vmul.f32 %v4764_v53, %v761_v34  ;;  %6553 = vst [vmem:[#allocation51_spill] sm:$0xff] %v5101_v12 }
 0x30e   :  { %v985_v36 = vand.u32 2147483647, %v977_v21  ;;  %v1301_v35 = vsel %vm659_vm3, %v6552_v41, %v6551_v52  ;;  %v1115_v27 = vadd.f32 %v1107_v13, %v883_v3  ;;  %v1209_v63 = vand.u32 2147483647, %v1201_v11 }
 0x30f   :  { %6550 = vst [vmem:[#allocation66_spill] sm:$0xff] %v5094_v58  ;;  %v873_v42 = vand.u32 2147483647, %v865_v18  ;;  %v1089_v47 = vadd.f32 %v4798_v20, %v5008_v51  ;;  %v1313_v19 = vadd.f32 %v4811_v46, %v1301_v35  ;;  %v6554_v33 = vmov 13   ;;  %v6575_v58 = vld [vmem:[#allocation25_spill] sm:$0xff] }
 0x310   :  { %v997_v56 = vmul.f32 %v4768_v32, %v985_v36  ;;  %3635 = vset.pattern.permute.xlu1 %v6554_v33  ;;  %v6332_v23 = vmov 30   ;;  %v5109_v34 = vadd.f32 %v1331_v17, %v1115_v27  ;;  %v1221_v21 = vmul.f32 %v4772_v37, %v1209_v63  ;;  %v5115_v18 = vpop.permute.xlu0 %1703 }
 0x311   :  { %3723 = vset.pattern.permute.xlu0 %v6332_v23  ;;  %v885_v3 = vmul.f32 %v4755_v6, %v873_v42  ;;  %2127 = vperm.xlu1 %3635, %v4129_v39   ;;  %v1097_v11 = vand.u32 2147483647, %v1089_v47  ;;  %v1321_v51 = vand.u32 2147483647, %v1313_v19  ;;  %6556 = vst [vmem:[#allocation68_spill] sm:$0xff] %v5115_v18  ;;  %v6559_v27 = vmov 24  }
 0x312   :  { %6555 = vst [vmem:[#allocation53_spill] sm:$0xff] %v5109_v34  ;;  %2271 = vperm.xlu0 %3723, %v4129_v39   ;;  %v1005_v13 = vadd.f32 %v997_v56, %v773_v8  ;;  %v6334_v19 = vmov 14   ;;  %v6573_v18 = vld [vmem:[#allocation100_spill] sm:$0xff] }
 0x313   :  { %v1109_v52 = vmul.f32 %v4760_v29, %v1097_v11  ;;  %v1333_v17 = vmul.f32 %v4782_v57, %v1321_v51  ;;  %v6580_v29 = vld [vmem:[#allocation7_spill] sm:$0xff] }
 0x314   :  { %v5117_v36 = vadd.f32 %v1221_v21, %v1005_v13  ;;  %v6562_v21 = vmov 12  }
 0x315   :  { %3636 = vset.pattern.permute.xlu1 %v6531_v55  ;;  %v1117_v41 = vadd.f32 %v1109_v52, %v885_v3  ;;  %v5124_v35 = vpop.permute.xlu0 %2051  ;;  %v6565_v52 = vld [vmem:[#allocation22_spill] sm:$0xff] }
 0x316   :  { %6557 = vst [vmem:[#allocation55_spill] sm:$0xff] %v5117_v36  ;;  %2275 = vperm.xlu0 %3723, %v4125_v38   ;;  %1579 = vperm.xlu1 %3636, %v4131_v40  }
 0x317   :  { %v5126_v8 = vadd.f32 %v1333_v17, %v1117_v41  ;;  %v6566_v41 = vmov 29  }
 0x319   :  { %6558 = vst [vmem:[#allocation70_spill] sm:$0xff] %v5126_v8  ;;  %v5131_v63 = vpop.permute.xlu0 %2063 }
 0x31a   :  { %2291 = vperm.xlu0 %3723, %v6546_v25   ;;  %3637 = vset.pattern.permute.xlu1 %v6559_v27  ;;  %6560 = vst [vmem:[#allocation57_spill] sm:$0xff] %v5131_v63  ;;  %v5133_v42 = vpop.xlane.xlu1 %576 }
 0x31b   :  { %1611 = vperm.xlu1 %3637, %v4131_v40   ;;  %6561 = vst [vmem:[#allocation72_spill] sm:$0xff] %v5133_v42  ;;  %v6568_v42 = vmov 31  }
 0x31e   :  { %2295 = vperm.xlu0 %3723, %v6509_v62   ;;  %v1380_v56 = vpop.permute.xlu1 %1379  ;;  %v1572_v47 = vpop.permute.xlu0 %1571 }
 0x31f   :  { %3638 = vset.pattern.permute.xlu1 %v6543_v1 }
 0x320   :  { %1723 = vperm.xlu1 %3638, %v4131_v40  }
 0x322   :  { %3726 = vset.pattern.permute.xlu0 %v6334_v19  ;;  %v1492_v3 = vpop.permute.xlu1 %1491  ;;  %v5141_v13 = vpop.permute.xlu0 %1583 }
 0x323   :  { %2247 = vperm.xlu0 %3726, %v6536_v10   ;;  %6563 = vst [vmem:[#allocation58_spill] sm:$0xff] %v5141_v13  ;;  %v6571_v13 = vld [vmem:[#allocation5_spill] sm:$0xff] }
 0x324   :  { %3639 = vset.pattern.permute.xlu1 %v6562_v21  ;;  %v5168_v8 = vsub.s32 6, %v6571_v13  ;;  %v5171_v36 = vsub.s32 7, %v6571_v13 }
 0x325   :  { %2019 = vperm.xlu1 %3639, %v4125_v38  }
 0x326   :  { %v5145_v11 = vpop.permute.xlu0 %1595  ;;  %v5179_v30 = vrot.slane %v6573_v18, %v5168_v8  ;;  %v5185_v61 = vrot.slane %v6573_v18, %v5171_v36 }
 0x327   :  { %2251 = vperm.xlu0 %3726, %v4131_v40   ;;  %6564 = vst [vmem:[#allocation74_spill] sm:$0xff] %v5145_v11  ;;  %v5148_v51 = vpop.permute.xlu1 %1567  ;;  %v6572_v11 = vld [vmem:[#allocation27_spill] sm:$0xff] }
 0x328   :  { %v1407_v24 = vsel %vm659_vm3, %v6572_v11, %v1380_v56 }
 0x329   :  { %3640 = vset.pattern.permute.xlu1 %v6554_v33  ;;  %v1419_v54 = vadd.f32 %v5179_v30, %v1407_v24 }
 0x32a   :  { %2131 = vperm.xlu1 %3640, %v4125_v38  }
 0x32b   :  { %2255 = vperm.xlu0 %3726, %v6565_v52   ;;  %v1716_v17 = vpop.permute.xlu0 %1715  ;;  %v1427_v56 = vand.u32 2147483647, %v1419_v54  ;;  %v6578_v54 = vld [vmem:[#allocation8_spill] sm:$0xff] }
 0x32c   :  { %v5153_v23 = vpop.permute.xlu1 %1679 }
 0x32e   :  { %3641 = vset.pattern.permute.xlu1 %v6566_v41 }
 0x32f   :  { %2267 = vperm.xlu0 %3726, %v4269_v4   ;;  %2163 = vperm.xlu1 %3641, %v4125_v38   ;;  %v5157_v19 = vpop.permute.xlu0 %1727 }
 0x330   :  { %6567 = vst [vmem:[#allocation59_spill] sm:$0xff] %v5157_v19 }
 0x331   :  { %v5161_v44 = vpop.permute.xlu1 %1711 }
 0x333   :  { %3731 = vset.pattern.permute.xlu0 %v6568_v42  ;;  %3642 = vset.pattern.permute.xlu1 %v6569_v9  ;;  %v5165_v63 = vpop.permute.xlu0 %1739 }
 0x334   :  { %2411 = vperm.xlu0 %3731, %v4269_v4   ;;  %1391 = vperm.xlu1 %3642, %v6565_v52   ;;  %6570 = vst [vmem:[#allocation76_spill] sm:$0xff] %v5165_v63  ;;  %v1519_v63 = vsel %vm659_vm3, %v5011_v45, %v1492_v3  ;;  %v5194_v45 = vld [vmem:[%s6235_s3 + $0x8] sm:$0xff] }
 0x335   :  { %v1531_v12 = vadd.f32 %v5185_v61, %v1519_v63  ;;  %v6576_v63 = vld [vmem:[#allocation91_spill] sm:$0xff]  ;;  %v5227_v53 = vrot.slane %v5194_v45, %v6578_v54 }
 0x336   :  { %v1604_v19 = vpop.permute.xlu1 %1603  ;;  %v5205_v57 = vrot.slane %v6576_v63, %v5168_v8 }
 0x337   :  { %v1539_v3 = vand.u32 2147483647, %v1531_v12  ;;  %v1631_v12 = vsel %vm659_vm3, %v1572_v47, %v1604_v19  ;;  %6583 = vst [vmem:[#allocation67_spill] sm:$0xff] %v5227_v53 }
 0x338   :  { %3643 = vset.pattern.permute.xlu1 %v6448_v49  ;;  %v1824_v13 = vpop.permute.xlu0 %1823  ;;  %6577 = vst [vmem:[#allocation77_spill] sm:$0xff] %v5205_v57 }
 0x339   :  { %1471 = vperm.xlu1 %3643, %v6565_v52  }
 0x33b   :  { %v1684_v34 = vpop.permute.xlu1 %1683 }
 0x33c   :  { %v5196_v18 = vpop.permute.xlu0 %1839 }
 0x33d   :  { %3644 = vset.pattern.permute.xlu1 %v6497_v50  ;;  %6574 = vst [vmem:[#allocation61_spill] sm:$0xff] %v5196_v18  ;;  %v1439_v18 = vmul.f32 %v5205_v57, %v1427_v56 }
 0x33e   :  { %1799 = vperm.xlu1 %3644, %v6536_v10  }
 0x33f   :  { %v656_v11 = vpop.permute.xlu1 %655 }
 0x340   :  { %v5200_v24 = vsel %vm659_vm3, %v6575_v58, %v656_v11  ;;  %v5218_v58 = vrot.slane %v6576_v63, %v5171_v36  ;;  %v1743_v11 = vsel %vm659_vm3, %v1684_v34, %v1716_v17  ;;  %v5234_v63 = vrot.slane %v5194_v45, %v6580_v29  ;;  %v5237_v47 = vpop.permute.xlu0 %1843 }
 0x341   :  { %v5209_v37 = vrot.slane %v5200_v24, %v6578_v54  ;;  %v5213_v6 = vrot.slane %v5200_v24, %v6580_v29  ;;  %6585 = vst [vmem:[#allocation69_spill] sm:$0xff] %v5237_v47  ;;  %v1447_v17 = vadd.f32 %v1439_v18, %v4858_v22  ;;  %v6586_v54 = vmov 14   ;;  %v6587_v47 = vld [vmem:[#allocation28_spill] sm:$0xff] }
 0x342   :  { %3645 = vset.pattern.permute.xlu1 %v6508_v48  ;;  %6582 = vst [vmem:[#allocation80_spill] sm:$0xff] %v5218_v58  ;;  %v1551_v14 = vmul.f32 %v5218_v58, %v1539_v3  ;;  %6584 = vst [vmem:[#allocation81_spill] sm:$0xff] %v5234_v63  ;;  %v1630_v22 = vsel %vm659_vm3, %v5148_v51, %v4904_v26 }
 0x343   :  { %6579 = vst [vmem:[#allocation79_spill] sm:$0xff] %v5209_v37  ;;  %6581 = vst [vmem:[#allocation65_spill] sm:$0xff] %v5213_v6  ;;  %1831 = vperm.xlu1 %3645, %v6536_v10   ;;  %v5223_v32 = vpop.permute.xlu1 %1351  ;;  %v1643_v46 = vadd.f32 %v5209_v37, %v1631_v12  ;;  %v1755_v0 = vadd.f32 %v5213_v6, %v1743_v11  ;;  %v1642_v18 = vadd.f32 %v5209_v37, %v1630_v22 }
 0x344   :  { %v1559_v12 = vadd.f32 %v1551_v14, %v4921_v16  ;;  %v5258_v14 = vpop.permute.xlu0 %1847 }
 0x345   :  { %v1651_v34 = vand.u32 2147483647, %v1643_v46  ;;  %v1763_v19 = vand.u32 2147483647, %v1755_v0  ;;  %v1406_v0 = vsel %vm659_vm3, %v6588_v2, %v6587_v47  ;;  %6589 = vst [vmem:[#allocation82_spill] sm:$0xff] %v5258_v14 }
 0x346   :  { %v1418_v16 = vadd.f32 %v5179_v30, %v1406_v0  ;;  %v1650_v47 = vand.u32 2147483647, %v1642_v18 }
 0x347   :  { %3646 = vset.pattern.permute.xlu1 %v6525_v5  ;;  %v1663_v56 = vmul.f32 %v5227_v53, %v1651_v34  ;;  %v1775_v3 = vmul.f32 %v5234_v63, %v1763_v19  ;;  %v6347_v19 = vmov 15  }
 0x348   :  { %1943 = vperm.xlu1 %3646, %v6536_v10   ;;  %v5243_v11 = vpop.permute.xlu1 %1383  ;;  %v1426_v2 = vand.u32 2147483647, %v1418_v16  ;;  %v1662_v22 = vmul.f32 %v5227_v53, %v1650_v47 }
 0x349   :  { %v5246_v29 = vadd.f32 %v1663_v56, %v1447_v17  ;;  %v5249_v46 = vadd.f32 %v1775_v3, %v1559_v12  ;;  %v6590_v17 = vld [vmem:[#allocation89_spill] sm:$0xff]  ;;  %v5270_v51 = vpop.permute.xlu0 %2391 }
 0x34a   :  { %v5268_v26 = vrot.slane %v5200_v24, %v6590_v17  ;;  %6591 = vst [vmem:[#allocation71_spill] sm:$0xff] %v5270_v51  ;;  %v5275_v3 = vrot.slane %v5194_v45, %v6590_v17  ;;  %v1438_v0 = vmul.f32 %v5205_v57, %v1426_v2 }
 0x34c   :  { %3647 = vset.pattern.permute.xlu1 %v6586_v54  ;;  %v1446_v18 = vadd.f32 %v1438_v0, %v4996_v15 }
 0x34d   :  { %2239 = vperm.xlu1 %3647, %v4129_v39   ;;  %v5262_v34 = vpop.permute.xlu1 %1495  ;;  %v5283_v51 = vpop.permute.xlu0 %2395 }
 0x34e   :  { %6592 = vst [vmem:[#allocation13_spill] sm:$0xff] %v5283_v51 }
 0x351   :  { %3648 = vset.pattern.permute.xlu1 %v6347_v19 }
 0x352   :  { %2351 = vperm.xlu1 %3648, %v4129_v39   ;;  %v1792_v56 = vpop.permute.xlu1 %1791 }
 0x353   :  { %v1854_v12 = vsel %vm659_vm3, %v1792_v56, %v1824_v13  ;;  %v1670_v13 = vadd.f32 %v1662_v22, %v1446_v18  ;;  %v6598_v18 = vld [vmem:[#allocation92_spill] sm:$0xff] }
 0x354   :  { %v1866_v16 = vadd.f32 %v5268_v26, %v1854_v12  ;;  %v5290_v12 = vpop.permute.xlu0 %2399 }
 0x355   :  { %6593 = vst [vmem:[#allocation83_spill] sm:$0xff] %v5290_v12 }
 0x356   :  { %3649 = vset.pattern.permute.xlu1 %v6568_v42  ;;  %v1874_v19 = vand.u32 2147483647, %v1866_v16 }
 0x357   :  { %2383 = vperm.xlu1 %3649, %v4129_v39   ;;  %v1904_v14 = vpop.permute.xlu1 %1903 }
 0x358   :  { %v1886_v56 = vmul.f32 %v5275_v3, %v1874_v19  ;;  %v1908_v15 = vpop.permute.xlu0 %1907 }
 0x35a   :  { %v5287_v2 = vadd.f32 %v1886_v56, %v1670_v13  ;;  %v5316_v13 = vrot.slane %v5200_v24, %v6598_v18 }
 0x35b   :  { %3651 = vset.pattern.permute.xlu1 %v6569_v9 }
 0x35c   :  { %1395 = vperm.xlu1 %3651, %v6546_v25   ;;  %v1936_v47 = vpop.permute.xlu1 %1935  ;;  %v5302_v0 = vpop.permute.xlu0 %1911  ;;  %6599 = vst [vmem:[#allocation22_spill] sm:$0xff] %v5316_v13 }
 0x35d   :  { %6596 = vst [vmem:[#allocation85_spill] sm:$0xff] %v5302_v0  ;;  %v6607_v0 = vld [vmem:[#allocation93_spill] sm:$0xff] }
 0x360   :  { %3652 = vset.pattern.permute.xlu1 %v6448_v49  ;;  %v5308_v49 = vpop.permute.xlu0 %1915 }
 0x361   :  { %1475 = vperm.xlu1 %3652, %v6546_v25   ;;  %v5294_v39 = vpop.permute.xlu1 %1387  ;;  %6597 = vst [vmem:[#allocation75_spill] sm:$0xff] %v5308_v49  ;;  %v5326_v49 = vrot.slane %v5194_v45, %v6598_v18  ;;  %v6604_v18 = vld [vmem:[#allocation90_spill] sm:$0xff] }
 0x362   :  { %6594 = vst [vmem:[#allocation73_spill] sm:$0xff] %v5294_v39 }
 0x363   :  { %6602 = vst [vmem:[#allocation100_spill] sm:$0xff] %v5326_v49 }
 0x364   :  { %v5318_v17 = vpop.permute.xlu0 %1931 }
 0x365   :  { %3654 = vset.pattern.permute.xlu1 %v6497_v50  ;;  %6600 = vst [vmem:[#allocation27_spill] sm:$0xff] %v5318_v17 }
 0x366   :  { %1803 = vperm.xlu1 %3654, %v4131_v40   ;;  %v5298_v19 = vpop.permute.xlu1 %1467 }
 0x367   :  { %6595 = vst [vmem:[#allocation14_spill] sm:$0xff] %v5298_v19  ;;  %v6601_v19 = vmov 15  }
 0x368   :  { %v2016_v53 = vpop.permute.xlu0 %2015 }
 0x36a   :  { %3655 = vset.pattern.permute.xlu1 %v6508_v48 }
 0x36b   :  { %1835 = vperm.xlu1 %3655, %v4131_v40  }
 0x36d   :  { %v5304_v22 = vpop.permute.xlu1 %1795 }
 0x36f   :  { %3656 = vset.pattern.permute.xlu1 %v6525_v5 }
 0x370   :  { %1947 = vperm.xlu1 %3656, %v4131_v40  }
 0x372   :  { %v5310_v16 = vpop.permute.xlu1 %1827 }
 0x374   :  { %3657 = vset.pattern.permute.xlu1 %v6586_v54 }
 0x375   :  { %2243 = vperm.xlu1 %3657, %v4125_v38  }
 0x377   :  { %v1940_v56 = vpop.permute.xlu1 %1939 }
 0x378   :  { %v1967_v12 = vsel %vm659_vm3, %v1908_v15, %v1940_v56  ;;  %v5339_v56 = vpop.permute.xlu0 %2027 }
 0x379   :  { %v1979_v51 = vadd.f32 %v5316_v13, %v1967_v12  ;;  %3658 = vset.pattern.permute.xlu1 %v6601_v19  ;;  %6603 = vst [vmem:[#allocation25_spill] sm:$0xff] %v5339_v56 }
 0x37a   :  { %2355 = vperm.xlu1 %3658, %v4125_v38  }
 0x37b   :  { %v1987_v39 = vand.u32 2147483647, %v1979_v51 }
 0x37c   :  { %v5328_v54 = vpop.permute.xlu1 %1575  ;;  %v5356_v57 = vpop.permute.xlu0 %2039 }
 0x37d   :  { %v1999_v48 = vmul.f32 %v5326_v49, %v1987_v39  ;;  %v6605_v39 = vld [vmem:[#allocation29_spill] sm:$0xff]  ;;  %6606 = vst [vmem:[#allocation91_spill] sm:$0xff] %v5356_v57  ;;  %v6608_v57 = vld [vmem:[#allocation94_spill] sm:$0xff] }
 0x37e   :  { %3659 = vset.pattern.permute.xlu1 %v6568_v42  ;;  %v1518_v17 = vsel %vm659_vm3, %v6605_v39, %v6604_v18  ;;  %v5360_v18 = vrot.slane %v5200_v24, %v6607_v0 }
 0x37f   :  { %v5333_v15 = vadd.f32 %v1999_v48, %v5249_v46  ;;  %2387 = vperm.xlu1 %3659, %v4125_v38   ;;  %v1742_v48 = vsel %vm659_vm3, %v5153_v23, %v5161_v44  ;;  %v1966_v38 = vsel %vm659_vm3, %v1904_v14, %v1936_v47  ;;  %v1530_v42 = vadd.f32 %v5185_v61, %v1518_v17 }
 0x380   :  { %v1754_v46 = vadd.f32 %v5213_v6, %v1742_v48  ;;  %v1978_v56 = vadd.f32 %v5316_v13, %v1966_v38  ;;  %v5365_v17 = vrot.slane %v5194_v45, %v6607_v0  ;;  %v5372_v13 = vrot.slane %v5200_v24, %v6608_v57 }
 0x381   :  { %v5336_v12 = vpop.permute.xlu1 %1687  ;;  %v1538_v23 = vand.u32 2147483647, %v1530_v42 }
 0x382   :  { %v1762_v44 = vand.u32 2147483647, %v1754_v46  ;;  %v1986_v48 = vand.u32 2147483647, %v1978_v56  ;;  %v2160_v46 = vpop.permute.xlu0 %2159 }
 0x383   :  { %3660 = vset.pattern.permute.xlu1 %v6559_v27 }
 0x384   :  { %1615 = vperm.xlu1 %3660, %v6565_v52   ;;  %v1774_v42 = vmul.f32 %v5234_v63, %v1762_v44  ;;  %v1998_v56 = vmul.f32 %v5326_v49, %v1986_v48  ;;  %v5450_v49 = vrot.slane %v5194_v45, %v5168_v8 }
 0x386   :  { %v5342_v51 = vpop.permute.xlu1 %1719 }
 0x388   :  { %3661 = vset.pattern.permute.xlu1 %v6539_v60 }
 0x389   :  { %1695 = vperm.xlu1 %3661, %v6565_v52  }
 0x38b   :  { %v2048_v39 = vpop.permute.xlu1 %2047 }
 0x38c   :  { %v2078_v14 = vsel %vm659_vm3, %v2016_v53, %v2048_v39  ;;  %v1550_v53 = vmul.f32 %v5218_v58, %v1538_v23 }
 0x38d   :  { %v2090_v47 = vadd.f32 %v5360_v18, %v2078_v14  ;;  %3662 = vset.pattern.permute.xlu1 %v6562_v21 }
 0x38e   :  { %2023 = vperm.xlu1 %3662, %v6536_v10   ;;  %v1558_v6 = vadd.f32 %v1550_v53, %v5015_v31 }
 0x38f   :  { %v2098_v38 = vand.u32 2147483647, %v2090_v47  ;;  %v5382_v47 = vrot.slane %v5194_v45, %v6608_v57 }
 0x390   :  { %v2128_v39 = vpop.permute.xlu1 %2127  ;;  %v1782_v23 = vadd.f32 %v1774_v42, %v1558_v6  ;;  %v5409_v42 = vpop.permute.xlu0 %2171 }
 0x391   :  { %v2110_v0 = vmul.f32 %v5365_v17, %v2098_v38  ;;  %v2190_v14 = vsel %vm659_vm3, %v2128_v39, %v2160_v46  ;;  %6612 = vst [vmem:[#allocation90_spill] sm:$0xff] %v5409_v42  ;;  %v6624_v42 = vmov 11  }
 0x392   :  { %v2202_v37 = vadd.f32 %v5372_v13, %v2190_v14  ;;  %3663 = vset.pattern.permute.xlu1 %v6549_v59  ;;  %v2006_v46 = vadd.f32 %v1998_v56, %v1782_v23  ;;  %v6615_v14 = vmov 6  }
 0x393   :  { %v2118_v44 = vadd.f32 %v2110_v0, %v5287_v2  ;;  %2055 = vperm.xlu1 %3663, %v6536_v10  }
 0x394   :  { %v2210_v38 = vand.u32 2147483647, %v2202_v37  ;;  %v5417_v0 = vpop.permute.xlu0 %2183 }
 0x395   :  { %v5388_v63 = vpop.permute.xlu1 %1579  ;;  %6614 = vst [vmem:[#allocation93_spill] sm:$0xff] %v5417_v0 }
 0x396   :  { %6609 = vst [vmem:[#allocation28_spill] sm:$0xff] %v5388_v63  ;;  %v2222_v31 = vmul.f32 %v5382_v47, %v2210_v38 }
 0x397   :  { %3664 = vset.pattern.permute.xlu1 %v6566_v41 }
 0x398   :  { %v2230_v48 = vadd.f32 %v2222_v31, %v2006_v46  ;;  %2167 = vperm.xlu1 %3664, %v6536_v10   ;;  %v5423_v23 = vpop.permute.xlu0 %2135  ;;  %v6619_v46 = vmov 23  }
 0x399   :  { %6617 = vst [vmem:[#allocation108_spill] sm:$0xff] %v5423_v23 }
 0x39a   :  { %v5393_v57 = vpop.permute.xlu1 %1611 }
 0x39b   :  { %6610 = vst [vmem:[#allocation31_spill] sm:$0xff] %v5393_v57 }
 0x39c   :  { %3665 = vset.pattern.permute.xlu1 %v6531_v55  ;;  %v5430_v31 = vpop.permute.xlu0 %2147 }
 0x39d   :  { %1587 = vperm.xlu1 %3665, %v6546_v25   ;;  %6620 = vst [vmem:[#allocation110_spill] sm:$0xff] %v5430_v31 }
 0x39f   :  { %v5397_v2 = vpop.permute.xlu1 %1723 }
 0x3a0   :  { %6611 = vst [vmem:[#allocation92_spill] sm:$0xff] %v5397_v2  ;;  %v5445_v2 = vrot.slane %v5200_v24, %v5168_v8 }
 0x3a1   :  { %3667 = vset.pattern.permute.xlu1 %v6539_v60 }
 0x3a2   :  { %1699 = vperm.xlu1 %3667, %v6546_v25  }
 0x3a4   :  { %v5401_v6 = vpop.permute.xlu1 %2019 }
 0x3a6   :  { %3668 = vset.pattern.permute.xlu1 %v6543_v1 }
 0x3a7   :  { %1731 = vperm.xlu1 %3668, %v6546_v25  }
 0x3a9   :  { %v5405_v37 = vpop.permute.xlu1 %2131 }
 0x3ab   :  { %3669 = vset.pattern.permute.xlu1 %v6549_v59 }
 0x3ac   :  { %2059 = vperm.xlu1 %3669, %v4131_v40  }
 0x3ae   :  { %v5411_v53 = vpop.permute.xlu1 %2163 }
 0x3b0   :  { %3670 = vset.pattern.permute.xlu1 %v6554_v33 }
 0x3b1   :  { %2139 = vperm.xlu1 %3670, %v4131_v40  }
 0x3b3   :  { %v5415_v39 = vpop.permute.xlu1 %1391 }
 0x3b4   :  { %6613 = vst [vmem:[#allocation29_spill] sm:$0xff] %v5415_v39 }
 0x3b5   :  { %3671 = vset.pattern.permute.xlu1 %v6615_v14 }
 0x3b6   :  { %1367 = vperm.xlu1 %3671, %v6509_v62  }
 0x3b8   :  { %v5421_v56 = vpop.permute.xlu1 %1471 }
 0x3b9   :  { %6616 = vst [vmem:[#allocation94_spill] sm:$0xff] %v5421_v56  ;;  %v5437_v56 = vpop.permute.xlu0 %2155 }
 0x3ba   :  { %3672 = vset.pattern.permute.xlu1 %v6569_v9  ;;  %6622 = vst [vmem:[#allocation112_spill] sm:$0xff] %v5437_v56 }
 0x3bb   :  { %1399 = vperm.xlu1 %3672, %v6509_v62  }
 0x3bd   :  { %v5427_v38 = vpop.permute.xlu1 %1799  ;;  %v2272_v31 = vpop.permute.xlu0 %2271 }
 0x3be   :  { %6618 = vst [vmem:[#allocation109_spill] sm:$0xff] %v5427_v38  ;;  %v6625_v38 = vmov 30  }
 0x3bf   :  { %3673 = vset.pattern.permute.xlu1 %v6619_v46 }
 0x3c0   :  { %1511 = vperm.xlu1 %3673, %v6509_v62  }
 0x3c2   :  { %v5433_v0 = vpop.permute.xlu1 %1831 }
 0x3c3   :  { %6621 = vst [vmem:[#allocation111_spill] sm:$0xff] %v5433_v0 }
 0x3c4   :  { %3674 = vset.pattern.permute.xlu1 %v6497_v50 }
 0x3c5   :  { %1807 = vperm.xlu1 %3674, %v6565_v52  }
 0x3c7   :  { %v5439_v39 = vpop.permute.xlu1 %1943 }
 0x3c8   :  { %6623 = vst [vmem:[#allocation113_spill] sm:$0xff] %v5439_v39 }
 0x3c9   :  { %3675 = vset.pattern.permute.xlu1 %v6624_v42 }
 0x3ca   :  { %1919 = vperm.xlu1 %3675, %v6565_v52  }
 0x3cc   :  { %v2240_v63 = vpop.permute.xlu1 %2239 }
 0x3cd   :  { %v2302_v57 = vsel %vm659_vm3, %v2240_v63, %v2272_v31  ;;  %v5460_v63 = vrot.slane %v5200_v24, %v5171_v36  ;;  %v5465_v31 = vrot.slane %v5194_v45, %v5171_v36 }
 0x3ce   :  { %v2314_v56 = vadd.f32 %v5445_v2, %v2302_v57  ;;  %3676 = vset.pattern.permute.xlu1 %v6525_v5 }
 0x3cf   :  { %1951 = vperm.xlu1 %3676, %v6565_v52  }
 0x3d0   :  { %v2322_v58 = vand.u32 2147483647, %v2314_v56 }
 0x3d1   :  { %v2352_v23 = vpop.permute.xlu1 %2351 }
 0x3d2   :  { %v2334_v39 = vmul.f32 %v5450_v49, %v2322_v58 }
 0x3d3   :  { %3677 = vset.pattern.permute.xlu1 %v6625_v38 }
 0x3d4   :  { %v2342_v0 = vadd.f32 %v2334_v39, %v2118_v44  ;;  %2279 = vperm.xlu1 %3677, %v6536_v10  }
 0x3d6   :  { %v2384_v8 = vpop.permute.xlu1 %2383 }
 0x3d7   :  { %v2414_v57 = vsel %vm659_vm3, %v2352_v23, %v2384_v8 }
 0x3d8   :  { %v2426_v56 = vadd.f32 %v5460_v63, %v2414_v57  ;;  %3678 = vset.pattern.permute.xlu1 %v6601_v19  ;;  %v2276_v57 = vpop.permute.xlu0 %2275 }
 0x3d9   :  { %2359 = vperm.xlu1 %3678, %v6536_v10  }
 0x3da   :  { %v2434_v58 = vand.u32 2147483647, %v2426_v56 }
 0x3db   :  { %v5470_v44 = vpop.permute.xlu1 %1395 }
 0x3dc   :  { %v2446_v39 = vmul.f32 %v5465_v31, %v2434_v58 }
 0x3dd   :  { %3679 = vset.pattern.permute.xlu1 %v6615_v14  ;;  %v2079_v14 = vsel %vm659_vm3, %v5401_v6, %v5124_v35 }
 0x3de   :  { %v2454_v24 = vadd.f32 %v2446_v39, %v2230_v48  ;;  %1371 = vperm.xlu1 %3679, %v4269_v4  }
 0x3e0   :  { %v5475_v23 = vpop.permute.xlu1 %1475  ;;  %v5477_v36 = vadd.f32 %v2454_v24, %v2342_v0 }
 0x3e2   :  { %6626 = vst [vmem:[#allocation114_spill] sm:$0xff] %v5477_v36  ;;  %3680 = vset.pattern.permute.xlu1 %v6569_v9  ;;  %v1855_v9 = vsel %vm659_vm3, %v5304_v22, %v5310_v16  ;;  %v2091_v22 = vadd.f32 %v5360_v18, %v2079_v14 }
 0x3e3   :  { %1403 = vperm.xlu1 %3680, %v4269_v4   ;;  %v1867_v8 = vadd.f32 %v5268_v26, %v1855_v9 }
 0x3e4   :  { %v2099_v6 = vand.u32 2147483647, %v2091_v22 }
 0x3e5   :  { %v5481_v45 = vpop.permute.xlu1 %1803  ;;  %v1875_v39 = vand.u32 2147483647, %v1867_v8 }
 0x3e6   :  { %v2111_v14 = vmul.f32 %v5365_v17, %v2099_v6 }
 0x3e7   :  { %3682 = vset.pattern.permute.xlu1 %v6619_v46  ;;  %v2191_v46 = vsel %vm659_vm3, %v5405_v37, %v5411_v53  ;;  %v1887_v53 = vmul.f32 %v5275_v3, %v1875_v39 }
 0x3e8   :  { %1515 = vperm.xlu1 %3682, %v4269_v4   ;;  %v2203_v16 = vadd.f32 %v5372_v13, %v2191_v46 }
 0x3ea   :  { %v5485_v10 = vpop.permute.xlu1 %1835  ;;  %v2211_v37 = vand.u32 2147483647, %v2203_v16 }
 0x3ec   :  { %3683 = vset.pattern.permute.xlu1 %v6497_v50  ;;  %v2223_v46 = vmul.f32 %v5382_v47, %v2211_v37 }
 0x3ed   :  { %1811 = vperm.xlu1 %3683, %v6546_v25  }
 0x3ef   :  { %v5489_v48 = vpop.permute.xlu1 %1947 }
 0x3f1   :  { %3684 = vset.pattern.permute.xlu1 %v6624_v42 }
 0x3f2   :  { %1923 = vperm.xlu1 %3684, %v6546_v25  }
 0x3f4   :  { %v2244_v0 = vpop.permute.xlu1 %2243 }
 0x3f5   :  { %v2303_v56 = vsel %vm659_vm3, %v2244_v0, %v2276_v57  ;;  %v1895_v57 = vadd.f32 %v1887_v53, %v5246_v29 }
 0x3f6   :  { %3685 = vset.pattern.permute.xlu1 %v6525_v5  ;;  %v2315_v35 = vadd.f32 %v5445_v2, %v2303_v56 }
 0x3f7   :  { %1955 = vperm.xlu1 %3685, %v6546_v25   ;;  %v2119_v39 = vadd.f32 %v2111_v14, %v1895_v57  ;;  %v6634_v57 = vld [vmem:[#allocation41_spill] sm:$0xff] }
 0x3f8   :  { %v2323_v24 = vand.u32 2147483647, %v2315_v35 }
 0x3f9   :  { %v2356_v58 = vpop.permute.xlu1 %2355 }
 0x3fa   :  { %v2335_v56 = vmul.f32 %v5450_v49, %v2323_v24 }
 0x3fb   :  { %3686 = vset.pattern.permute.xlu1 %v6625_v38 }
 0x3fc   :  { %2283 = vperm.xlu1 %3686, %v4131_v40   ;;  %v2343_v6 = vadd.f32 %v2335_v56, %v2119_v39  ;;  %v6636_v39 = vld [vmem:[#allocation39_spill] sm:$0xff] }
 0x3fe   :  { %v2388_v9 = vpop.permute.xlu1 %2387 }
 0x3ff   :  { %v2415_v0 = vsel %vm659_vm3, %v2356_v58, %v2388_v9  ;;  %v2231_v58 = vadd.f32 %v2223_v46, %v5333_v15 }
 0x400   :  { %v2427_v8 = vadd.f32 %v5460_v63, %v2415_v0  ;;  %3687 = vset.pattern.permute.xlu1 %v6601_v19 }
 0x401   :  { %2363 = vperm.xlu1 %3687, %v4131_v40  }
 0x402   :  { %v2435_v22 = vand.u32 2147483647, %v2427_v8  ;;  %v6633_v8 = vld [vmem:[#allocation36_spill] sm:$0xff] }
 0x403   :  { %v5520_v16 = vpop.permute.xlu1 %1615  ;;  %v736_v56 = vsel %vm659_vm3, %v6634_v57, %v6633_v8 }
 0x404   :  { %6627 = vst [vmem:[#allocation115_spill] sm:$0xff] %v5520_v16  ;;  %v2447_v35 = vmul.f32 %v5465_v31, %v2435_v22  ;;  %v6635_v22 = vld [vmem:[#allocation40_spill] sm:$0xff] }
 0x405   :  { %3688 = vset.pattern.permute.xlu1 %v6531_v55 }
 0x406   :  { %v2455_v37 = vadd.f32 %v2447_v35, %v2231_v58  ;;  %1591 = vperm.xlu1 %3688, %v6509_v62   ;;  %v960_v58 = vsel %vm659_vm3, %v6636_v39, %v6635_v22  ;;  %v748_v35 = vadd.f32 %v4786_v7, %v736_v56  ;;  %v5595_v22 = vpop.permute.xlu0 %2291  ;;  %v6643_v56 = vld [vmem:[#allocation48_spill] sm:$0xff]  ;;  %v6644_v39 = vld [vmem:[#allocation46_spill] sm:$0xff] }
 0x407   :  { %6642 = vst [vmem:[#allocation41_spill] sm:$0xff] %v5595_v22 }
 0x408   :  { %v5526_v9 = vpop.permute.xlu1 %1695  ;;  %v5528_v40 = vadd.f32 %v2455_v37, %v2343_v6  ;;  %v6638_v37 = vld [vmem:[#allocation38_spill] sm:$0xff]  ;;  %v756_v7 = vand.u32 2147483647, %v748_v35 }
 0x409   :  { %6628 = vst [vmem:[#allocation116_spill] sm:$0xff] %v5526_v9  ;;  %v6639_v9 = vld [vmem:[#allocation37_spill] sm:$0xff]  ;;  %v6649_v35 = vld [vmem:[#allocation102_spill] sm:$0xff] }
 0x40a   :  { %6629 = vst [vmem:[#allocation117_spill] sm:$0xff] %v5528_v40  ;;  %3689 = vset.pattern.permute.xlu1 %v6559_v27  ;;  %v848_v16 = vsel %vm659_vm3, %v6639_v9, %v6638_v37  ;;  %v6640_v40 = vld [vmem:[#allocation44_spill] sm:$0xff]  ;;  %v1408_v9 = vsel %vm659_vm3, %v5223_v32, %v5243_v11  ;;  %v6650_v32 = vld [vmem:[#allocation35_spill] sm:$0xff] }
 0x40b   :  { %1623 = vperm.xlu1 %3689, %v6509_v62   ;;  %v860_v8 = vadd.f32 %v4790_v43, %v848_v16  ;;  %v1632_v11 = vsel %vm659_vm3, %v5328_v54, %v6650_v32  ;;  %v6658_v32 = vld [vmem:[#allocation113_spill] sm:$0xff] }
 0x40d   :  { %v5532_v29 = vpop.permute.xlu1 %2023  ;;  %v868_v22 = vand.u32 2147483647, %v860_v8  ;;  %v6653_v8 = vld [vmem:[#allocation98_spill] sm:$0xff] }
 0x40f   :  { %3691 = vset.pattern.permute.xlu1 %v6543_v1 }
 0x410   :  { %1735 = vperm.xlu1 %3691, %v6509_v62  }
 0x412   :  { %v5536_v15 = vpop.permute.xlu1 %2055 }
 0x414   :  { %3692 = vset.pattern.permute.xlu1 %v6562_v21 }
 0x415   :  { %2031 = vperm.xlu1 %3692, %v6565_v52  }
 0x417   :  { %v5540_v55 = vpop.permute.xlu1 %2167 }
 0x419   :  { %3694 = vset.pattern.permute.xlu1 %v6554_v33 }
 0x41a   :  { %2143 = vperm.xlu1 %3694, %v6565_v52  }
 0x41c   :  { %v5544_v53 = vpop.permute.xlu1 %1587 }
 0x41e   :  { %3695 = vset.pattern.permute.xlu1 %v6566_v41 }
 0x41f   :  { %2175 = vperm.xlu1 %3695, %v6565_v52  }
 0x421   :  { %v5548_v1 = vpop.permute.xlu1 %1699 }
 0x423   :  { %3697 = vset.pattern.permute.xlu1 %v6559_v27 }
 0x424   :  { %1627 = vperm.xlu1 %3697, %v4269_v4  }
 0x426   :  { %v5552_v24 = vpop.permute.xlu1 %1731 }
 0x428   :  { %3698 = vset.pattern.permute.xlu1 %v6539_v60 }
 0x429   :  { %1707 = vperm.xlu1 %3698, %v4269_v4  }
 0x42b   :  { %v5556_v0 = vpop.permute.xlu1 %2059 }
 0x42d   :  { %3700 = vset.pattern.permute.xlu1 %v6562_v21 }
 0x42e   :  { %2035 = vperm.xlu1 %3700, %v6546_v25  }
 0x430   :  { %v5560_v14 = vpop.permute.xlu1 %2139 }
 0x432   :  { %3701 = vset.pattern.permute.xlu1 %v6549_v59 }
 0x433   :  { %2067 = vperm.xlu1 %3701, %v6546_v25  }
 0x435   :  { %v5564_v27 = vpop.permute.xlu1 %1367 }
 0x436   :  { %6630 = vst [vmem:[#allocation118_spill] sm:$0xff] %v5564_v27 }
 0x437   :  { %3702 = vset.pattern.permute.xlu1 %v6566_v41  ;;  %v972_v41 = vadd.f32 %v4794_v28, %v960_v58  ;;  %v6645_v28 = vld [vmem:[#allocation52_spill] sm:$0xff]  ;;  %v6646_v58 = vld [vmem:[#allocation50_spill] sm:$0xff] }
 0x438   :  { %2179 = vperm.xlu1 %3702, %v6546_v25   ;;  %v1296_v43 = vsel %vm659_vm3, %v6646_v58, %v6645_v28  ;;  %v6654_v58 = vld [vmem:[#allocation79_spill] sm:$0xff] }
 0x439   :  { %v1644_v54 = vadd.f32 %v6654_v58, %v1632_v11 }
 0x43a   :  { %v5568_v60 = vpop.permute.xlu1 %1399 }
 0x43b   :  { %6631 = vst [vmem:[#allocation119_spill] sm:$0xff] %v5568_v60  ;;  %v6669_v60 = vld [vmem:[#allocation80_spill] sm:$0xff] }
 0x43c   :  { %3703 = vset.pattern.permute.xlu1 %v6497_v50 }
 0x43d   :  { %1815 = vperm.xlu1 %3703, %v6509_v62  }
 0x43f   :  { %v5572_v46 = vpop.permute.xlu1 %1511 }
 0x440   :  { %6632 = vst [vmem:[#allocation120_spill] sm:$0xff] %v5572_v46 }
 0x441   :  { %3705 = vset.pattern.permute.xlu1 %v6624_v42  ;;  %v6641_v42 = vld [vmem:[#allocation42_spill] sm:$0xff] }
 0x442   :  { %1927 = vperm.xlu1 %3705, %v6509_v62   ;;  %v1072_v36 = vsel %vm659_vm3, %v6641_v42, %v6640_v40  ;;  %v1184_v40 = vsel %vm659_vm3, %v6644_v39, %v6643_v56  ;;  %v1420_v56 = vadd.f32 %v5179_v30, %v1408_v9  ;;  %v6651_v39 = vld [vmem:[#allocation103_spill] sm:$0xff] }
 0x443   :  { %v1084_v57 = vadd.f32 %v4798_v20, %v1072_v36  ;;  %v980_v20 = vand.u32 2147483647, %v972_v41  ;;  %v6647_v36 = vld [vmem:[#allocation60_spill] sm:$0xff]  ;;  %v1196_v42 = vadd.f32 %v6649_v35, %v1184_v40  ;;  %v1308_v46 = vadd.f32 %v6651_v39, %v1296_v43  ;;  %v6656_v9 = vld [vmem:[#allocation111_spill] sm:$0xff]  ;;  %v6657_v43 = vld [vmem:[#allocation109_spill] sm:$0xff] }
 0x444   :  { %v5583_v6 = vpop.permute.xlu1 %1807  ;;  %v1520_v16 = vsel %vm659_vm3, %v6647_v36, %v5262_v34  ;;  %v1744_v41 = vsel %vm659_vm3, %v5336_v12, %v5342_v51  ;;  %v6652_v34 = vld [vmem:[#allocation97_spill] sm:$0xff]  ;;  %v5627_v36 = vpop.permute.xlu0 %2295  ;;  %v1856_v35 = vsel %vm659_vm3, %v6657_v43, %v6656_v9  ;;  %v1428_v11 = vand.u32 2147483647, %v1420_v56  ;;  %v6664_v9 = vld [vmem:[#allocation108_spill] sm:$0xff] }
 0x445   :  { %6637 = vst [vmem:[#allocation36_spill] sm:$0xff] %v5583_v6  ;;  %v1092_v6 = vand.u32 2147483647, %v1084_v57  ;;  %v768_v28 = vmul.f32 %v6652_v34, %v756_v7  ;;  %v1532_v40 = vadd.f32 %v5185_v61, %v1520_v16  ;;  %v992_v57 = vmul.f32 %v6653_v8, %v980_v20  ;;  %6655 = vst [vmem:[#allocation39_spill] sm:$0xff] %v5627_v36  ;;  %v6659_v12 = vld [vmem:[#allocation85_spill] sm:$0xff]  ;;  %v6660_v7 = vld [vmem:[#allocation95_spill] sm:$0xff] }
 0x446   :  { %3706 = vset.pattern.permute.xlu1 %v6525_v5  ;;  %v1968_v51 = vsel %vm659_vm3, %v6659_v12, %v6658_v32  ;;  %v1204_v39 = vand.u32 2147483647, %v1196_v42  ;;  %v880_v34 = vmul.f32 %v6660_v7, %v868_v22  ;;  %v6661_v16 = vld [vmem:[#allocation96_spill] sm:$0xff]  ;;  %v1316_v8 = vand.u32 2147483647, %v1308_v46  ;;  %v6665_v22 = vld [vmem:[#allocation22_spill] sm:$0xff] }
 0x447   :  { %1959 = vperm.xlu1 %3706, %v6509_v62   ;;  %v2080_v36 = vsel %vm659_vm3, %v5532_v29, %v5536_v15  ;;  %v2192_v43 = vsel %vm659_vm3, %v6664_v9, %v5540_v55  ;;  %v1540_v32 = vand.u32 2147483647, %v1532_v40  ;;  %v1868_v42 = vadd.f32 %v5268_v26, %v1856_v35  ;;  %v6666_v15 = vld [vmem:[#allocation99_spill] sm:$0xff]  ;;  %v6667_v55 = vld [vmem:[#allocation77_spill] sm:$0xff] }
 0x448   :  { %v1980_v12 = vadd.f32 %v6665_v22, %v1968_v51  ;;  %v2092_v7 = vadd.f32 %v5360_v18, %v2080_v36  ;;  %v2204_v29 = vadd.f32 %v5372_v13, %v2192_v43  ;;  %v1440_v40 = vmul.f32 %v6667_v55, %v1428_v11  ;;  %v6668_v9 = vld [vmem:[#allocation101_spill] sm:$0xff] }
 0x449   :  { %v5610_v37 = vpop.permute.xlu1 %1919  ;;  %v1328_v35 = vmul.f32 %v6668_v9, %v1316_v8  ;;  %v1552_v21 = vmul.f32 %v6669_v60, %v1540_v32  ;;  %v6673_v9 = vld [vmem:[#allocation71_spill] sm:$0xff] }
 0x44a   :  { %6648 = vst [vmem:[#allocation40_spill] sm:$0xff] %v5610_v37  ;;  %v1104_v37 = vmul.f32 %v6661_v16, %v1092_v6  ;;  %v1000_v6 = vadd.f32 %v992_v57, %v768_v28  ;;  %v1216_v16 = vmul.f32 %v6666_v15, %v1204_v39  ;;  %v1876_v28 = vand.u32 2147483647, %v1868_v42 }
 0x44b   :  { %3707 = vset.pattern.permute.xlu1 %v6625_v38  ;;  %v6662_v38 = vld [vmem:[#allocation65_spill] sm:$0xff]  ;;  %v1988_v57 = vand.u32 2147483647, %v1980_v12  ;;  %v2100_v43 = vand.u32 2147483647, %v2092_v7  ;;  %v6672_v12 = vld [vmem:[#allocation100_spill] sm:$0xff] }
 0x44c   :  { %2287 = vperm.xlu1 %3707, %v6565_v52   ;;  %v1756_v27 = vadd.f32 %v6662_v38, %v1744_v41  ;;  %v1652_v41 = vand.u32 2147483647, %v1644_v54  ;;  %v1112_v46 = vadd.f32 %v1104_v37, %v880_v34  ;;  %v1224_v37 = vadd.f32 %v1216_v16, %v1000_v6  ;;  %v6671_v34 = vld [vmem:[#allocation81_spill] sm:$0xff] }
 0x44d   :  { %v2212_v8 = vand.u32 2147483647, %v2204_v29  ;;  %v1888_v42 = vmul.f32 %v5275_v3, %v1876_v28  ;;  %v6674_v29 = vmov 26  }
 0x44e   :  { %v5638_v20 = vpop.permute.xlu1 %1951  ;;  %v1764_v56 = vand.u32 2147483647, %v1756_v27  ;;  %v6670_v27 = vld [vmem:[#allocation67_spill] sm:$0xff]  ;;  %v1336_v39 = vadd.f32 %v1328_v35, %v1112_v46  ;;  %v1448_v15 = vadd.f32 %v1440_v40, %v1224_v37  ;;  %v2112_v46 = vmul.f32 %v5365_v17, %v2100_v43 }
 0x44f   :  { %6663 = vst [vmem:[#allocation38_spill] sm:$0xff] %v5638_v20  ;;  %v2248_v20 = vpop.permute.xlu0 %2247  ;;  %v1664_v54 = vmul.f32 %v6670_v27, %v1652_v41 }
 0x450   :  { %3708 = vset.pattern.permute.xlu1 %v6601_v19  ;;  %v1776_v11 = vmul.f32 %v6671_v34, %v1764_v56  ;;  %v1560_v32 = vadd.f32 %v1552_v21, %v1336_v39  ;;  %v2224_v56 = vmul.f32 %v5382_v47, %v2212_v8 }
 0x451   :  { %2367 = vperm.xlu1 %3708, %v6565_v52   ;;  %v1672_v41 = vadd.f32 %v1664_v54, %v1448_v15 }
 0x453   :  { %v2280_v51 = vpop.permute.xlu1 %2279  ;;  %v1896_v21 = vadd.f32 %v1888_v42, %v1672_v41 }
 0x454   :  { %v2304_v52 = vsel %vm659_vm3, %v2248_v20, %v2280_v51  ;;  %v2000_v20 = vmul.f32 %v6672_v12, %v1988_v57 }
 0x455   :  { %v2316_v36 = vadd.f32 %v5445_v2, %v2304_v52  ;;  %3710 = vset.pattern.permute.xlu1 %v6497_v50  ;;  %v1784_v50 = vadd.f32 %v1776_v11, %v1560_v32  ;;  %v2120_v52 = vadd.f32 %v2112_v46, %v1896_v21  ;;  %v6675_v11 = vld [vmem:[#allocation88_spill] sm:$0xff]  ;;  %v6676_v32 = vld [vmem:[#allocation43_spill] sm:$0xff]  ;;  %v6679_v46 = vld [vmem:[#allocation73_spill] sm:$0xff] }
 0x456   :  { %1819 = vperm.xlu1 %3710, %v4269_v4   ;;  %v1411_v43 = vsel %vm659_vm3, %v6675_v11, %v5470_v44  ;;  %v1635_v42 = vsel %vm659_vm3, %v5544_v53, %v6676_v32  ;;  %v6678_v53 = vld [vmem:[#allocation106_spill] sm:$0xff]  ;;  %v6681_v21 = vld [vmem:[#allocation69_spill] sm:$0xff] }
 0x457   :  { %v2324_v6 = vand.u32 2147483647, %v2316_v36  ;;  %v2008_v40 = vadd.f32 %v2000_v20, %v1784_v50  ;;  %v1423_v20 = vadd.f32 %v5179_v30, %v1411_v43 }
 0x458   :  { %v2360_v16 = vpop.permute.xlu1 %2359 }
 0x459   :  { %v2416_v51 = vsel %vm659_vm3, %v2360_v16, %v6673_v9  ;;  %v2336_v35 = vmul.f32 %v5450_v49, %v2324_v6  ;;  %v2232_v37 = vadd.f32 %v2224_v56, %v2008_v40  ;;  %v6677_v6 = vmov 14   ;;  %v6680_v56 = vld [vmem:[#allocation86_spill] sm:$0xff] }
 0x45a   :  { %v2428_v7 = vadd.f32 %v5460_v63, %v2416_v51  ;;  %3711 = vset.pattern.permute.xlu1 %v6674_v29  ;;  %v1431_v16 = vand.u32 2147483647, %v1423_v20  ;;  %v1523_v9 = vsel %vm659_vm3, %v5475_v23, %v6678_v53  ;;  %v1747_v29 = vsel %vm659_vm3, %v5548_v1, %v5552_v24  ;;  %v6687_v20 = vld [vmem:[#allocation28_spill] sm:$0xff]  ;;  %v6689_v53 = vld [vmem:[#allocation51_spill] sm:$0xff] }
 0x45b   :  { %1851 = vperm.xlu1 %3711, %v4269_v4   ;;  %v2344_v36 = vadd.f32 %v2336_v35, %v2120_v52  ;;  %v6682_v35 = vld [vmem:[#allocation104_spill] sm:$0xff]  ;;  %v1535_v23 = vadd.f32 %v5185_v61, %v1523_v9  ;;  %v1759_v1 = vadd.f32 %v6662_v38, %v1747_v29 }
 0x45c   :  { %v2436_v28 = vand.u32 2147483647, %v2428_v7  ;;  %v1443_v51 = vmul.f32 %v6667_v55, %v1431_v16  ;;  %v1409_v7 = vsel %vm659_vm3, %v6680_v56, %v6679_v46  ;;  %v1857_v46 = vsel %vm659_vm3, %v5481_v45, %v5485_v10  ;;  %v6691_v10 = vld [vmem:[#allocation25_spill] sm:$0xff] }
 0x45d   :  { %v5672_v57 = vpop.permute.xlu1 %1371  ;;  %v1421_v43 = vadd.f32 %v5179_v30, %v1409_v7  ;;  %v1767_v56 = vand.u32 2147483647, %v1759_v1  ;;  %v1869_v45 = vadd.f32 %v5268_v26, %v1857_v46 }
 0x45e   :  { %v2448_v54 = vmul.f32 %v5465_v31, %v2436_v28  ;;  %v6683_v28 = vld [vmem:[#allocation14_spill] sm:$0xff] }
 0x45f   :  { %3713 = vset.pattern.permute.xlu1 %v6525_v5  ;;  %v1647_v5 = vadd.f32 %v6654_v58, %v1635_v42  ;;  %v1521_v52 = vsel %vm659_vm3, %v6683_v28, %v6682_v35  ;;  %v6686_v42 = vld [vmem:[#allocation31_spill] sm:$0xff]  ;;  %v1429_v28 = vand.u32 2147483647, %v1421_v43 }
 0x460   :  { %v2456_v39 = vadd.f32 %v2448_v54, %v2232_v37  ;;  %1963 = vperm.xlu1 %3713, %v4269_v4   ;;  %v1533_v32 = vadd.f32 %v5185_v61, %v1521_v52 }
 0x461   :  { %v1655_v41 = vand.u32 2147483647, %v1647_v5  ;;  %v1633_v5 = vsel %vm659_vm3, %v6687_v20, %v6686_v42  ;;  %v6693_v20 = vld [vmem:[#allocation53_spill] sm:$0xff] }
 0x462   :  { %v5680_v8 = vpop.permute.xlu1 %1403  ;;  %v5682_v15 = vadd.f32 %v2456_v39, %v2344_v36  ;;  %v6684_v36 = vmov 31   ;;  %v6685_v39 = vld [vmem:[#allocation66_spill] sm:$0xff]  ;;  %v1645_v29 = vadd.f32 %v6654_v58, %v1633_v5  ;;  %v1541_v52 = vand.u32 2147483647, %v1533_v32 }
 0x463   :  { %v1667_v37 = vmul.f32 %v6670_v27, %v1655_v41  ;;  %v1451_v11 = vadd.f32 %v1443_v51, %v6685_v39  ;;  %v6688_v41 = vld [vmem:[#allocation92_spill] sm:$0xff]  ;;  %v6692_v39 = vld [vmem:[#allocation90_spill] sm:$0xff] }
 0x464   :  { %3714 = vset.pattern.permute.xlu1 %v6677_v6  ;;  %2494 = vrot.lane.b32.xlu0 %v5682_v15, %s3825_s28  ;;  %v1745_v9 = vsel %vm659_vm3, %v6689_v53, %v6688_v41  ;;  %v1653_v32 = vand.u32 2147483647, %v1645_v29  ;;  %v1553_v53 = vmul.f32 %v6669_v60, %v1541_v52 }
 0x465   :  { %2259 = vperm.xlu1 %3714, %v6546_v25  }
 0x466   :  { %v1665_v29 = vmul.f32 %v6670_v27, %v1653_v32  ;;  %v6698_v32 = vld [vmem:[#allocation118_spill] sm:$0xff] }
 0x467   :  { %v5693_v44 = vpop.permute.xlu1 %1515 }
 0x469   :  { %3715 = vset.pattern.permute.xlu1 %v6601_v19 }
 0x46a   :  { %2371 = vperm.xlu1 %3715, %v6546_v25  }
 0x46c   :  { %v1812_v50 = vpop.permute.xlu1 %1811 }
 0x46d   :  { %v1859_v40 = vsel %vm659_vm3, %v1812_v50, %v6681_v21  ;;  %v1543_v50 = vand.u32 2147483647, %v1535_v23  ;;  %v1757_v21 = vadd.f32 %v6662_v38, %v1745_v9  ;;  %v2252_v9 = vpop.permute.xlu0 %2251 }
 0x46e   :  { %v1871_v54 = vadd.f32 %v5268_v26, %v1859_v40  ;;  %3716 = vset.pattern.permute.xlu1 %v6684_v36  ;;  %v6690_v40 = vld [vmem:[#allocation75_spill] sm:$0xff] }
 0x46f   :  { %2403 = vperm.xlu1 %3716, %v6546_v25   ;;  %v1675_v25 = vadd.f32 %v1667_v37, %v1451_v11  ;;  %v1969_v35 = vsel %vm659_vm3, %v6690_v40, %v5489_v48  ;;  %v1555_v23 = vmul.f32 %v6669_v60, %v1543_v50  ;;  %v2193_v11 = vsel %vm659_vm3, %v5560_v14, %v6692_v39 }
 0x470   :  { %v1879_v24 = vand.u32 2147483647, %v1871_v54  ;;  %v2081_v54 = vsel %vm659_vm3, %v6691_v10, %v5556_v0  ;;  %v1779_v48 = vmul.f32 %v6671_v34, %v1767_v56  ;;  %v1765_v42 = vand.u32 2147483647, %v1757_v21 }
 0x471   :  { %v1924_v16 = vpop.permute.xlu1 %1923  ;;  %v1563_v0 = vadd.f32 %v1555_v23, %v6693_v20  ;;  %v2093_v5 = vadd.f32 %v5360_v18, %v2081_v54  ;;  %v2205_v14 = vadd.f32 %v5372_v13, %v2193_v11  ;;  %v1877_v50 = vand.u32 2147483647, %v1869_v45  ;;  %v6696_v54 = vld [vmem:[#allocation47_spill] sm:$0xff]  ;;  %v6699_v20 = vld [vmem:[#allocation13_spill] sm:$0xff] }
 0x472   :  { %v1891_v51 = vmul.f32 %v5275_v3, %v1879_v24  ;;  %v1981_v24 = vadd.f32 %v6665_v22, %v1969_v35  ;;  %v6694_v40 = vmov 12   ;;  %v1777_v35 = vmul.f32 %v6671_v34, %v1765_v42 }
 0x473   :  { %3718 = vset.pattern.permute.xlu1 %v6549_v59  ;;  %v2213_v23 = vand.u32 2147483647, %v2205_v14  ;;  %v1889_v10 = vmul.f32 %v5275_v3, %v1877_v50  ;;  %v1561_v39 = vadd.f32 %v1553_v53, %v6696_v54 }
 0x474   :  { %v5732_v7 = vadd.f32 %v1891_v51, %v1675_v25  ;;  %2071 = vperm.xlu1 %3718, %v6509_v62   ;;  %v1989_v51 = vand.u32 2147483647, %v1981_v24 }
 0x476   :  { %v1956_v37 = vpop.permute.xlu1 %1955  ;;  %v2001_v11 = vmul.f32 %v6672_v12, %v1989_v51 }
 0x477   :  { %v1971_v1 = vsel %vm659_vm3, %v1924_v16, %v1956_v37  ;;  %v1441_v16 = vmul.f32 %v6667_v55, %v1429_v28  ;;  %v2101_v28 = vand.u32 2147483647, %v2093_v5  ;;  %v6695_v37 = vld [vmem:[#allocation45_spill] sm:$0xff]  ;;  %v1785_v5 = vadd.f32 %v1777_v35, %v1561_v39 }
 0x478   :  { %v1983_v43 = vadd.f32 %v6665_v22, %v1971_v1  ;;  %3719 = vset.pattern.permute.xlu1 %v6554_v33  ;;  %v1787_v33 = vadd.f32 %v1779_v48, %v1563_v0 }
 0x479   :  { %2151 = vperm.xlu1 %3719, %v6509_v62   ;;  %v1449_v45 = vadd.f32 %v1441_v16, %v6695_v37  ;;  %v2113_v14 = vmul.f32 %v5365_v17, %v2101_v28  ;;  %v6702_v28 = vmov 29  }
 0x47a   :  { %v1991_v41 = vand.u32 2147483647, %v1983_v43  ;;  %v6697_v43 = vld [vmem:[#allocation119_spill] sm:$0xff] }
 0x47b   :  { %v2284_v25 = vpop.permute.xlu1 %2283  ;;  %v1673_v48 = vadd.f32 %v1665_v29, %v1449_v45  ;;  %v1412_v42 = vsel %vm659_vm3, %v6698_v32, %v6697_v43  ;;  %v6700_v29 = vld [vmem:[#allocation120_spill] sm:$0xff]  ;;  %v6703_v32 = vld [vmem:[#allocation107_spill] sm:$0xff] }
 0x47c   :  { %v2003_v46 = vmul.f32 %v6672_v12, %v1991_v41  ;;  %v2305_v56 = vsel %vm659_vm3, %v2252_v9, %v2284_v25  ;;  %v2225_v41 = vmul.f32 %v5382_v47, %v2213_v23  ;;  %v2009_v9 = vadd.f32 %v2001_v11, %v1785_v5 }
 0x47d   :  { %v2317_v21 = vadd.f32 %v5445_v2, %v2305_v56  ;;  %3721 = vset.pattern.permute.xlu1 %v6694_v40  ;;  %v1897_v53 = vadd.f32 %v1889_v10, %v1673_v48  ;;  %v1424_v50 = vadd.f32 %v5179_v30, %v1412_v42 }
 0x47e   :  { %v5765_v52 = vadd.f32 %v2003_v46, %v1787_v33  ;;  %2043 = vperm.xlu1 %3721, %v4269_v4   ;;  %v2233_v56 = vadd.f32 %v2225_v41, %v2009_v9  ;;  %v6705_v9 = vld [vmem:[#allocation33_spill] sm:$0xff] }
 0x47f   :  { %v2325_v1 = vand.u32 2147483647, %v2317_v21  ;;  %v2121_v46 = vadd.f32 %v2113_v14, %v1897_v53  ;;  %v6701_v21 = vld [vmem:[#allocation62_spill] sm:$0xff] }
 0x480   :  { %v2364_v24 = vpop.permute.xlu1 %2363  ;;  %v1524_v40 = vsel %vm659_vm3, %v6701_v21, %v6700_v29 }
 0x481   :  { %v2417_v0 = vsel %vm659_vm3, %v2364_v24, %v6699_v20  ;;  %v2337_v25 = vmul.f32 %v5450_v49, %v2325_v1  ;;  %v1536_v45 = vadd.f32 %v5185_v61, %v1524_v40  ;;  %v6707_v40 = vld [vmem:[#allocation49_spill] sm:$0xff] }
 0x482   :  { %v2429_v16 = vadd.f32 %v5460_v63, %v2417_v0  ;;  %3722 = vset.pattern.permute.xlu1 %v6549_v59  ;;  %v1432_v59 = vand.u32 2147483647, %v1424_v50  ;;  %v6704_v0 = vld [vmem:[#allocation68_spill] sm:$0xff] }
 0x483   :  { %2075 = vperm.xlu1 %3722, %v4269_v4   ;;  %v2345_v23 = vadd.f32 %v2337_v25, %v2121_v46  ;;  %v1544_v24 = vand.u32 2147483647, %v1536_v45  ;;  %v1413_v46 = vsel %vm659_vm3, %v5672_v57, %v5680_v8  ;;  %v6708_v57 = vld [vmem:[#allocation74_spill] sm:$0xff] }
 0x484   :  { %v2437_v51 = vand.u32 2147483647, %v2429_v16  ;;  %v1444_v11 = vmul.f32 %v6667_v55, %v1432_v59  ;;  %v1425_v29 = vadd.f32 %v5179_v30, %v1413_v46 }
 0x485   :  { %v1592_v33 = vpop.permute.xlu1 %1591  ;;  %v1556_v14 = vmul.f32 %v6669_v60, %v1544_v24  ;;  %v6712_v24 = vld [vmem:[#allocation117_spill] sm:$0xff] }
 0x486   :  { %v2449_v35 = vmul.f32 %v5465_v31, %v2437_v51  ;;  %v1452_v42 = vadd.f32 %v1444_v11, %v6703_v32  ;;  %v6711_v11 = vld [vmem:[#allocation76_spill] sm:$0xff] }
 0x487   :  { %3724 = vset.pattern.permute.xlu1 %v6702_v28  ;;  %v1564_v50 = vadd.f32 %v1556_v14, %v6705_v9 }
 0x488   :  { %v2457_v37 = vadd.f32 %v2449_v35, %v2233_v56  ;;  %2187 = vperm.xlu1 %3724, %v4269_v4   ;;  %v6706_v56 = vmov 30   ;;  %v1433_v35 = vand.u32 2147483647, %v1425_v29  ;;  %v6715_v29 = vld [vmem:[#allocation29_spill] sm:$0xff] }
 0x48a   :  { %v1624_v10 = vpop.permute.xlu1 %1623  ;;  %v5791_v54 = vadd.f32 %v2457_v37, %v2345_v23  ;;  %v1445_v59 = vmul.f32 %v6667_v55, %v1433_v35  ;;  %v6709_v37 = vld [vmem:[#allocation114_spill] sm:$0xff]  ;;  %v6717_v35 = vld [vmem:[#allocation105_spill] sm:$0xff] }
 0x48b   :  { %v1636_v39 = vsel %vm659_vm3, %v1592_v33, %v1624_v10 }
 0x48c   :  { %v1648_v1 = vadd.f32 %v6654_v58, %v1636_v39  ;;  %3725 = vset.pattern.permute.xlu1 %v6677_v6 }
 0x48d   :  { %2263 = vperm.xlu1 %3725, %v6509_v62  }
 0x48e   :  { %v1656_v48 = vand.u32 2147483647, %v1648_v1 }
 0x48f   :  { %v1736_v43 = vpop.permute.xlu1 %1735 }
 0x490   :  { %v1668_v20 = vmul.f32 %v6670_v27, %v1656_v48  ;;  %v1748_v5 = vsel %vm659_vm3, %v6704_v0, %v1736_v43  ;;  %v6713_v0 = vld [vmem:[#allocation70_spill] sm:$0xff] }
 0x491   :  { %v1760_v41 = vadd.f32 %v6662_v38, %v1748_v5  ;;  %3727 = vset.pattern.permute.xlu1 %v6601_v19 }
 0x492   :  { %v1676_v16 = vadd.f32 %v1668_v20, %v1452_v42  ;;  %2375 = vperm.xlu1 %3727, %v6509_v62  }
 0x493   :  { %v1768_v6 = vand.u32 2147483647, %v1760_v41 }
 0x494   :  { %v2032_v53 = vpop.permute.xlu1 %2031 }
 0x495   :  { %v1780_v25 = vmul.f32 %v6671_v34, %v1768_v6 }
 0x496   :  { %3728 = vset.pattern.permute.xlu1 %v6684_v36  ;;  %v1525_v36 = vsel %vm659_vm3, %v6707_v40, %v5693_v44  ;;  %v6716_v40 = vld [vmem:[#allocation87_spill] sm:$0xff] }
 0x497   :  { %v5809_v51 = vadd.f32 %v1780_v25, %v1564_v50  ;;  %2407 = vperm.xlu1 %3728, %v6509_v62   ;;  %v1537_v62 = vadd.f32 %v5185_v61, %v1525_v36  ;;  %v6714_v25 = vld [vmem:[#allocation82_spill] sm:$0xff]  ;;  %v1410_v36 = vsel %vm659_vm3, %v6716_v40, %v6715_v29 }
 0x499   :  { %v2144_v33 = vpop.permute.xlu1 %2143  ;;  %v1545_v45 = vand.u32 2147483647, %v1537_v62  ;;  %v6718_v62 = vld [vmem:[#allocation94_spill] sm:$0xff] }
 0x49b   :  { %3729 = vset.pattern.permute.xlu1 %v6706_v56  ;;  %v1557_v48 = vmul.f32 %v6669_v60, %v1545_v45  ;;  %v6720_v45 = vld [vmem:[#allocation58_spill] sm:$0xff] }
 0x49c   :  { %2299 = vperm.xlu1 %3729, %v4269_v4  }
 0x49d   :  { %v1565_v5 = vadd.f32 %v1557_v48, %v6713_v0  ;;  %v6725_v0 = vld [vmem:[#allocation38_spill] sm:$0xff] }
 0x49e   :  { %v2176_v21 = vpop.permute.xlu1 %2175 }
 0x4a0   :  { %3730 = vset.pattern.permute.xlu1 %v6601_v19  ;;  %v6710_v19 = vld [vmem:[#allocation55_spill] sm:$0xff] }
 0x4a1   :  { %2379 = vperm.xlu1 %3730, %v4269_v4   ;;  %v1453_v39 = vadd.f32 %v1445_v59, %v6710_v19  ;;  %v1422_v59 = vadd.f32 %v5179_v30, %v1410_v36 }
 0x4a3   :  { %v1628_v28 = vpop.permute.xlu1 %1627 }
 0x4a4   :  { %v1637_v8 = vsel %vm659_vm3, %v6708_v57, %v1628_v28  ;;  %v1522_v28 = vsel %vm659_vm3, %v6718_v62, %v6717_v35 }
 0x4a5   :  { %v1649_v23 = vadd.f32 %v6654_v58, %v1637_v8  ;;  %2490 = vrot.lane.b32.xlu1 %v6709_v37, %s3825_s28  ;;  %v1534_v19 = vadd.f32 %v5185_v61, %v1522_v28 }
 0x4a7   :  { %v1657_v44 = vand.u32 2147483647, %v1649_v23  ;;  %v6719_v23 = vld [vmem:[#allocation115_spill] sm:$0xff] }
 0x4a8   :  { %v1708_v10 = vpop.permute.xlu1 %1707 }
 0x4a9   :  { %v1669_v4 = vmul.f32 %v6670_v27, %v1657_v44  ;;  %v1749_v1 = vsel %vm659_vm3, %v1708_v10, %v6711_v11  ;;  %2492 = vrot.lane.b32.xlu1 %v6712_v24, %s3825_s28  ;;  %v1634_v44 = vsel %vm659_vm3, %v6720_v45, %v6719_v23  ;;  %v2256_v23 = vpop.permute.xlu0 %2255 }
 0x4aa   :  { %v1761_v43 = vadd.f32 %v6662_v38, %v1749_v1  ;;  %v1646_v48 = vadd.f32 %v6654_v58, %v1634_v44 }
 0x4ab   :  { %v5838_v32 = vadd.f32 %v1669_v4, %v1453_v39  ;;  %v6721_v39 = vld [vmem:[#allocation59_spill] sm:$0xff]  ;;  %v6722_v4 = vld [vmem:[#allocation116_spill] sm:$0xff] }
 0x4ac   :  { %v1769_v42 = vand.u32 2147483647, %v1761_v43  ;;  %v1746_v11 = vsel %vm659_vm3, %v6722_v4, %v6721_v39  ;;  %v6723_v43 = vld [vmem:[#allocation61_spill] sm:$0xff]  ;;  %v1654_v62 = vand.u32 2147483647, %v1646_v48 }
 0x4ad   :  { %v5840_v20 = vpop.permute.xlu1 %2035  ;;  %2496 = vrot.lane.b32.xlu1 %v5791_v54, %s3825_s28 }
 0x4ae   :  { %v1781_v14 = vmul.f32 %v6671_v34, %v1769_v42  ;;  %v6724_v42 = vld [vmem:[#allocation36_spill] sm:$0xff] }
 0x4af   :  { %v1858_v30 = vsel %vm659_vm3, %v6724_v42, %v6723_v43  ;;  %v6729_v42 = vld [vmem:[#allocation26_spill] sm:$0xff] }
 0x4b0   :  { %v5846_v41 = vadd.f32 %v1781_v14, %v1565_v5  ;;  %v6726_v5 = vld [vmem:[#allocation40_spill] sm:$0xff]  ;;  %v1870_v40 = vadd.f32 %v5268_v26, %v1858_v30 }
 0x4b1   :  { %v1970_v14 = vsel %vm659_vm3, %v6726_v5, %v6725_v0 }
 0x4b2   :  { %v5848_v6 = vpop.permute.xlu1 %2067  ;;  %v1982_v36 = vadd.f32 %v6665_v22, %v1970_v14 }
 0x4b4   :  { %v1990_v45 = vand.u32 2147483647, %v1982_v36 }
 0x4b6   :  { %v2002_v5 = vmul.f32 %v6672_v12, %v1990_v45 }
 0x4b7   :  { %v5850_v9 = vpop.permute.xlu1 %2179 }
 0x4bc   :  { %v1816_v50 = vpop.permute.xlu1 %1815 }
 0x4bd   :  { %v1860_v46 = vsel %vm659_vm3, %v1816_v50, %v6714_v25  ;;  %v1430_v50 = vand.u32 2147483647, %v1422_v59  ;;  %v1758_v25 = vadd.f32 %v6662_v38, %v1746_v11 }
 0x4be   :  { %v1872_v56 = vadd.f32 %v5268_v26, %v1860_v46  ;;  %v1542_v46 = vand.u32 2147483647, %v1534_v19  ;;  %v1666_v19 = vmul.f32 %v6670_v27, %v1654_v62 }
 0x4bf   :  { %v1766_v28 = vand.u32 2147483647, %v1758_v25  ;;  %v6730_v25 = vld [vmem:[#allocation83_spill] sm:$0xff] }
 0x4c0   :  { %v1880_v57 = vand.u32 2147483647, %v1872_v56  ;;  %v6727_v56 = vld [vmem:[#allocation57_spill] sm:$0xff] }
 0x4c1   :  { %v1928_v8 = vpop.permute.xlu1 %1927  ;;  %v2082_v29 = vsel %vm659_vm3, %v2032_v53, %v6727_v56  ;;  %v1442_v53 = vmul.f32 %v6667_v55, %v1430_v50  ;;  %v1778_v4 = vmul.f32 %v6671_v34, %v1766_v28  ;;  %v6728_v55 = vld [vmem:[#allocation64_spill] sm:$0xff] }
 0x4c2   :  { %v1892_v10 = vmul.f32 %v5275_v3, %v1880_v57  ;;  %v2094_v57 = vadd.f32 %v5360_v18, %v2082_v29 }
 0x4c4   :  { %v5870_v1 = vadd.f32 %v1892_v10, %v1676_v16  ;;  %v2194_v16 = vsel %vm659_vm3, %v2144_v33, %v2176_v21  ;;  %v1554_v33 = vmul.f32 %v6669_v60, %v1542_v46  ;;  %v2102_v11 = vand.u32 2147483647, %v2094_v57 }
 0x4c5   :  { %v2206_v38 = vadd.f32 %v5372_v13, %v2194_v16  ;;  %v1450_v60 = vadd.f32 %v1442_v53, %v6728_v55 }
 0x4c6   :  { %v1960_v61 = vpop.permute.xlu1 %1959  ;;  %v1562_v30 = vadd.f32 %v1554_v33, %v6729_v42  ;;  %v2114_v46 = vmul.f32 %v5365_v17, %v2102_v11 }
 0x4c7   :  { %v1972_v58 = vsel %vm659_vm3, %v1928_v8, %v1960_v61  ;;  %v1878_v8 = vand.u32 2147483647, %v1870_v40  ;;  %v2214_v48 = vand.u32 2147483647, %v2206_v38  ;;  %v1674_v27 = vadd.f32 %v1666_v19, %v1450_v60 }
 0x4c8   :  { %v1984_v35 = vadd.f32 %v6665_v22, %v1972_v58  ;;  %v1786_v34 = vadd.f32 %v1778_v4, %v1562_v30  ;;  %v2083_v19 = vsel %vm659_vm3, %v5840_v20, %v5848_v6 }
 0x4c9   :  { %v1890_v0 = vmul.f32 %v5275_v3, %v1878_v8 }
 0x4ca   :  { %v1992_v59 = vand.u32 2147483647, %v1984_v35  ;;  %v2010_v16 = vadd.f32 %v2002_v5, %v1786_v34 }
 0x4cb   :  { %v2288_v21 = vpop.permute.xlu1 %2287  ;;  %v1898_v29 = vadd.f32 %v1890_v0, %v1674_v27 }
 0x4cc   :  { %v2004_v44 = vmul.f32 %v6672_v12, %v1992_v59  ;;  %v2306_v10 = vsel %vm659_vm3, %v2256_v23, %v2288_v21 }
 0x4cd   :  { %v2318_v39 = vadd.f32 %v5445_v2, %v2306_v10  ;;  %v2122_v35 = vadd.f32 %v2114_v46, %v1898_v29 }
 0x4ce   :  { %v5897_v43 = vadd.f32 %v2004_v44, %v5809_v51  ;;  %v2226_v51 = vmul.f32 %v5382_v47, %v2214_v48  ;;  %v2095_v48 = vadd.f32 %v5360_v18, %v2083_v19 }
 0x4cf   :  { %v2326_v14 = vand.u32 2147483647, %v2318_v39  ;;  %v6731_v39 = vld [vmem:[#allocation110_spill] sm:$0xff] }
 0x4d0   :  { %v2368_v50 = vpop.permute.xlu1 %2367  ;;  %v2234_v62 = vadd.f32 %v2226_v51, %v2010_v16  ;;  %v2195_v4 = vsel %vm659_vm3, %v6731_v39, %v5850_v9  ;;  %v2103_v60 = vand.u32 2147483647, %v2095_v48  ;;  %v6737_v48 = vld [vmem:[#allocation112_spill] sm:$0xff] }
 0x4d1   :  { %v2418_v61 = vsel %vm659_vm3, %v2368_v50, %v6730_v25  ;;  %v2338_v58 = vmul.f32 %v5450_v49, %v2326_v14  ;;  %v2207_v55 = vadd.f32 %v5372_v13, %v2195_v4 }
 0x4d2   :  { %v2430_v56 = vadd.f32 %v5460_v63, %v2418_v61  ;;  %v2115_v6 = vmul.f32 %v5365_v17, %v2103_v60 }
 0x4d3   :  { %v2346_v57 = vadd.f32 %v2338_v58, %v2122_v35  ;;  %v2215_v42 = vand.u32 2147483647, %v2207_v55  ;;  %v6733_v35 = vld [vmem:[#allocation91_spill] sm:$0xff] }
 0x4d4   :  { %v2438_v40 = vand.u32 2147483647, %v2430_v56  ;;  %v2123_v25 = vadd.f32 %v2115_v6, %v5732_v7  ;;  %v6734_v7 = vld [vmem:[#allocation93_spill] sm:$0xff] }
 0x4d5   :  { %v1820_v36 = vpop.permute.xlu1 %1819  ;;  %v2227_v9 = vmul.f32 %v5382_v47, %v2215_v42 }
 0x4d6   :  { %v2450_v28 = vmul.f32 %v5465_v31, %v2438_v40 }
 0x4d7   :  { %v2235_v61 = vadd.f32 %v2227_v9, %v5765_v52 }
 0x4d8   :  { %v2458_v38 = vadd.f32 %v2450_v28, %v2234_v62  ;;  %v6735_v28 = vld [vmem:[#allocation39_spill] sm:$0xff] }
 0x4da   :  { %v1852_v59 = vpop.permute.xlu1 %1851  ;;  %v5910_v23 = vadd.f32 %v2458_v38, %v2346_v57 }
 0x4db   :  { %v1861_v53 = vsel %vm659_vm3, %v1820_v36, %v1852_v59 }
 0x4dc   :  { %v1873_v33 = vadd.f32 %v5268_v26, %v1861_v53  ;;  %2498 = vrot.lane.b32.xlu0 %v5910_v23, %s3825_s28  ;;  %v6732_v26 = vld [vmem:[#allocation41_spill] sm:$0xff] }
 0x4de   :  { %v1881_v21 = vand.u32 2147483647, %v1873_v33 }
 0x4df   :  { %v1964_v8 = vpop.permute.xlu1 %1963 }
 0x4e0   :  { %v1893_v45 = vmul.f32 %v5275_v3, %v1881_v21  ;;  %v6736_v21 = vld [vmem:[#allocation27_spill] sm:$0xff] }
 0x4e2   :  { %v5918_v44 = vadd.f32 %v1893_v45, %v5838_v32  ;;  %v1973_v45 = vsel %vm659_vm3, %v6736_v21, %v1964_v8  ;;  %v2268_v8 = vpop.permute.xlu0 %2267  ;;  %v6743_v21 = vld [vmem:[#allocation9_spill] sm:$0xff] }
 0x4e4   :  { %v2260_v10 = vpop.permute.xlu1 %2259 }
 0x4e5   :  { %v2307_v11 = vsel %vm659_vm3, %v2260_v10, %v6732_v26  ;;  %v1985_v26 = vadd.f32 %v6665_v22, %v1973_v45 }
 0x4e6   :  { %v2319_v32 = vadd.f32 %v5445_v2, %v2307_v11 }
 0x4e7   :  { %v1993_v6 = vand.u32 2147483647, %v1985_v26 }
 0x4e8   :  { %v2327_v30 = vand.u32 2147483647, %v2319_v32 }
 0x4e9   :  { %v2372_v3 = vpop.permute.xlu1 %2371 }
 0x4ea   :  { %v2339_v14 = vmul.f32 %v5450_v49, %v2327_v30 }
 0x4ec   :  { %v2347_v46 = vadd.f32 %v2339_v14, %v2123_v25 }
 0x4ee   :  { %v2404_v0 = vpop.permute.xlu1 %2403 }
 0x4ef   :  { %v2419_v20 = vsel %vm659_vm3, %v2372_v3, %v2404_v0 }
 0x4f0   :  { %v2431_v5 = vadd.f32 %v5460_v63, %v2419_v20 }
 0x4f2   :  { %v2439_v50 = vand.u32 2147483647, %v2431_v5 }
 0x4f3   :  { %v2072_v27 = vpop.permute.xlu1 %2071 }
 0x4f4   :  { %v2451_v34 = vmul.f32 %v5465_v31, %v2439_v50  ;;  %v2084_v62 = vsel %vm659_vm3, %v6733_v35, %v2072_v27 }
 0x4f5   :  { %v2096_v38 = vadd.f32 %v5360_v18, %v2084_v62 }
 0x4f6   :  { %v2459_v51 = vadd.f32 %v2451_v34, %v2235_v61 }
 0x4f7   :  { %v2104_v10 = vand.u32 2147483647, %v2096_v38  ;;  %v6739_v38 = vld [vmem:[#allocation5_spill] sm:$0xff] }
 0x4f8   :  { %v2152_v56 = vpop.permute.xlu1 %2151  ;;  %v5939_v29 = vadd.f32 %v2459_v51, %v2347_v46  ;;  %v2005_v51 = vmul.f32 %v6672_v12, %v1993_v6  ;;  %v6750_v6 = vld [vmem:[#allocation18_spill] sm:$0xff] }
 0x4f9   :  { %v2196_v52 = vsel %vm659_vm3, %v2152_v56, %v6734_v7  ;;  %v2116_v32 = vmul.f32 %v5365_v17, %v2104_v10  ;;  %v6744_v10 = vld [vmem:[#allocation34_spill] sm:$0xff] }
 0x4fa   :  { %2500 = vrot.lane.b32.xlu1 %v5939_v29, %s3825_s28  ;;  %v2208_v59 = vadd.f32 %v5372_v13, %v2196_v52 }
 0x4fb   :  { %v2124_v5 = vadd.f32 %v2116_v32, %v5870_v1 }
 0x4fc   :  { %v2216_v19 = vand.u32 2147483647, %v2208_v59  ;;  %v6741_v59 = vld [vmem:[#allocation30_spill] sm:$0xff] }
 0x4fd   :  { %v2044_v16 = vpop.permute.xlu1 %2043 }
 0x4fe   :  { %v2228_v60 = vmul.f32 %v5382_v47, %v2216_v19 }
 0x500   :  { %v2236_v14 = vadd.f32 %v2228_v60, %v5897_v43  ;;  %v6748_v60 = vld [vmem:[#allocation17_spill] sm:$0xff] }
 0x502   :  { %v2076_v58 = vpop.permute.xlu1 %2075 }
 0x503   :  { %v2085_v11 = vsel %vm659_vm3, %v2044_v16, %v2076_v58 }
 0x504   :  { %v2097_v30 = vadd.f32 %v5360_v18, %v2085_v11 }
 0x506   :  { %v2105_v61 = vand.u32 2147483647, %v2097_v30 }
 0x507   :  { %v2188_v40 = vpop.permute.xlu1 %2187 }
 0x508   :  { %v2197_v55 = vsel %vm659_vm3, %v6737_v48, %v2188_v40  ;;  %v2117_v43 = vmul.f32 %v5365_v17, %v2105_v61 }
 0x509   :  { %v2209_v0 = vadd.f32 %v5372_v13, %v2197_v55  ;;  %v2412_v13 = vpop.permute.xlu0 %2411  ;;  %v6746_v55 = vld [vmem:[#allocation10_spill] sm:$0xff] }
 0x50a   :  { %v2125_v62 = vadd.f32 %v2117_v43, %v5918_v44  ;;  %v6742_v44 = vmov 0.0  }
 0x50b   :  { %v2217_v34 = vand.u32 2147483647, %v2209_v0 }
 0x50c   :  { %v2264_v36 = vpop.permute.xlu1 %2263 }
 0x50d   :  { %v2308_v57 = vsel %vm659_vm3, %v2264_v36, %v6735_v28  ;;  %v2229_v40 = vmul.f32 %v5382_v47, %v2217_v34  ;;  %v2495_v45 = vpop.permute.xlu0 %2494 }
 0x50e   :  { %v2320_v33 = vadd.f32 %v5445_v2, %v2308_v57  ;;  %v2516_v11 = vadd.f32 %v2495_v45, %v5682_v15  ;;  %v6749_v15 = vld [vmem:[#allocation54_spill] sm:$0xff] }
 0x510   :  { %v2328_v39 = vand.u32 2147483647, %v2320_v33 }
 0x511   :  { %v2376_v53 = vpop.permute.xlu1 %2375 }
 0x512   :  { %v2340_v22 = vmul.f32 %v5450_v49, %v2328_v39  ;;  %v6745_v39 = vld [vmem:[#allocation15_spill] sm:$0xff] }
 0x514   :  { %v2348_v18 = vadd.f32 %v2340_v22, %v2124_v5 }
 0x516   :  { %v2408_v4 = vpop.permute.xlu1 %2407 }
 0x517   :  { %v2420_v3 = vsel %vm659_vm3, %v2376_v53, %v2408_v4 }
 0x518   :  { %v2432_v42 = vadd.f32 %v5460_v63, %v2420_v3 }
 0x51a   :  { %v2440_v20 = vand.u32 2147483647, %v2432_v42 }
 0x51b   :  { %v2300_v9 = vpop.permute.xlu1 %2299 }
 0x51c   :  { %v2452_v50 = vmul.f32 %v5465_v31, %v2440_v20  ;;  %v2309_v27 = vsel %vm659_vm3, %v2268_v8, %v2300_v9 }
 0x51d   :  { %v2321_v25 = vadd.f32 %v5445_v2, %v2309_v27  ;;  %v2013_v2 = vadd.f32 %v2005_v51, %v5846_v41  ;;  %v6740_v41 = vld [vmem:[#allocation8_spill] sm:$0xff] }
 0x51e   :  { %v2460_v46 = vadd.f32 %v2452_v50, %v2236_v14  ;;  %v6751_v14 = vld [vmem:[#allocation6_spill] sm:$0xff] }
 0x51f   :  { %v2329_v56 = vand.u32 2147483647, %v2321_v25  ;;  %v2237_v7 = vadd.f32 %v2229_v40, %v2013_v2  ;;  %v6755_v40 = vld [vmem:[#allocation19_spill] sm:$0xff] }
 0x520   :  { %v2380_v16 = vpop.permute.xlu1 %2379  ;;  %v5971_v58 = vadd.f32 %v2460_v46, %v2348_v18  ;;  %v6752_v18 = vld [vmem:[#allocation32_spill] sm:$0xff] }
 0x521   :  { %v2421_v1 = vsel %vm659_vm3, %v2380_v16, %v2412_v13  ;;  %v2341_v35 = vmul.f32 %v5450_v49, %v2329_v56  ;;  %v5991_v49 = vrot.slane %v6741_v59, %v6740_v41  ;;  %v6753_v13 = vld [vmem:[#allocation16_spill] sm:$0xff]  ;;  %v6754_v56 = vld [vmem:[#allocation11_spill] sm:$0xff]  ;;  %v6758_v41 = vld [vmem:[#allocation21_spill] sm:$0xff] }
 0x522   :  { %v2433_v36 = vadd.f32 %v5460_v63, %v2421_v1  ;;  %2502 = vrot.lane.b32.xlu0 %v5971_v58, %s3825_s28  ;;  %v6738_v63 = vld [vmem:[#allocation20_spill] sm:$0xff] }
 0x523   :  { %v2349_v28 = vadd.f32 %v2341_v35, %v2125_v62  ;;  %vm202_vm5 = vcmp.eq.s32.totalorder %v6739_v38, %v6738_v63  ;;  %vm204_vm6 = vcmp.eq.s32.totalorder %v6743_v21, %v6738_v63  ;;  %v2474_v19 = vadd.f32 %v5991_v49, %v6744_v10  ;;  %v6756_v35 = vld [vmem:[#allocation63_spill] sm:$0xff] }
 0x524   :  { %v2441_v12 = vand.u32 2147483647, %v2433_v36  ;;  %v2491_v47 = vpop.permute.xlu1 %2490  ;;  %v3096_v33 = vsel %vm202_vm5, 1.0, %v6742_v44  ;;  %v3098_v26 = vsel %vm204_vm6, 1.0, %v6742_v44  ;;  %vm205_vm7 = vcmp.eq.s32.totalorder %v6746_v55, %v6738_v63  ;;  %vm6104_vm5 = vmpackc.low %vm553_vm2, %vm553_vm2 }
 0x525   :  { %v6000_v4 = vadd.f32 %v3096_v33, %v6745_v39  ;;  %v6010_v42 = vadd.f32 %v3098_v26, %v6748_v60  ;;  %v3099_v8 = vsel %vm205_vm7, 1.0, %v6742_v44  ;;  %v2477_v20 = vadd.f32 %v5991_v49, %v6749_v15 }
 0x526   :  { %v2453_v52 = vmul.f32 %v5465_v31, %v2441_v12  ;;  %v2514_v31 = vadd.f32 %v2491_v47, %v6709_v37  ;;  %v6747_v37 = vld [vmem:[#allocation56_spill] sm:$0xff]  ;;  %v6020_v9 = vadd.f32 %v3099_v8, %v6750_v6  ;;  %vm203_vm10 = vcmp.eq.s32.totalorder %v6751_v14, %v6738_v63 }
 0x527   :  { %v2476_v32 = vadd.f32 %v5991_v49, %v6747_v37  ;;  %vm2530_vm8 = vcmp.gt.f32.partialorder %v6000_v4, 0.0  ;;  %vm2532_vm9 = vcmp.gt.f32.partialorder %v6010_v42, 0.0  ;;  %v2475_v46 = vadd.f32 %v5991_v49, %v6752_v18  ;;  %v6757_v47 = vld [vmem:[#allocation12_spill] sm:$0xff] }
 0x528   :  { %v2461_v57 = vadd.f32 %v2453_v52, %v2237_v7  ;;  %v2493_v53 = vpop.permute.xlu1 %2492  ;;  %v2522_v48 = vadd.f32 %v2514_v31, %v2474_v19  ;;  %vm2533_vm11 = vcmp.gt.f32.partialorder %v6020_v9, 0.0  ;;  %vm206_vm12 = vcmp.eq.s32.totalorder %v6754_v56, %v6738_v63  ;;  %v6763_v8 = vld [vmem:[#allocation24_spill] sm:$0xff] }
 0x529   :  { %v2524_v30 = vadd.f32 %v2516_v11, %v2476_v32  ;;  %v2515_v25 = vadd.f32 %v2493_v53, %v6712_v24  ;;  %v3100_v24 = vsel %vm206_vm12, 1.0, %v6742_v44  ;;  %v2478_v12 = vadd.f32 %v5991_v49, %v6756_v35  ;;  %v6761_v11 = vld [vmem:[#allocation23_spill] sm:$0xff] }
 0x52a   :  { %v5983_v17 = vadd.f32 %v2461_v57, %v2349_v28  ;;  %v6014_v22 = vsel %vm2530_vm8, %v2522_v48, -1e+30  ;;  %v6041_v36 = vadd.f32 %v3100_v24, %v6755_v40  ;;  %vm207_vm1 = vcmp.eq.s32.totalorder %v6757_v47, %v6738_v63 }
 0x52b   :  { %v2546_v5 = vsel %vm659_vm3, %v6014_v22, -inf  ;;  %v2540_v27 = vsel %vm2532_vm9, %v2524_v30, -1e+30  ;;  %v2523_v16 = vadd.f32 %v2515_v25, %v2475_v46  ;;  %v3101_v38 = vsel %vm207_vm1, 1.0, %v6742_v44 }
 0x52c   :  { %2504 = vrot.lane.b32.xlu1 %v5983_v17, %s3825_s28  ;;  %v2497_v3 = vpop.permute.xlu1 %2496  ;;  %v2552_v61 = vsel %vm659_vm3, %v2540_v27, -inf  ;;  %vm2534_vm14 = vcmp.gt.f32.partialorder %v6041_v36, 0.0  ;;  %v6053_v59 = vadd.f32 %v3101_v38, %v6758_v41  ;;  %vm2536_vm15 = vcmp.gt.f32.partialorder %v6761_v11, 0.0 }
 0x52d   :  { %v2517_v0 = vadd.f32 %v2497_v3, %v5791_v54  ;;  %v3097_v54 = vsel %vm203_vm10, 1.0, %v6742_v44  ;;  %v6760_v44 = vld [vmem:[#allocation84_spill] sm:$0xff]  ;;  %vm2537_vm4 = vcmp.gt.f32.partialorder %v6763_v8, 0.0 }
 0x52e   :  { %v6033_v51 = vadd.f32 %v3097_v54, %v6753_v13  ;;  %vm2535_vm0 = vcmp.gt.f32.partialorder %v6053_v59, 0.0  ;;  %v2480_v19 = vadd.f32 %v5991_v49, %v6760_v44  ;;  %v6762_v3 = vld [vmem:[#allocation72_spill] sm:$0xff] }
 0x52f   :  { %v2525_v50 = vadd.f32 %v2517_v0, %v2477_v20  ;;  %v2481_v37 = vadd.f32 %v5991_v49, %v6762_v3 }
 0x530   :  { %vm2531_vm13 = vcmp.gt.f32.partialorder %v6033_v51, 0.0 }
 0x531   :  { %v2541_v34 = vsel %vm2533_vm11, %v2525_v50, -1e+30  ;;  %v2539_v43 = vsel %vm2531_vm13, %v2523_v16, -1e+30 }
 0x532   :  { %v2555_v1 = vsel %vm659_vm3, %v2541_v34, -inf  ;;  %v2549_v7 = vsel %vm659_vm3, %v2539_v43, -inf }
 0x541   :  { %2547 = vmax.xlane.f32.xlu0 %v2546_v5 }
 0x545   :  { %2553 = vmax.xlane.f32.xlu0 %v2552_v61 }
 0x549   :  { %2556 = vmax.xlane.f32.xlu0 %v2555_v1 }
 0x54e   :  { %v2499_v2 = vpop.permute.xlu0 %2498 }
 0x54f   :  { %v2518_v62 = vadd.f32 %v2499_v2, %v5910_v23  ;;  %v6759_v23 = vld [vmem:[#allocation78_spill] sm:$0xff] }
 0x550   :  { %2550 = vmax.xlane.f32.xlu1 %v2549_v7  ;;  %v2479_v33 = vadd.f32 %v5991_v49, %v6759_v23  ;;  %v2844_v23 = vld [vmem:[%s6236_s4 + $0x18] sm:$0xff] }
 0x551   :  { %v2526_v52 = vadd.f32 %v2518_v62, %v2478_v12 }
 0x553   :  { %v2542_v28 = vsel %vm2534_vm14, %v2526_v52, -1e+30  ;;  %v2841_v52 = vld [vmem:[%s6236_s4] sm:$0xff] }
 0x554   :  { %v2558_v57 = vsel %vm659_vm3, %v2542_v28, -inf }
 0x555   :  { %2559 = vmax.xlane.f32.xlu0 %v2558_v57 }
 0x56c   :  { %v2501_v53 = vpop.permute.xlu1 %2500 }
 0x56d   :  { %v2519_v31 = vadd.f32 %v2501_v53, %v5939_v29  ;;  %v2843_v53 = vld [vmem:[%s6236_s4 + $0x10] sm:$0xff] }
 0x56f   :  { %v2527_v21 = vadd.f32 %v2519_v31, %v2479_v33  ;;  %v2845_v33 = vld [vmem:[%s6236_s4 + $0x20] sm:$0xff]  ;;  %v3431_v31 = vpack.c.bf16 %v2844_v23, %v2843_v53 }
 0x571   :  { %v6059_v45 = vsel %vm2535_vm0, %v2527_v21, -1e+30 }
 0x572   :  { %v2561_v10 = vsel %vm659_vm3, %v6059_v45, -inf }
 0x573   :  { %2562 = vmax.xlane.f32.xlu1 %v2561_v10  ;;  %v2848_v10 = vld [vmem:[%s6236_s4 + $0x38] sm:$0xff] }
 0x594   :  { %v2503_v63 = vpop.permute.xlu0 %2502 }
 0x595   :  { %v2520_v39 = vadd.f32 %v2503_v63, %v5971_v58 }
 0x597   :  { %v2528_v26 = vadd.f32 %v2520_v39, %v2480_v19 }
 0x599   :  { %v6067_v48 = vsel %vm2536_vm15, %v2528_v26, -1e+30  ;;  %v2849_v26 = vld [vmem:[%s6236_s4 + $0x40] sm:$0xff] }
 0x59a   :  { %v2564_v29 = vsel %vm659_vm3, %v6067_v48, -inf }
 0x59b   :  { %2565 = vmax.xlane.f32.xlu0 %v2564_v29  ;;  %v2850_v29 = vld [vmem:[%s6236_s4 + $0x48] sm:$0xff] }
 0x59c   :  { %v3449_v3 = vpack.c.bf16 %v2850_v29, %v2849_v26 }
 0x59e   :  { %v2505_v55 = vpop.permute.xlu1 %2504 }
 0x59f   :  { %v2521_v32 = vadd.f32 %v2505_v55, %v5983_v17 }
 0x5a1   :  { %v2529_v60 = vadd.f32 %v2521_v32, %v2481_v37 }
 0x5a3   :  { %v6075_v30 = vsel %vm2537_vm4, %v2529_v60, -1e+30 }
 0x5a4   :  { %v2567_v58 = vsel %vm659_vm3, %v6075_v30, -inf }
 0x5a5   :  { %2568 = vmax.xlane.f32.xlu1 %v2567_v58 }
 0x5ce   :  { %v2548_v0 = vpop.xlane.xlu0 %2547 }
 0x5cf   :  { %v2570_v15 = vsub.f32 %v6014_v22, %v2548_v0 }
 0x5d1   :  { %v2578_v20 = vmul.f32 1.442695, %v2570_v15 }
 0x5d2   :  { %v2554_v6 = vpop.xlane.xlu0 %2553 }
 0x5d3   :  { %3732 = vpow2.f32 %v2578_v20  ;;  %v2572_v5 = vsub.f32 %v2540_v27, %v2554_v6  ;;  %v2852_v20 = vld [vmem:[%s6236_s4 + $0x58] sm:$0xff]  ;;  %v2853_v6 = vld [vmem:[%s6236_s4 + $0x60] sm:$0xff] }
 0x5d5   :  { %v2582_v14 = vmul.f32 1.442695, %v2572_v5 }
 0x5d6   :  { %v2557_v49 = vpop.xlane.xlu0 %2556 }
 0x5d7   :  { %3734 = vpow2.f32 %v2582_v14  ;;  %v2573_v17 = vsub.f32 %v2541_v34, %v2557_v49  ;;  %v2855_v49 = vld [vmem:[%s6236_s4 + $0x70] sm:$0xff] }
 0x5d9   :  { %v2584_v54 = vmul.f32 1.442695, %v2573_v17  ;;  %v2856_v17 = vld [vmem:[%s6236_s4 + $0x78] sm:$0xff] }
 0x5db   :  { %3736 = vpow2.f32 %v2584_v54 }
 0x5dd   :  { %v3733_v50 = vpop.eup %3732  ;;  %v2551_v25 = vpop.xlane.xlu1 %2550 }
 0x5de   :  { %v2571_v61 = vsub.f32 %v2539_v43, %v2551_v25  ;;  %v2594_v18 = vmul.f32 %v3733_v50, %v6000_v4  ;;  %v3467_v50 = vpack.c.bf16 %v2856_v17, %v2855_v49 }
 0x5e0   :  { %v2580_v46 = vmul.f32 1.442695, %v2571_v61  ;;  %3315 = vmatprep.mubr.msk.f32.mxu0 %vm659_vm3, %v2594_v18  ;;  %v2602_v13 = vsel %vm659_vm3, %v2594_v18, 0.0 }
 0x5e1   :  { %v3735_v22 = vpop.eup %3734  ;;  %2603 = vadd.xlane.f32.xlu0 %v2602_v13  ;;  %v6766_v13 = vld [vmem:[#allocation7_spill] sm:$0xff] }
 0x5e2   :  { %3738 = vpow2.f32 %v2580_v46  ;;  %v2560_v27 = vpop.xlane.xlu0 %2559  ;;  %v2596_v56 = vmul.f32 %v3735_v22, %v6010_v42  ;;  %v6196_v46 = vld [vmem:[%s6235_s3 + $0x10] sm:$0x7]  ;;  %s3842_s3 = smov [#allocation2]  }
 0x5e3   :  { %v2574_v16 = vsub.f32 %v2542_v28, %v2560_v27  ;;  %v6200_v22 = vrot.slane %v6196_v46, %v6766_v13  ;;  %s3051_s12 = sshll.u32 %s3842_s3, 4  ;;  %s3052_s12 = int_to_ptr.vmem [resolvable:$true] %s3051_s12 }
 0x5e4   :  { %v2608_v34 = vsel %vm659_vm3, %v2596_v56, 0.0  ;;  %s3781_s13 = scalar_lea.vmem %s3052_s12, 1024  ;;  %p3786_p1 = scmp.lt.s32.totalorder %s3052_s12, %s3052_s12 }
 0x5e5   :  { %v2586_v1 = vmul.f32 1.442695, %v2574_v16  ;;  %2609 = vadd.xlane.f32.xlu0 %v2608_v34  ;;  %v3737_v24 = vpop.eup %3736  ;;  %p3782_p0 = scmp.ne.s32.totalorder %s3052_s12, %s3781_s13  ;;  %p3787_p2 = scmp.lt.s32.totalorder %s3781_s13, %s3781_s13 }
 0x5e6   :  { %v2597_v2 = vmul.f32 %v3737_v24, %v6020_v9 }
 0x5e7   :  { %3740 = vpow2.f32 %v2586_v1  ;;  %p3788_p3 = por %p3787_p2, %p3786_p1 }
 0x5e8   :  { %v2611_v12 = vsel %vm659_vm3, %v2597_v2, 0.0 }
 0x5e9   :  { %p3789_p4 = pnand %p3788_p3, %p3782_p0 }
 0x5ec   :  { %v3739_v4 = vpop.eup %3738 }
 0x5ed   :  { %v2595_v43 = vmul.f32 %v3739_v4, %v6033_v51 }
 0x5ef   :  { %3316 = vmatmul.mubr.msk.f32.vlgmr.msra.gmra.mrb[22].mxu0 %vm659_vm3, %v2595_v43  ;;  %v2605_v40 = vsel %vm659_vm3, %v2595_v43, 0.0 }
 0x5f0   :  { %2606 = vadd.xlane.f32.xlu1 %v2605_v40  ;;  %3318 = vmatprep.mubr.msk.f32.mxu0 %vm659_vm3, %v2596_v56 }
 0x5f1   :  { %v3741_v42 = vpop.eup %3740 }
 0x5f2   :  { %v2598_v35 = vmul.f32 %v3741_v42, %v6041_v36  ;;  %v2842_v36 = vld [vmem:[%s6236_s4 + $0x8] sm:$0xff] }
 0x5f3   :  { %3319 = vmatmul.mubr.msk.f32.gmra.mrb[24].mxu0 %vm659_vm3, %v2597_v2  ;;  %v3425_v57 = vpack.c.bf16 %v2842_v36, %v2841_v52 }
 0x5f4   :  { %2612 = vadd.xlane.f32.xlu1 %v2611_v12  ;;  %3321 = vmatprep.mubr.msk.f32.mxu0 %vm659_vm3, %v2598_v35  ;;  %v2614_v51 = vsel %vm659_vm3, %v2598_v35, 0.0 }
 0x5f5   :  { %2615 = vadd.xlane.f32.xlu0 %v2614_v51  ;;  %3427 = vmatprep.subr.msk.bf16.mxu1 %vm6104_vm5, %v3425_v57 }
 0x5f6   :  { %3430 = vmatpush3.bf16.xpose.msk.msra.mxu1 %vm6104_vm5, %v3425_v57 }
 0x5f7   :  { %3433 = vmatprep.subr.msk.bf16.mxu1 %vm6104_vm5, %v3431_v31 }
 0x5fe   :  { %3436 = vmatpush3.bf16.xpose.msk.msra.mxu1 %vm6104_vm5, %v3431_v31 }
 0x600   :  { %v2563_v62 = vpop.xlane.xlu1 %2562 }
 0x601   :  { %v2575_v7 = vsub.f32 %v6059_v45, %v2563_v62  ;;  %v2847_v45 = vld [vmem:[%s6236_s4 + $0x30] sm:$0xff] }
 0x602   :  { %v3443_v19 = vpack.c.bf16 %v2848_v10, %v2847_v45 }
 0x603   :  { %v2588_v9 = vmul.f32 1.442695, %v2575_v7 }
 0x605   :  { %3742 = vpow2.f32 %v2588_v9 }
 0x60f   :  { %v3743_v47 = vpop.eup %3742 }
 0x610   :  { %v2599_v38 = vmul.f32 %v3743_v47, %v6053_v59  ;;  %v2846_v59 = vld [vmem:[%s6236_s4 + $0x28] sm:$0xff] }
 0x611   :  { %v3437_v21 = vpack.c.bf16 %v2846_v59, %v2845_v33 }
 0x612   :  { %3322 = vmatmul.mubr.msk.f32.gmra.mrb[26].mxu0 %vm659_vm3, %v2599_v38  ;;  %v2617_v41 = vsel %vm659_vm3, %v2599_v38, 0.0 }
 0x613   :  { %2618 = vadd.xlane.f32.xlu1 %v2617_v41  ;;  %3439 = vmatprep.subr.msk.bf16.mxu1 %vm6104_vm5, %v3437_v21 }
 0x614   :  { %3442 = vmatpush3.bf16.xpose.msk.msra.mxu1 %vm6104_vm5, %v3437_v21 }
 0x615   :  { %3445 = vmatprep.subr.msk.bf16.mxu1 %vm6104_vm5, %v3443_v19 }
 0x61c   :  { %3448 = vmatpush3.bf16.xpose.msk.msra.mxu1 %vm6104_vm5, %v3443_v19 }
 0x61d   :  { %3451 = vmatprep.subr.msk.bf16.mxu1 %vm6104_vm5, %v3449_v3 }
 0x624   :  { %3454 = vmatpush3.bf16.xpose.msk.msra.mxu1 %vm6104_vm5, %v3449_v3 }
 0x628   :  { %v2566_v63 = vpop.xlane.xlu0 %2565 }
 0x629   :  { %v2576_v44 = vsub.f32 %v6067_v48, %v2566_v63 }
 0x62b   :  { %v2590_v39 = vmul.f32 1.442695, %v2576_v44 }
 0x62d   :  { %3744 = vpow2.f32 %v2590_v39 }
 0x632   :  { %v2569_v55 = vpop.xlane.xlu1 %2568 }
 0x633   :  { %v2577_v48 = vsub.f32 %v6075_v30, %v2569_v55 }
 0x635   :  { %v2592_v37 = vmul.f32 1.442695, %v2577_v48 }
 0x637   :  { %v3745_v32 = vpop.eup %3744  ;;  %3746 = vpow2.f32 %v2592_v37 }
 0x638   :  { %v2600_v60 = vmul.f32 %v3745_v32, %v6761_v11  ;;  %v2851_v11 = vld [vmem:[%s6236_s4 + $0x50] sm:$0xff] }
 0x639   :  { %v3455_v5 = vpack.c.bf16 %v2852_v20, %v2851_v11 }
 0x63a   :  { %3324 = vmatprep.mubr.msk.f32.mxu0 %vm659_vm3, %v2600_v60  ;;  %v2620_v58 = vsel %vm659_vm3, %v2600_v60, 0.0 }
 0x63b   :  { %2621 = vadd.xlane.f32.xlu0 %v2620_v58  ;;  %3457 = vmatprep.subr.msk.bf16.mxu1 %vm6104_vm5, %v3455_v5 }
 0x63c   :  { %3460 = vmatpush3.bf16.xpose.msk.msra.mxu1 %vm6104_vm5, %v3455_v5 }
 0x641   :  { %v3747_v30 = vpop.eup %3746 }
 0x642   :  { %v2601_v0 = vmul.f32 %v3747_v30, %v6763_v8  ;;  %v2854_v8 = vld [vmem:[%s6236_s4 + $0x68] sm:$0xff] }
 0x643   :  { %v3461_v14 = vpack.c.bf16 %v2854_v8, %v2853_v6 }
 0x644   :  { %3325 = vmatmul.mubr.msk.f32.gmra.mrb[28].mxu0 %vm659_vm3, %v2601_v0  ;;  %v2623_v15 = vsel %vm659_vm3, %v2601_v0, 0.0 }
 0x645   :  { %2624 = vadd.xlane.f32.xlu1 %v2623_v15  ;;  %3463 = vmatprep.subr.msk.bf16.mxu1 %vm6104_vm5, %v3461_v14 }
 0x646   :  { %3466 = vmatpush3.bf16.xpose.msk.msra.mxu1 %vm6104_vm5, %v3461_v14 }
 0x647   :  { %3469 = vmatprep.subr.msk.bf16.mxu1 %vm6104_vm5, %v3467_v50 }
 0x64e   :  { %3472 = vmatpush3.bf16.xpose.msk.msra.mxu1 %vm6104_vm5, %v3467_v50 }
 0x66e   :  { %v2604_v25 = vpop.xlane.xlu0 %2603 }
 0x672   :  { %v2610_v18 = vpop.xlane.xlu0 %2609 }
 0x67d   :  { %v2607_v54 = vpop.xlane.xlu1 %2606 }
 0x67e   :  { %3748 = vrcp.f32 %v2607_v54 }
 0x67f   :  { %3750 = vrcp.f32 %v2604_v25 }
 0x681   :  { %v2613_v61 = vpop.xlane.xlu1 %2612 }
 0x682   :  { %3752 = vrcp.f32 %v2613_v61  ;;  %v2616_v45 = vpop.xlane.xlu0 %2615 }
 0x683   :  { %3754 = vrcp.f32 %v2610_v18 }
 0x688   :  { %v3749_v27 = vpop.eup %3748 }
 0x689   :  { %v3751_v16 = vpop.eup %3750 }
 0x68c   :  { %v3753_v43 = vpop.eup %3752 }
 0x68d   :  { %v3755_v42 = vpop.eup %3754 }
 0x6a0   :  { %v2619_v59 = vpop.xlane.xlu1 %2618 }
 0x6c2   :  { %v3317_v56 = vpop.f32.mrb[22].mxu0 }
 0x6c3   :  { %v2774_v34 = vmul.f32 %v3749_v27, %v3317_v56  ;;  %v2726_v1 = vpop.f32.mrb[23].mxu0 }
 0x6c4   :  { %v2773_v24 = vmul.f32 %v3751_v16, %v2726_v1 }
 0x6c5   :  { %v2786_v4 = vadd.f32 %v6200_v22, %v2774_v34 }
 0x6c6   :  { %v2785_v40 = vadd.f32 %v6200_v22, %v2773_v24  ;;  %v3320_v2 = vpop.f32.mrb[24].mxu0 }
 0x6c7   :  { %v2802_v35 = vmin.f32 %v2786_v4, 0.0  ;;  %v2776_v12 = vmul.f32 %v3753_v43, %v3320_v2  ;;  %v2736_v51 = vpop.f32.mrb[25].mxu0  ;;  %vm2794_vm6 = vcmp.gt.f32.partialorder %v2786_v4, 0.0 }
 0x6c8   :  { %v2801_v62 = vmin.f32 %v2785_v40, 0.0  ;;  %v2775_v7 = vmul.f32 %v3755_v42, %v2736_v51  ;;  %vm2793_vm3 = vcmp.gt.f32.partialorder %v2785_v40, 0.0  ;;  %v2622_v54 = vpop.xlane.xlu0 %2621 }
 0x6c9   :  { %v2811_v9 = vmul.f32 1.442695, %v2802_v35  ;;  %v2788_v52 = vadd.f32 %v6200_v22, %v2776_v12 }
 0x6ca   :  { %v2809_v36 = vmul.f32 1.442695, %v2801_v62  ;;  %v2787_v28 = vadd.f32 %v6200_v22, %v2775_v7  ;;  %v6767_v62 = vld [vmem:[#allocation89_spill] sm:$0xff] }
 0x6cb   :  { %3756 = vpow2.f32 %v2811_v9  ;;  %v2804_v57 = vmin.f32 %v2788_v52, 0.0  ;;  %vm2796_vm8 = vcmp.gt.f32.partialorder %v2788_v52, 0.0 }
 0x6cc   :  { %3758 = vpow2.f32 %v2809_v36  ;;  %v2803_v47 = vmin.f32 %v2787_v28, 0.0  ;;  %vm2795_vm7 = vcmp.gt.f32.partialorder %v2787_v28, 0.0 }
 0x6cd   :  { %v2815_v38 = vmul.f32 1.442695, %v2804_v57 }
 0x6ce   :  { %v2813_v41 = vmul.f32 1.442695, %v2803_v47 }
 0x6cf   :  { %3760 = vpow2.f32 %v2815_v38 }
 0x6d0   :  { %3762 = vpow2.f32 %v2813_v41 }
 0x6d1   :  { %3764 = vrcp.f32 %v2619_v59 }
 0x6d2   :  { %3766 = vrcp.f32 %v2616_v45  ;;  %v2625_v50 = vpop.xlane.xlu1 %2624 }
 0x6d5   :  { %v3757_v53 = vpop.eup %3756 }
 0x6d6   :  { %v3759_v23 = vpop.eup %3758  ;;  %v3158_v33 = vadd.f32 -1.0, %v3757_v53 }
 0x6d7   :  { %v3157_v31 = vadd.f32 -1.0, %v3759_v23 }
 0x6d8   :  { %v2834_v44 = vsel %vm2794_vm6, %v2786_v4, %v3158_v33 }
 0x6d9   :  { %v3761_v21 = vpop.eup %3760  ;;  %v2833_v10 = vsel %vm2793_vm3, %v2785_v40, %v3157_v31 }
 0x6da   :  { %v3763_v63 = vpop.eup %3762  ;;  %3359 = vmatprep.mubr.msk.f32.mxu1 %vm553_vm2, %v2833_v10  ;;  %v3160_v19 = vadd.f32 -1.0, %v3761_v21 }
 0x6db   :  { %3360 = vmatmul.mubr.msk.f32.vlgmr.msra.gmra.mrb[8].mxu1 %vm553_vm2, %v2834_v44  ;;  %v3159_v39 = vadd.f32 -1.0, %v3763_v63  ;;  %v3765_v55 = vpop.eup %3764 }
 0x6dc   :  { %v2836_v29 = vsel %vm2796_vm8, %v2788_v52, %v3160_v19  ;;  %v3767_v48 = vpop.eup %3766 }
 0x6dd   :  { %v2835_v26 = vsel %vm2795_vm7, %v2787_v28, %v3159_v39 }
 0x6de   :  { %3362 = vmatprep.mubr.msk.f32.mxu1 %vm553_vm2, %v2835_v26 }
 0x6df   :  { %3363 = vmatmul.mubr.msk.f32.gmra.mrb[10].mxu1 %vm553_vm2, %v2836_v29 }
 0x6e5   :  { %v3323_v3 = vpop.f32.mrb[26].mxu0 }
 0x6e6   :  { %v2778_v37 = vmul.f32 %v3765_v55, %v3323_v3  ;;  %v2746_v32 = vpop.f32.mrb[27].mxu0 }
 0x6e7   :  { %v2777_v60 = vmul.f32 %v3767_v48, %v2746_v32 }
 0x6e8   :  { %v2790_v58 = vadd.f32 %v6200_v22, %v2778_v37 }
 0x6e9   :  { %v2789_v30 = vadd.f32 %v6200_v22, %v2777_v60 }
 0x6ea   :  { %v2806_v0 = vmin.f32 %v2790_v58, 0.0  ;;  %vm2798_vm10 = vcmp.gt.f32.partialorder %v2790_v58, 0.0 }
 0x6eb   :  { %v2805_v15 = vmin.f32 %v2789_v30, 0.0  ;;  %vm2797_vm9 = vcmp.gt.f32.partialorder %v2789_v30, 0.0 }
 0x6ec   :  { %v2819_v11 = vmul.f32 1.442695, %v2806_v0 }
 0x6ed   :  { %v2817_v20 = vmul.f32 1.442695, %v2805_v15 }
 0x6ee   :  { %3768 = vpow2.f32 %v2819_v11 }
 0x6ef   :  { %3770 = vpow2.f32 %v2817_v20 }
 0x6f0   :  { %3772 = vrcp.f32 %v2625_v50 }
 0x6f1   :  { %3774 = vrcp.f32 %v2622_v54 }
 0x6f8   :  { %v3769_v6 = vpop.eup %3768 }
 0x6f9   :  { %v3771_v5 = vpop.eup %3770  ;;  %v3162_v8 = vadd.f32 -1.0, %v3769_v6 }
 0x6fa   :  { %v3161_v14 = vadd.f32 -1.0, %v3771_v5  ;;  %v3773_v25 = vpop.eup %3772 }
 0x6fb   :  { %v2838_v17 = vsel %vm2798_vm10, %v2790_v58, %v3162_v8  ;;  %v3775_v18 = vpop.eup %3774 }
 0x6fc   :  { %v2837_v49 = vsel %vm2797_vm9, %v2789_v30, %v3161_v14 }
 0x6fd   :  { %3365 = vmatprep.mubr.msk.f32.mxu1 %vm553_vm2, %v2837_v49 }
 0x6fe   :  { %3366 = vmatmul.mubr.msk.f32.gmra.mrb[12].mxu1 %vm553_vm2, %v2838_v17 }
 0x717   :  { %v3326_v61 = vpop.f32.mrb[28].mxu0 }
 0x718   :  { %v2780_v13 = vmul.f32 %v3773_v25, %v3326_v61  ;;  %v2756_v27 = vpop.f32.mrb[29].mxu0 }
 0x719   :  { %v2779_v56 = vmul.f32 %v3775_v18, %v2756_v27 }
 0x71a   :  { %v2792_v16 = vadd.f32 %v6200_v22, %v2780_v13 }
 0x71b   :  { %v2791_v34 = vadd.f32 %v6200_v22, %v2779_v56  ;;  %v2860_v22 = vrot.slane %v6196_v46, %v6767_v62 }
 0x71c   :  { %v2808_v1 = vmin.f32 %v2792_v16, 0.0  ;;  %vm2800_vm12 = vcmp.gt.f32.partialorder %v2792_v16, 0.0 }
 0x71d   :  { %v2807_v24 = vmin.f32 %v2791_v34, 0.0  ;;  %vm2799_vm11 = vcmp.gt.f32.partialorder %v2791_v34, 0.0 }
 0x71e   :  { %v2823_v4 = vmul.f32 1.442695, %v2808_v1 }
 0x71f   :  { %v2821_v43 = vmul.f32 1.442695, %v2807_v24 }
 0x720   :  { %3776 = vpow2.f32 %v2823_v4 }
 0x721   :  { %3778 = vpow2.f32 %v2821_v43 }
 0x72a   :  { %v3777_v40 = vpop.eup %3776 }
 0x72b   :  { %v3779_v2 = vpop.eup %3778  ;;  %v3164_v42 = vadd.f32 -1.0, %v3777_v40 }
 0x72c   :  { %v3163_v35 = vadd.f32 -1.0, %v3779_v2 }
 0x72d   :  { %v2840_v51 = vsel %vm2800_vm12, %v2792_v16, %v3164_v42 }
 0x72e   :  { %v2839_v12 = vsel %vm2799_vm11, %v2791_v34, %v3163_v35 }
 0x72f   :  { %3368 = vmatprep.mubr.msk.f32.mxu1 %vm553_vm2, %v2839_v12 }
 0x730   :  { %3369 = vmatmul.mubr.msk.f32.gmra.mrb[14].mxu1 %vm553_vm2, %v2840_v51 }
 0x7ae   :  { %v3361_v7 = vpop.f32.mrb[8].mxu1 }
 0x7af   :  { %v3005_v9 = vadd.f32 %v3361_v7, %v2860_v22  ;;  %v2999_v52 = vpop.f32.mrb[9].mxu1 }
 0x7b0   :  { %v3000_v36 = vadd.f32 %v2999_v52, %v2860_v22 }
 0x7b1   :  { %3039 = vst [vmem:[#allocation2 + $0x8] sm:$0xff] %v3005_v9 }
 0x7b2   :  { %3038 = vst [vmem:[#allocation2] sm:$0xff] %v3000_v36  ;;  %v3364_v28 = vpop.f32.mrb[10].mxu1 }
 0x7b3   :  { %v3015_v57 = vadd.f32 %v3364_v28, %v2860_v22  ;;  %v3009_v47 = vpop.f32.mrb[11].mxu1 }
 0x7b4   :  { %v3010_v38 = vadd.f32 %v3009_v47, %v2860_v22 }
 0x7b5   :  { %3041 = vst [vmem:[#allocation2 + $0x18] sm:$0xff] %v3015_v57 }
 0x7b6   :  { %3040 = vst [vmem:[#allocation2 + $0x10] sm:$0xff] %v3010_v38 }
 0x7d1   :  { %v3367_v41 = vpop.f32.mrb[12].mxu1 }
 0x7d2   :  { %v3025_v53 = vadd.f32 %v3367_v41, %v2860_v22  ;;  %v3019_v23 = vpop.f32.mrb[13].mxu1 }
 0x7d3   :  { %v3020_v33 = vadd.f32 %v3019_v23, %v2860_v22 }
 0x7d4   :  { %3043 = vst [vmem:[#allocation2 + $0x28] sm:$0xff] %v3025_v53 }
 0x7d5   :  { %3042 = vst [vmem:[#allocation2 + $0x20] sm:$0xff] %v3020_v33 }
 0x803   :  { %v3370_v46 = vpop.f32.mrb[14].mxu1 }
 0x804   :  { %v3035_v31 = vadd.f32 %v3370_v46, %v2860_v22  ;;  %v3029_v59 = vpop.f32.mrb[15].mxu1 }
 0x805   :  { %v3030_v21 = vadd.f32 %v3029_v59, %v2860_v22 }
 0x806   :  { %3045 = vst [vmem:[#allocation2 + $0x38] sm:$0xff] %v3035_v31 }
 0x807   :  { %3044 = vst [vmem:[#allocation2 + $0x30] sm:$0xff] %v3030_v21 }
 0x808   :  { %3792 = shalt.err (!%p3789_p4)
}
 0x809   :  { %s3793_s16 = scalar_lea.hbm %s6237_s5, 1024 }
 0x80a   :  { %p3794_p5 = scmp.ne.s32.totalorder %s6237_s5, %s3793_s16  ;;  %p3797_p6 = scmp.lt.u32.totalorder %s3793_s16, %s6237_s5 }
 0x80c   :  { %p3799_p7 = pnand %p3797_p6, %p3794_p5 }
 0x80e   :  { %3802 = shalt.err (!%p3799_p7)
}
 0x80f   :  { %s3843_s20 = smov 128   ;;  %s3844_s21 = smov 8  }
 0x810   :  { %3057 = dma.vmem_to_hbm [thread:$0]  %s3052_s12, 1024, %s6237_s5, [#allocation3], %s3843_s20, %s3843_s20, %s3844_s21  }
 0x811   :  { %3803 = dma.done.wait [#allocation3], 1024  }
 0x812   :  { %3804 = vsyncadd [#allocation3], 4294966272 }
 0x813   :  { %3061 = vsyncpa [#allocation3], 1 }

</bundles_post_ra>
